<compile_context>
chip_gen: v7x
topology: tpu7x:2x2x1
jax: 0.10.0
libtpu: 0.0.40
codegen_flags: <defaults>
</compile_context>

<pallas_src>
import functools

import jax
import jax.numpy as jnp
from jax.experimental import pallas as pl
from jax.experimental.pallas import tpu as pltpu

DIM_CAPS = 16
H1 = 512
H2 = 1024
OUT_PATCH = (1, 28, 28)
OUT_DIM = OUT_PATCH[0] * OUT_PATCH[1] * OUT_PATCH[2]  # 784
OUT_DIM_PAD = 896                                     # 7 * 128, lane-dense


def _round_up(v, m):
    return (v + m - 1) // m * m


def _decoder_kernel(x_ref, w1_ref, b1_ref, w2_ref, b2_ref, w3_ref, b3_ref, o_ref):
    # Fused 3-layer MLP on one batch tile; all weights resident in VMEM.
    x = x_ref[...]                                                   # bf16 (bb, 16)
    h1 = jnp.dot(x, w1_ref[...], preferred_element_type=jnp.float32) + b1_ref[...]
    h1 = jnp.maximum(h1, 0.0).astype(jnp.bfloat16)                   # ReLU, bf16 feed
    h2 = jnp.dot(h1, w2_ref[...], preferred_element_type=jnp.float32) + b2_ref[...]
    h2 = jnp.maximum(h2, 0.0).astype(jnp.bfloat16)                   # ReLU, bf16 feed
    logits = jnp.dot(h2, w3_ref[...], preferred_element_type=jnp.float32) + b3_ref[...]
    # sigmoid(x) = 1 / (1 + exp(-x)); exp on the EUP, approx reciprocal off the VALU.
    e = jnp.exp(-logits)
    o_ref[...] = pl.reciprocal(1.0 + e, approx=True).astype(o_ref.dtype)


def prepare_params(params):
    """One-time weight prep: bf16 cast for the MXU, fc3 padded to 896 lanes."""
    w1, b1, w2, b2, w3, b3 = params
    w1_bf = w1.astype(jnp.bfloat16)
    w2_bf = w2.astype(jnp.bfloat16)
    w3_bf = jnp.pad(w3, ((0, 0), (0, OUT_DIM_PAD - OUT_DIM))).astype(jnp.bfloat16)
    b3_p = jnp.pad(b3, ((0, 0), (0, OUT_DIM_PAD - OUT_DIM)))
    return (w1_bf, b1, w2_bf, b2, w3_bf, b3_p)


@functools.partial(jax.jit, static_argnames=("block_b",))
def linear_decoder(x, prepared_params, block_b=256):
    """x: [B, DIM_CAPS] float32 -> [B, 1, 28, 28] float32."""
    w1_bf, b1, w2_bf, b2, w3_bf, b3_p = prepared_params
    B = x.shape[0]

    # Batch tile: at most block_b, sublane (8) aligned; when B is large enough,
    # force >=2 tiles so the 'parallel' axis can shard across two TensorCores.
    bb = min(block_b, _round_up(B, 8))
    if _round_up(B, bb) // bb < 2 and B >= 16:
        bb = _round_up((B + 1) // 2, 8)
    B_pad = _round_up(B, bb)

    if B_pad != B:
        x = jnp.pad(x, ((0, B_pad - B), (0, 0)))
    x_bf = x.astype(jnp.bfloat16)

    grid = (B_pad // bb,)

    weight_bytes = (DIM_CAPS * H1 + H1 * H2 + H2 * OUT_DIM_PAD) * 2
    bias_bytes = (H1 + H2 + OUT_DIM_PAD) * 4
    cost = pl.CostEstimate(
        flops=2 * B_pad * (DIM_CAPS * H1 + H1 * H2 + H2 * OUT_DIM_PAD),
        transcendentals=B_pad * OUT_DIM_PAD,
        bytes_accessed=B_pad * DIM_CAPS * 2 + weight_bytes + bias_bytes
        + B_pad * OUT_DIM_PAD * 4,
    )

    out2d = pl.pallas_call(
        _decoder_kernel,
        out_shape=jax.ShapeDtypeStruct((B_pad, OUT_DIM_PAD), jnp.float32),
        grid_spec=pltpu.PrefetchScalarGridSpec(
            num_scalar_prefetch=0,
            grid=grid,
            in_specs=[
                # batch tile of the input
                pl.BlockSpec((bb, DIM_CAPS), lambda i: (i, 0)),
                # weights / biases: full arrays, constant block -> stay resident
                pl.BlockSpec((DIM_CAPS, H1), lambda i: (0, 0)),
                pl.BlockSpec((1, H1), lambda i: (0, 0)),
                pl.BlockSpec((H1, H2), lambda i: (0, 0)),
                pl.BlockSpec((1, H2), lambda i: (0, 0)),
                pl.BlockSpec((H2, OUT_DIM_PAD), lambda i: (0, 0)),
                pl.BlockSpec((1, OUT_DIM_PAD), lambda i: (0, 0)),
            ],
            out_specs=pl.BlockSpec((bb, OUT_DIM_PAD), lambda i: (i, 0)),
        ),
        compiler_params=pltpu.CompilerParams(
            dimension_semantics=("parallel",),
            vmem_limit_bytes=48 * 1024 * 1024,
        ),
        cost_estimate=cost,
    )(x_bf, w1_bf, b1, w2_bf, b2, w3_bf, b3_p)

    # Glue: drop batch padding + lane padding, then PyTorch's view(-1, 1, 28, 28).
    out2d = out2d[:B, :OUT_DIM]
    return out2d.reshape(-1, *OUT_PATCH)


def init_params(key):
    """Deterministic init mirroring nn.Linear's default U(-1/sqrt(fan_in), +)."""
    def linear_init(k, fan_in, fan_out):
        kw, kb = jax.random.split(k)
        bound = 1.0 / jnp.sqrt(fan_in)
        # stored as [in, out] (transpose of PyTorch layout) for x @ W
        w = jax.random.uniform(kw, (fan_in, fan_out), jnp.float32, -bound, bound)
        b = jax.random.uniform(kb, (1, fan_out), jnp.float32, -bound, bound)
        return w, b

    k1, k2, k3 = jax.random.split(key, 3)
    w1, b1 = linear_init(k1, DIM_CAPS, H1)
    w2, b2 = linear_init(k2, H1, H2)
    w3, b3 = linear_init(k3, H2, OUT_DIM)
    return (w1, b1, w2, b2, w3, b3)


def _reference_f32(x, params):
    """Pure f32 reference matching the PyTorch module."""
    w1, b1, w2, b2, w3, b3 = params
    h1 = jax.nn.relu(x @ w1 + b1)
    h2 = jax.nn.relu(h1 @ w2 + b2)
    y = jax.nn.sigmoid(h2 @ w3 + b3)
    return y.reshape(-1, *OUT_PATCH)


def _reference_bf16(x, params):
    """Reference emulating the kernel's bf16-operand / f32-accumulate path."""
    w1, b1, w2, b2, w3, b3 = params

    def bf(a):
        return a.astype(jnp.bfloat16).astype(jnp.float32)

    h1 = jax.nn.relu(bf(x) @ bf(w1) + b1)
    h2 = jax.nn.relu(bf(h1) @ bf(w2) + b2)
    y = jax.nn.sigmoid(bf(h2) @ bf(w3) + b3)
    return y.reshape(-1, *OUT_PATCH)


if __name__ == "__main__":
    key = jax.random.PRNGKey(0)
    kp, kx = jax.random.split(key)
    params = init_params(kp)
    prepared = prepare_params(params)

    # Small demo batch (single tile).
    B = 8
    x = jax.random.normal(kx, (B, DIM_CAPS), jnp.float32)
    out = jax.block_until_ready(linear_decoder(x, prepared))
    assert out.shape == (B, *OUT_PATCH), out.shape
    ref_bf = _reference_bf16(x, params)
    assert jnp.allclose(out, ref_bf, atol=5e-3, rtol=5e-3), "mismatch vs bf16 reference"
    ref_f32 = _reference_f32(x, params)
    assert jnp.allclose(out, ref_f32, atol=3e-2, rtol=3e-2), "mismatch vs f32 reference"

    # Ragged batch exercising padding + a 2-tile parallel grid.
    B2 = 20
    x2 = jax.random.normal(jax.random.PRNGKey(1), (B2, DIM_CAPS), jnp.float32)
    out2 = jax.block_until_ready(linear_decoder(x2, prepared))
    assert out2.shape == (B2, *OUT_PATCH), out2.shape
    assert jnp.allclose(out2, _reference_bf16(x2, params), atol=5e-3, rtol=5e-3)

    print("KERNEL_OK")
</pallas_src>

<mosaic_0001>
module attributes {stable_mosaic.version = 11 : i64} {
  func.func @_decoder_kernel(%arg0: i32, %arg1: memref<8x16xbf16, #tpu.memory_space<vmem>>, %arg2: memref<16x512xbf16, #tpu.memory_space<vmem>>, %arg3: memref<1x512xf32, #tpu.memory_space<vmem>>, %arg4: memref<512x1024xbf16, #tpu.memory_space<vmem>>, %arg5: memref<1x1024xf32, #tpu.memory_space<vmem>>, %arg6: memref<1024x896xbf16, #tpu.memory_space<vmem>>, %arg7: memref<1x896xf32, #tpu.memory_space<vmem>>, %arg8: memref<8x896xf32, #tpu.memory_space<vmem>>) attributes {dimension_semantics = [#tpu.dimension_semantics<parallel>], iteration_bounds = array<i64: 1>, scalar_prefetch = 0 : i64, scratch_operands = 0 : i64, tpu.core_type = #tpu.core_type<tc>, window_params = [{transform_indices = @transform_0, window_bounds = array<i64: 8, 16>}, {pipeline_mode = #tpu.pipeline_mode<synchronous>, transform_indices = @transform_1, window_bounds = array<i64: 16, 512>}, {pipeline_mode = #tpu.pipeline_mode<synchronous>, transform_indices = @transform_2, window_bounds = array<i64: 1, 512>}, {pipeline_mode = #tpu.pipeline_mode<synchronous>, transform_indices = @transform_3, window_bounds = array<i64: 512, 1024>}, {pipeline_mode = #tpu.pipeline_mode<synchronous>, transform_indices = @transform_4, window_bounds = array<i64: 1, 1024>}, {pipeline_mode = #tpu.pipeline_mode<synchronous>, transform_indices = @transform_5, window_bounds = array<i64: 1024, 896>}, {pipeline_mode = #tpu.pipeline_mode<synchronous>, transform_indices = @transform_6, window_bounds = array<i64: 1, 896>}, {transform_indices = @transform_7, window_bounds = array<i64: 8, 896>}]} {
    %c0 = arith.constant 0 : index
    %c0_0 = arith.constant 0 : index
    %0 = vector.load %arg1[%c0, %c0_0] : memref<8x16xbf16, #tpu.memory_space<vmem>>, vector<8x16xbf16>
    %c0_1 = arith.constant 0 : index
    %c0_2 = arith.constant 0 : index
    %1 = vector.load %arg2[%c0_1, %c0_2] : memref<16x512xbf16, #tpu.memory_space<vmem>>, vector<16x512xbf16>
    %cst = arith.constant dense<0.000000e+00> : vector<8x512xf32>
    %2 = tpu.matmul %0, %1, %cst {dimension_numbers = #tpu.dot_dimension_numbers<[1], [0], [0], [1], [0, 0, 1, 1], [], []>} : vector<8x16xbf16>, vector<16x512xbf16>, vector<8x512xf32> -> vector<8x512xf32>
    %c0_3 = arith.constant 0 : index
    %c0_4 = arith.constant 0 : index
    %3 = vector.load %arg3[%c0_3, %c0_4] : memref<1x512xf32, #tpu.memory_space<vmem>>, vector<1x512xf32>
    %4 = vector.broadcast %3 : vector<1x512xf32> to vector<8x512xf32>
    %5 = arith.addf %2, %4 : vector<8x512xf32>
    %cst_5 = arith.constant 0.000000e+00 : f32
    %6 = vector.broadcast %cst_5 : f32 to vector<8x512xf32>
    %7 = arith.maximumf %5, %6 : vector<8x512xf32>
    %8 = arith.truncf %7 : vector<8x512xf32> to vector<8x512xbf16>
    %c0_6 = arith.constant 0 : index
    %c0_7 = arith.constant 0 : index
    %9 = vector.load %arg4[%c0_6, %c0_7] : memref<512x1024xbf16, #tpu.memory_space<vmem>>, vector<512x1024xbf16>
    %cst_8 = arith.constant dense<0.000000e+00> : vector<8x1024xf32>
    %10 = tpu.matmul %8, %9, %cst_8 {dimension_numbers = #tpu.dot_dimension_numbers<[1], [0], [0], [1], [0, 0, 1, 1], [], []>} : vector<8x512xbf16>, vector<512x1024xbf16>, vector<8x1024xf32> -> vector<8x1024xf32>
    %c0_9 = arith.constant 0 : index
    %c0_10 = arith.constant 0 : index
    %11 = vector.load %arg5[%c0_9, %c0_10] : memref<1x1024xf32, #tpu.memory_space<vmem>>, vector<1x1024xf32>
    %12 = vector.broadcast %11 : vector<1x1024xf32> to vector<8x1024xf32>
    %13 = arith.addf %10, %12 : vector<8x1024xf32>
    %cst_11 = arith.constant 0.000000e+00 : f32
    %14 = vector.broadcast %cst_11 : f32 to vector<8x1024xf32>
    %15 = arith.maximumf %13, %14 : vector<8x1024xf32>
    %16 = arith.truncf %15 : vector<8x1024xf32> to vector<8x1024xbf16>
    %c0_12 = arith.constant 0 : index
    %c0_13 = arith.constant 0 : index
    %17 = vector.load %arg6[%c0_12, %c0_13] : memref<1024x896xbf16, #tpu.memory_space<vmem>>, vector<1024x896xbf16>
    %cst_14 = arith.constant dense<0.000000e+00> : vector<8x896xf32>
    %18 = tpu.matmul %16, %17, %cst_14 {dimension_numbers = #tpu.dot_dimension_numbers<[1], [0], [0], [1], [0, 0, 1, 1], [], []>} : vector<8x1024xbf16>, vector<1024x896xbf16>, vector<8x896xf32> -> vector<8x896xf32>
    %c0_15 = arith.constant 0 : index
    %c0_16 = arith.constant 0 : index
    %19 = vector.load %arg7[%c0_15, %c0_16] : memref<1x896xf32, #tpu.memory_space<vmem>>, vector<1x896xf32>
    %20 = vector.broadcast %19 : vector<1x896xf32> to vector<8x896xf32>
    %21 = arith.addf %18, %20 : vector<8x896xf32>
    %cst_17 = arith.constant 0.000000e+00 : f32
    %22 = vector.broadcast %cst_17 : f32 to vector<8x896xf32>
    %23 = arith.subf %22, %21 : vector<8x896xf32>
    %24 = math.exp %23 : vector<8x896xf32>
    %cst_18 = arith.constant 1.000000e+00 : f32
    %25 = vector.broadcast %cst_18 : f32 to vector<8x896xf32>
    %26 = arith.addf %25, %24 : vector<8x896xf32>
    %27 = tpu.reciprocal %26 {approx = true} : vector<8x896xf32> -> vector<8x896xf32>
    %c0_19 = arith.constant 0 : index
    %c0_20 = arith.constant 0 : index
    %28 = vector.load %arg8[%c0_19, %c0_20] : memref<8x896xf32, #tpu.memory_space<vmem>>, vector<8x896xf32>
    tpu.vector_store %arg8[%c0_19, %c0_20], %27 {strides = array<i32>} : memref<8x896xf32, #tpu.memory_space<vmem>>, vector<8x896xf32>,
    return
  }
  func.func @transform_0(%arg0: i32) -> (i32, i32) {
    %c0_i32 = arith.constant 0 : i32
    %c0_i32_0 = arith.constant 0 : i32
    return %arg0, %c0_i32 : i32, i32
  }
  func.func @transform_1(%arg0: i32) -> (i32, i32) {
    %c0_i32 = arith.constant 0 : i32
    %c0_i32_0 = arith.constant 0 : i32
    %c0_i32_1 = arith.constant 0 : i32
    return %c0_i32, %c0_i32_0 : i32, i32
  }
  func.func @transform_2(%arg0: i32) -> (i32, i32) {
    %c0_i32 = arith.constant 0 : i32
    %c0_i32_0 = arith.constant 0 : i32
    %c0_i32_1 = arith.constant 0 : i32
    return %c0_i32, %c0_i32_0 : i32, i32
  }
  func.func @transform_3(%arg0: i32) -> (i32, i32) {
    %c0_i32 = arith.constant 0 : i32
    %c0_i32_0 = arith.constant 0 : i32
    %c0_i32_1 = arith.constant 0 : i32
    return %c0_i32, %c0_i32_0 : i32, i32
  }
  func.func @transform_4(%arg0: i32) -> (i32, i32) {
    %c0_i32 = arith.constant 0 : i32
    %c0_i32_0 = arith.constant 0 : i32
    %c0_i32_1 = arith.constant 0 : i32
    return %c0_i32, %c0_i32_0 : i32, i32
  }
  func.func @transform_5(%arg0: i32) -> (i32, i32) {
    %c0_i32 = arith.constant 0 : i32
    %c0_i32_0 = arith.constant 0 : i32
    %c0_i32_1 = arith.constant 0 : i32
    return %c0_i32, %c0_i32_0 : i32, i32
  }
  func.func @transform_6(%arg0: i32) -> (i32, i32) {
    %c0_i32 = arith.constant 0 : i32
    %c0_i32_0 = arith.constant 0 : i32
    %c0_i32_1 = arith.constant 0 : i32
    return %c0_i32, %c0_i32_0 : i32, i32
  }
  func.func @transform_7(%arg0: i32) -> (i32, i32) {
    %c0_i32 = arith.constant 0 : i32
    %c0_i32_0 = arith.constant 0 : i32
    return %arg0, %c0_i32 : i32, i32
  }
}

</mosaic_0001>

<bundles_post_ra>
// kernel: linear_decoder.1
= control target key start
LH: loop header
LB: loop body
LE: loop exit
PB: predicated region body
PF: predicated region fallthrough
CT: control target
= control target key end

     0   :  { %12 = vsyncpa [#allocation3], 0  ;;  %s7696_s0 = inlined_call_operand.vmem [shape: bf16[8,16], index: 0, kind: input, shape index: {}]   ;;  %s7697_s1 = inlined_call_operand.hbm [shape: bf16[16,512], index: 1, kind: input, shape index: {}]   ;;  %s7698_s2 = inlined_call_operand.hbm [shape: f32[1,512], index: 2, kind: input, shape index: {}]   ;;  %s7699_s3 = inlined_call_operand.hbm [shape: bf16[512,1024], index: 3, kind: input, shape index: {}]   ;;  %s7700_s4 = inlined_call_operand.hbm [shape: f32[1,1024], index: 4, kind: input, shape index: {}]   ;;  %s7701_s5 = inlined_call_operand.hbm [shape: bf16[1024,896], index: 5, kind: input, shape index: {}]   ;;  %s7702_s6 = inlined_call_operand.hbm [shape: f32[1,896], index: 6, kind: input, shape index: {}]   ;;  %s7703_s7 = inlined_call_operand.vmem [shape: f32[8,896], index: 7, kind: output, shape index: {}]  }
   0x1   :  { %13 = vsyncpa [#allocation5], 0 }
   0x2   :  { %14 = vsyncpa [#allocation8], 0 }
   0x3   :  { %15 = vsyncpa [#allocation11], 0  ;;  %s7411_s24 = smov [#allocation4]   ;;  %s7412_s26 = smov [#allocation7]  }
   0x4   :  { %s36_s25 = sshll.u32 %s7411_s24, 4  ;;  %s58_s27 = sshll.u32 %s7412_s26, 4  ;;  %s37_s25 = int_to_ptr.vmem [resolvable:$true] %s36_s25  ;;  %s59_s27 = int_to_ptr.vmem [resolvable:$true] %s58_s27 }
   0x5   :  { %s7271_s30 = scalar_lea.hbm %s7698_s2, 64 }
   0x6   :  { %p7272_p0 = scmp.ne.s32.totalorder %s7698_s2, %s7271_s30  ;;  %p7275_p1 = scmp.lt.u32.totalorder %s7271_s30, %s7698_s2 }
   0x8   :  { %p7277_p2 = pnand %p7275_p1, %p7272_p0 }
   0xa   :  { %7280 = shalt.err (!%p7277_p2)
}
   0xb   :  { %s7281_s12 = scalar_lea.vmem %s37_s25, 64  ;;  %p7286_p4 = scmp.lt.s32.totalorder %s37_s25, %s37_s25 }
   0xc   :  { %p7282_p3 = scmp.ne.s32.totalorder %s37_s25, %s7281_s12  ;;  %p7287_p5 = scmp.lt.s32.totalorder %s7281_s12, %s7281_s12 }
   0xe   :  { %p7288_p6 = por %p7287_p5, %p7286_p4 }
  0x10   :  { %p7289_p7 = pnand %p7288_p6, %p7282_p3 }
  0x12   :  { %7292 = shalt.err (!%p7289_p7)
}
  0x13   :  { %39 = dma.hbm_to_vmem [thread:$0]  %s7698_s2, 64, %s37_s25, [#allocation5]  }
  0x14   :  { %s7293_s17 = scalar_lea.hbm %s7700_s4, 128 }
  0x15   :  { %p7294_p8 = scmp.ne.s32.totalorder %s7700_s4, %s7293_s17  ;;  %p7297_p9 = scmp.lt.u32.totalorder %s7293_s17, %s7700_s4 }
  0x17   :  { %p7299_p10 = pnand %p7297_p9, %p7294_p8 }
  0x19   :  { %7302 = shalt.err (!%p7299_p10)
}
  0x1a   :  { %s7303_s22 = scalar_lea.vmem %s59_s27, 128  ;;  %p7308_p12 = scmp.lt.s32.totalorder %s59_s27, %s59_s27 }
  0x1b   :  { %p7304_p11 = scmp.ne.s32.totalorder %s59_s27, %s7303_s22  ;;  %p7309_p13 = scmp.lt.s32.totalorder %s7303_s22, %s7303_s22 }
  0x1d   :  { %p7310_p0 = por %p7309_p13, %p7308_p12 }
  0x1f   :  { %p7311_p1 = pnand %p7310_p0, %p7304_p11 }
  0x21   :  { %7314 = shalt.err (!%p7311_p1)
}
  0x22   :  { %61 = dma.hbm_to_vmem [thread:$0]  %s7700_s4, 128, %s59_s27, [#allocation8]  }
  0x23   :  { %s7413_s24 = smov [#allocation2]   ;;  %s7315_s29 = scalar_lea.hbm %s7697_s1, 512 }
  0x24   :  { %s23_s25 = sshll.u32 %s7413_s24, 4  ;;  %p7316_p2 = scmp.ne.s32.totalorder %s7697_s1, %s7315_s29  ;;  %s24_s25 = int_to_ptr.vmem [resolvable:$true] %s23_s25 }
  0x25   :  { %p7319_p3 = scmp.lt.u32.totalorder %s7315_s29, %s7697_s1 }
  0x27   :  { %p7321_p4 = pnand %p7319_p3, %p7316_p2 }
  0x29   :  { %7324 = shalt.err (!%p7321_p4)
}
  0x2a   :  { %s7325_s11 = scalar_lea.vmem %s24_s25, 512  ;;  %p7330_p6 = scmp.lt.s32.totalorder %s24_s25, %s24_s25 }
  0x2b   :  { %p7326_p5 = scmp.ne.s32.totalorder %s24_s25, %s7325_s11  ;;  %p7331_p7 = scmp.lt.s32.totalorder %s7325_s11, %s7325_s11 }
  0x2d   :  { %p7332_p8 = por %p7331_p7, %p7330_p6 }
  0x2f   :  { %p7333_p9 = pnand %p7332_p8, %p7326_p5 }
  0x31   :  { %7336 = shalt.err (!%p7333_p9)
}
  0x32   :  { %s7414_s4 = smov 256   ;;  %s7415_s27 = smov 16  }
  0x33   :  { %29 = dma.hbm_to_vmem [thread:$0]  %s7697_s1, 512, %s24_s25, [#allocation3], %s7414_s4, %s7414_s4, %s7415_s27  }
  0x34   :  { %s7416_s14 = smov [#allocation6]   ;;  %s7337_s18 = scalar_lea.hbm %s7699_s3, 32768 }
  0x35   :  { %s45_s15 = sshll.u32 %s7416_s14, 4  ;;  %p7338_p10 = scmp.ne.s32.totalorder %s7699_s3, %s7337_s18  ;;  %s46_s15 = int_to_ptr.vmem [resolvable:$true] %s45_s15 }
  0x36   :  { %p7341_p11 = scmp.lt.u32.totalorder %s7337_s18, %s7699_s3 }
  0x38   :  { %p7343_p12 = pnand %p7341_p11, %p7338_p10 }
  0x3a   :  { %7346 = shalt.err (!%p7343_p12)
}
  0x3b   :  { %s7347_s2 = scalar_lea.vmem %s46_s15, 32768  ;;  %p7352_p0 = scmp.lt.s32.totalorder %s46_s15, %s46_s15 }
  0x3c   :  { %p7348_p13 = scmp.ne.s32.totalorder %s46_s15, %s7347_s2  ;;  %p7353_p1 = scmp.lt.s32.totalorder %s7347_s2, %s7347_s2 }
  0x3e   :  { %p7354_p2 = por %p7353_p1, %p7352_p0 }
  0x40   :  { %p7355_p3 = pnand %p7354_p2, %p7348_p13 }
  0x42   :  { %7358 = shalt.err (!%p7355_p3)
}
  0x43   :  { %s7417_s1 = smov 512   ;;  %s7418_s23 = smov 32  }
  0x44   :  { %51 = dma.hbm_to_vmem [thread:$0]  %s7699_s3, 32768, %s46_s15, [#allocation5], %s7417_s1, %s7417_s1, %s7418_s23  }
  0x45   :  { %s7419_s26 = smov [#allocation9]   ;;  %s7359_s8 = scalar_lea.hbm %s7701_s5, 57344 }
  0x46   :  { %s67_s28 = sshll.u32 %s7419_s26, 4  ;;  %p7360_p4 = scmp.ne.s32.totalorder %s7701_s5, %s7359_s8  ;;  %s68_s28 = int_to_ptr.vmem [resolvable:$true] %s67_s28 }
  0x47   :  { %p7363_p5 = scmp.lt.u32.totalorder %s7359_s8, %s7701_s5 }
  0x49   :  { %p7365_p6 = pnand %p7363_p5, %p7360_p4 }
  0x4b   :  { %7368 = shalt.err (!%p7365_p6)
}
  0x4c   :  { %s7369_s27 = scalar_lea.vmem %s68_s28, 57344  ;;  %p7374_p8 = scmp.lt.s32.totalorder %s68_s28, %s68_s28 }
  0x4d   :  { %p7370_p7 = scmp.ne.s32.totalorder %s68_s28, %s7369_s27  ;;  %p7375_p9 = scmp.lt.s32.totalorder %s7369_s27, %s7369_s27 }
  0x4f   :  { %p7376_p10 = por %p7375_p9, %p7374_p8 }
  0x51   :  { %p7377_p11 = pnand %p7376_p10, %p7370_p7 }
  0x53   :  { %7380 = shalt.err (!%p7377_p11)
}
  0x54   :  { %s7420_s3 = smov 448   ;;  %s7421_s12 = smov 28  }
  0x55   :  { %73 = dma.hbm_to_vmem [thread:$0]  %s7701_s5, 57344, %s68_s28, [#allocation8], %s7420_s3, %s7420_s3, %s7421_s12  }
  0x56   :  { %s7422_s15 = smov [#allocation10]   ;;  %s7381_s19 = scalar_lea.hbm %s7702_s6, 112 }
  0x57   :  { %s80_s16 = sshll.u32 %s7422_s15, 4  ;;  %p7382_p12 = scmp.ne.s32.totalorder %s7702_s6, %s7381_s19  ;;  %s81_s16 = int_to_ptr.vmem [resolvable:$true] %s80_s16 }
  0x58   :  { %p7385_p13 = scmp.lt.u32.totalorder %s7381_s19, %s7702_s6 }
  0x5a   :  { %p7387_p0 = pnand %p7385_p13, %p7382_p12 }
  0x5c   :  { %7390 = shalt.err (!%p7387_p0)
}
  0x5d   :  { %s7391_s1 = scalar_lea.vmem %s81_s16, 112  ;;  %s7395_s5 = scalar_lea.vmem %s81_s16, 128 }
  0x5e   :  { %p7392_p1 = scmp.ne.s32.totalorder %s81_s16, %s7391_s1  ;;  %p7396_p2 = scmp.lt.s32.totalorder %s81_s16, %s81_s16 }
  0x5f   :  { %p7397_p3 = scmp.lt.s32.totalorder %s7395_s5, %s7391_s1 }
  0x61   :  { %p7398_p4 = por %p7397_p3, %p7396_p2 }
  0x63   :  { %p7399_p5 = pnand %p7398_p4, %p7392_p1 }
  0x65   :  { %7402 = shalt.err (!%p7399_p5)
}
  0x66   :  { %83 = dma.hbm_to_vmem [thread:$0]  %s7702_s6, 112, %s81_s16, [#allocation11]  }
  0x67   :  { %7403 = dma.done.wait [#allocation3], 512  }
  0x68   :  { %7404 = vsyncadd [#allocation3], 4294966784 }
  0x69   :  { %7405 = dma.done.wait [#allocation5], 32832  }
  0x6a   :  { %7406 = vsyncadd [#allocation5], 4294934464 }
  0x6b   :  { %7407 = dma.done.wait [#allocation8], 57472  }
  0x6c   :  { %7408 = vsyncadd [#allocation8], 4294909824 }
  0x6d   :  { %7409 = dma.done.wait [#allocation11], 112  }
  0x6e   :  { %7410 = vsyncadd [#allocation11], 4294967184  ;;  %v7423_v0 = vmov 0   ;;  %v6596_v1 = vld [vmem:[#allocation2 + $0x4] ss:$16 sps:$4 sm:$0xff]   ;;  %vm150_vm0 = vcmask 130048  }
  0x6f   :  { %186 = vmatprep.mubr.bf16.mxu0 %v7423_v0  ;;  %227 = vmatprep.mubr.bf16.mxu1 %v7423_v0  ;;  %v6598_v2 = vld [vmem:[#allocation2 + $0xc] ss:$16 sps:$4 sm:$0xff]   ;;  %v6600_v3 = vld [vmem:[#allocation2] ss:$16 sps:$4 sm:$0xff]   ;;  %v6601_v4 = vld [vmem:[#allocation2 + $0x8] ss:$16 sps:$4 sm:$0xff]  }
  0x70   :  { %154 = vmatprep.subr.bf16.mxu0 %v6596_v1  ;;  %v103_v5 = vld [vmem:[%s7696_s0] sm:$0xf]  ;;  %195 = vmatprep.subr.bf16.mxu1 %v6598_v2  ;;  %v244_v6 = vld [vmem:[#allocation6] sm:$0xff] }
  0x71   :  { %v248_v7 = vld [vmem:[#allocation6 + $0x20] sm:$0xff]  ;;  %155 = vmatpush1.bf16.msra.mxu0 %v6600_v3  ;;  %196 = vmatpush1.bf16.msra.mxu1 %v6601_v4 }
  0x72   :  { %v372_v8 = vld [vmem:[#allocation6 + $0x400] sm:$0xff]  ;;  %v5727_v9 = vcombine.low %v244_v6, %v248_v7  ;;  %v5728_v10 = vcombine.high %v244_v6, %v248_v7 }
  0x73   :  { %v376_v11 = vld [vmem:[#allocation6 + $0x420] sm:$0xff] }
  0x74   :  { %v252_v12 = vld [vmem:[#allocation6 + $0x40] sm:$0xff]  ;;  %v5855_v14 = vcombine.low %v372_v8, %v376_v11  ;;  %v5856_v15 = vcombine.high %v372_v8, %v376_v11  ;;  %1822 = vmatprep.subr.bf16.mxu1 %v5728_v10  ;;  %5725 = vmatmul.mubr.msk.bf16.vlgmr.msra.gmra.mrb[0].mxu0 %vm150_vm0, %v103_v5 }
  0x75   :  { %v256_v13 = vld [vmem:[#allocation6 + $0x60] sm:$0xff]  ;;  %5726 = vmatmul.mubr.msk.bf16.vlgmr.msra.gmra.mrb[0].mxu1 %vm150_vm0, %v103_v5 }
  0x76   :  { %v5736_v16 = vcombine.high %v252_v12, %v256_v13  ;;  %v380_v17 = vld [vmem:[#allocation6 + $0x440] sm:$0xff]  ;;  %1863 = vmatprep.subr.bf16.mxu0 %v5856_v15  ;;  %1823 = vmatpush1.bf16.msra.mxu1 %v5727_v9  ;;  %v5735_v24 = vcombine.low %v252_v12, %v256_v13 }
  0x77   :  { %v384_v18 = vld [vmem:[#allocation6 + $0x460] sm:$0xff]  ;;  %1864 = vmatpush1.bf16.msra.mxu0 %v5855_v14 }
  0x78   :  { %v5864_v19 = vcombine.high %v380_v17, %v384_v18  ;;  %v260_v20 = vld [vmem:[#allocation6 + $0x80] sm:$0xff]  ;;  %1824 = vmatprep.subr.bf16.mxu1 %v5736_v16  ;;  %v5863_v25 = vcombine.low %v380_v17, %v384_v18 }
  0x79   :  { %v264_v21 = vld [vmem:[#allocation6 + $0xa0] sm:$0xff] }
  0x7a   :  { %v388_v22 = vld [vmem:[#allocation6 + $0x480] sm:$0xff]  ;;  %v5744_v26 = vcombine.high %v260_v20, %v264_v21  ;;  %1865 = vmatprep.subr.bf16.mxu0 %v5864_v19  ;;  %1825 = vmatpush1.bf16.msra.mxu1 %v5735_v24  ;;  %v5743_v32 = vcombine.low %v260_v20, %v264_v21 }
  0x7b   :  { %v392_v23 = vld [vmem:[#allocation6 + $0x4a0] sm:$0xff]  ;;  %1866 = vmatpush1.bf16.msra.mxu0 %v5863_v25 }
  0x7c   :  { %v5872_v27 = vcombine.high %v388_v22, %v392_v23  ;;  %v268_v28 = vld [vmem:[#allocation6 + $0xc0] sm:$0xff]  ;;  %1826 = vmatprep.subr.bf16.mxu1 %v5744_v26  ;;  %v5871_v33 = vcombine.low %v388_v22, %v392_v23 }
  0x7d   :  { %v272_v29 = vld [vmem:[#allocation6 + $0xe0] sm:$0xff] }
  0x7e   :  { %v396_v30 = vld [vmem:[#allocation6 + $0x4c0] sm:$0xff]  ;;  %v5752_v34 = vcombine.high %v268_v28, %v272_v29  ;;  %1867 = vmatprep.subr.bf16.mxu0 %v5872_v27  ;;  %1827 = vmatpush1.bf16.msra.mxu1 %v5743_v32  ;;  %v5751_v40 = vcombine.low %v268_v28, %v272_v29 }
  0x7f   :  { %v400_v31 = vld [vmem:[#allocation6 + $0x4e0] sm:$0xff]  ;;  %1868 = vmatpush1.bf16.msra.mxu0 %v5871_v33 }
  0x80   :  { %v5880_v35 = vcombine.high %v396_v30, %v400_v31  ;;  %v276_v36 = vld [vmem:[#allocation6 + $0x100] sm:$0xff]  ;;  %1828 = vmatprep.subr.bf16.mxu1 %v5752_v34  ;;  %v5879_v41 = vcombine.low %v396_v30, %v400_v31 }
  0x81   :  { %v280_v37 = vld [vmem:[#allocation6 + $0x120] sm:$0xff] }
  0x82   :  { %v404_v38 = vld [vmem:[#allocation6 + $0x500] sm:$0xff]  ;;  %v5760_v42 = vcombine.high %v276_v36, %v280_v37  ;;  %1869 = vmatprep.subr.bf16.mxu0 %v5880_v35  ;;  %1829 = vmatpush1.bf16.msra.mxu1 %v5751_v40  ;;  %v5759_v48 = vcombine.low %v276_v36, %v280_v37 }
  0x83   :  { %v408_v39 = vld [vmem:[#allocation6 + $0x520] sm:$0xff]  ;;  %1870 = vmatpush1.bf16.msra.mxu0 %v5879_v41 }
  0x84   :  { %v5888_v43 = vcombine.high %v404_v38, %v408_v39  ;;  %v284_v44 = vld [vmem:[#allocation6 + $0x140] sm:$0xff]  ;;  %1830 = vmatprep.subr.bf16.mxu1 %v5760_v42  ;;  %v5887_v50 = vcombine.low %v404_v38, %v408_v39 }
  0x85   :  { %v288_v45 = vld [vmem:[#allocation6 + $0x160] sm:$0xff] }
  0x86   :  { %v412_v46 = vld [vmem:[#allocation6 + $0x540] sm:$0xff]  ;;  %v5768_v51 = vcombine.high %v284_v44, %v288_v45  ;;  %1871 = vmatprep.subr.bf16.mxu0 %v5888_v43  ;;  %1831 = vmatpush1.bf16.msra.mxu1 %v5759_v48  ;;  %v5767_v56 = vcombine.low %v284_v44, %v288_v45 }
  0x87   :  { %v416_v47 = vld [vmem:[#allocation6 + $0x560] sm:$0xff]  ;;  %1872 = vmatpush1.bf16.msra.mxu0 %v5887_v50 }
  0x88   :  { %v292_v49 = vld [vmem:[#allocation6 + $0x180] sm:$0xff]  ;;  %v5896_v55 = vcombine.high %v412_v46, %v416_v47  ;;  %1832 = vmatprep.subr.bf16.mxu1 %v5768_v51  ;;  %v5895_v59 = vcombine.low %v412_v46, %v416_v47 }
  0x89   :  { %v296_v52 = vld [vmem:[#allocation6 + $0x1a0] sm:$0xff] }
  0x8a   :  { %v420_v53 = vld [vmem:[#allocation6 + $0x580] sm:$0xff]  ;;  %v5776_v60 = vcombine.high %v292_v49, %v296_v52  ;;  %1873 = vmatprep.subr.bf16.mxu0 %v5896_v55  ;;  %1833 = vmatpush1.bf16.msra.mxu1 %v5767_v56  ;;  %v5775_v0 = vcombine.low %v292_v49, %v296_v52 }
  0x8b   :  { %v424_v54 = vld [vmem:[#allocation6 + $0x5a0] sm:$0xff]  ;;  %1874 = vmatpush1.bf16.msra.mxu0 %v5895_v59 }
  0x8c   :  { %v300_v57 = vld [vmem:[#allocation6 + $0x1c0] sm:$0xff]  ;;  %v5904_v63 = vcombine.high %v420_v53, %v424_v54  ;;  %1834 = vmatprep.subr.bf16.mxu1 %v5776_v60  ;;  %v5903_v3 = vcombine.low %v420_v53, %v424_v54 }
  0x8d   :  { %v304_v58 = vld [vmem:[#allocation6 + $0x1e0] sm:$0xff] }
  0x8e   :  { %v428_v61 = vld [vmem:[#allocation6 + $0x5c0] sm:$0xff]  ;;  %v5784_v4 = vcombine.high %v300_v57, %v304_v58  ;;  %1875 = vmatprep.subr.bf16.mxu0 %v5904_v63  ;;  %1835 = vmatpush1.bf16.msra.mxu1 %v5775_v0  ;;  %v5783_v8 = vcombine.low %v300_v57, %v304_v58 }
  0x8f   :  { %v432_v62 = vld [vmem:[#allocation6 + $0x5e0] sm:$0xff]  ;;  %1876 = vmatpush1.bf16.msra.mxu0 %v5903_v3 }
  0x90   :  { %v308_v1 = vld [vmem:[#allocation6 + $0x200] sm:$0xff]  ;;  %v5912_v7 = vcombine.high %v428_v61, %v432_v62  ;;  %1836 = vmatprep.subr.bf16.mxu1 %v5784_v4  ;;  %v5911_v11 = vcombine.low %v428_v61, %v432_v62 }
  0x91   :  { %v312_v2 = vld [vmem:[#allocation6 + $0x220] sm:$0xff] }
  0x92   :  { %v436_v5 = vld [vmem:[#allocation6 + $0x600] sm:$0xff]  ;;  %v5792_v12 = vcombine.high %v308_v1, %v312_v2  ;;  %1877 = vmatprep.subr.bf16.mxu0 %v5912_v7  ;;  %1837 = vmatpush1.bf16.msra.mxu1 %v5783_v8  ;;  %v5791_v16 = vcombine.low %v308_v1, %v312_v2  ;;  %v249_v7 = vld [vmem:[#allocation6 + $0x28] sm:$0xff]  ;;  %v246_v8 = vld [vmem:[#allocation6 + $0x10] sm:$0xff] }
  0x93   :  { %v440_v6 = vld [vmem:[#allocation6 + $0x620] sm:$0xff]  ;;  %1878 = vmatpush1.bf16.msra.mxu0 %v5911_v11 }
  0x94   :  { %v316_v9 = vld [vmem:[#allocation6 + $0x240] sm:$0xff]  ;;  %v5920_v15 = vcombine.high %v436_v5, %v440_v6  ;;  %1838 = vmatprep.subr.bf16.mxu1 %v5792_v12  ;;  %v5919_v19 = vcombine.low %v436_v5, %v440_v6  ;;  %v245_v6 = vld [vmem:[#allocation6 + $0x8] sm:$0xff] }
  0x95   :  { %v320_v10 = vld [vmem:[#allocation6 + $0x260] sm:$0xff]  ;;  %v5729_v11 = vcombine.low %v245_v6, %v249_v7 }
  0x96   :  { %v444_v13 = vld [vmem:[#allocation6 + $0x640] sm:$0xff]  ;;  %v5800_v20 = vcombine.high %v316_v9, %v320_v10  ;;  %1879 = vmatprep.subr.bf16.mxu0 %v5920_v15  ;;  %1839 = vmatpush1.bf16.msra.mxu1 %v5791_v16  ;;  %v5799_v24 = vcombine.low %v316_v9, %v320_v10  ;;  %v5730_v9 = vcombine.high %v245_v6, %v249_v7  ;;  %v250_v10 = vld [vmem:[#allocation6 + $0x30] sm:$0xff] }
  0x97   :  { %v448_v14 = vld [vmem:[#allocation6 + $0x660] sm:$0xff]  ;;  %1880 = vmatpush1.bf16.msra.mxu0 %v5919_v19  ;;  %v5731_v12 = vcombine.low %v246_v8, %v250_v10 }
  0x98   :  { %v324_v17 = vld [vmem:[#allocation6 + $0x280] sm:$0xff]  ;;  %v5928_v23 = vcombine.high %v444_v13, %v448_v14  ;;  %1840 = vmatprep.subr.bf16.mxu1 %v5800_v20  ;;  %v5927_v27 = vcombine.low %v444_v13, %v448_v14  ;;  %v5732_v13 = vcombine.high %v246_v8, %v250_v10  ;;  %v110_v14 = vlaneseq  ;;  %v289_v10 = vld [vmem:[#allocation6 + $0x168] sm:$0xff] }
  0x99   :  { %v328_v18 = vld [vmem:[#allocation6 + $0x2a0] sm:$0xff] }
  0x9a   :  { %v452_v21 = vld [vmem:[#allocation6 + $0x680] sm:$0xff]  ;;  %v5808_v28 = vcombine.high %v324_v17, %v328_v18  ;;  %1881 = vmatprep.subr.bf16.mxu0 %v5928_v23  ;;  %1841 = vmatpush1.bf16.msra.mxu1 %v5799_v24  ;;  %v5807_v32 = vcombine.low %v324_v17, %v328_v18  ;;  %v7541_v15 = vshrl.u32 %v110_v14, 7  ;;  %v108_v17 = vld [vmem:[#allocation4] sm:$0xf] }
  0x9b   :  { %v456_v22 = vld [vmem:[#allocation6 + $0x6a0] sm:$0xff]  ;;  %1882 = vmatpush1.bf16.msra.mxu0 %v5927_v27 }
  0x9c   :  { %v332_v25 = vld [vmem:[#allocation6 + $0x2c0] sm:$0xff]  ;;  %v5936_v31 = vcombine.high %v452_v21, %v456_v22  ;;  %1842 = vmatprep.subr.bf16.mxu1 %v5808_v28  ;;  %v5935_v35 = vcombine.low %v452_v21, %v456_v22  ;;  %v7544_v16 = vsub.s32 0, %v7541_v15  ;;  %v7547_v18 = vsub.s32 1, %v7541_v15 }
  0x9d   :  { %v336_v26 = vld [vmem:[#allocation6 + $0x2e0] sm:$0xff]  ;;  %v7550_v19 = vsub.s32 2, %v7541_v15  ;;  %v7553_v20 = vsub.s32 3, %v7541_v15 }
  0x9e   :  { %v460_v29 = vld [vmem:[#allocation6 + $0x6c0] sm:$0xff]  ;;  %v5816_v36 = vcombine.high %v332_v25, %v336_v26  ;;  %1883 = vmatprep.subr.bf16.mxu0 %v5936_v31  ;;  %1843 = vmatpush1.bf16.msra.mxu1 %v5807_v32  ;;  %v5815_v40 = vcombine.low %v332_v25, %v336_v26  ;;  %v113_v21 = vrot.slane %v108_v17, %v7544_v16 }
  0x9f   :  { %v464_v30 = vld [vmem:[#allocation6 + $0x6e0] sm:$0xff]  ;;  %1884 = vmatpush1.bf16.msra.mxu0 %v5935_v35  ;;  %v121_v22 = vrot.slane %v108_v17, %v7550_v19  ;;  %v117_v23 = vrot.slane %v108_v17, %v7547_v18  ;;  %v125_v24 = vrot.slane %v108_v17, %v7553_v20 }
  0xa0   :  { %v340_v33 = vld [vmem:[#allocation6 + $0x300] sm:$0xff]  ;;  %v5944_v39 = vcombine.high %v460_v29, %v464_v30  ;;  %1844 = vmatprep.subr.bf16.mxu1 %v5816_v36  ;;  %v5943_v43 = vcombine.low %v460_v29, %v464_v30 }
  0xa1   :  { %v344_v34 = vld [vmem:[#allocation6 + $0x320] sm:$0xff] }
  0xa2   :  { %v468_v37 = vld [vmem:[#allocation6 + $0x700] sm:$0xff]  ;;  %v5824_v44 = vcombine.high %v340_v33, %v344_v34  ;;  %1885 = vmatprep.subr.bf16.mxu0 %v5944_v39  ;;  %1845 = vmatpush1.bf16.msra.mxu1 %v5815_v40  ;;  %v5823_v48 = vcombine.low %v340_v33, %v344_v34  ;;  %v257_v39 = vld [vmem:[#allocation6 + $0x68] sm:$0xff] }
  0xa3   :  { %v472_v38 = vld [vmem:[#allocation6 + $0x720] sm:$0xff]  ;;  %1886 = vmatpush1.bf16.msra.mxu0 %v5943_v43  ;;  %v254_v43 = vld [vmem:[#allocation6 + $0x50] sm:$0xff] }
  0xa4   :  { %v348_v41 = vld [vmem:[#allocation6 + $0x340] sm:$0xff]  ;;  %v5952_v47 = vcombine.high %v468_v37, %v472_v38  ;;  %1846 = vmatprep.subr.bf16.mxu1 %v5824_v44  ;;  %v5951_v49 = vcombine.low %v468_v37, %v472_v38  ;;  %v253_v38 = vld [vmem:[#allocation6 + $0x48] sm:$0xff]  ;;  %v258_v44 = vld [vmem:[#allocation6 + $0x70] sm:$0xff] }
  0xa5   :  { %v352_v42 = vld [vmem:[#allocation6 + $0x360] sm:$0xff] }
  0xa6   :  { %v476_v45 = vld [vmem:[#allocation6 + $0x740] sm:$0xff]  ;;  %v5832_v50 = vcombine.high %v348_v41, %v352_v42  ;;  %1887 = vmatprep.subr.bf16.mxu0 %v5952_v47  ;;  %1847 = vmatpush1.bf16.msra.mxu1 %v5823_v48  ;;  %v5831_v52 = vcombine.low %v348_v41, %v352_v42  ;;  %v261_v48 = vld [vmem:[#allocation6 + $0x88] sm:$0xff] }
  0xa7   :  { %v480_v46 = vld [vmem:[#allocation6 + $0x760] sm:$0xff]  ;;  %1888 = vmatpush1.bf16.msra.mxu0 %v5951_v49  ;;  %v265_v49 = vld [vmem:[#allocation6 + $0xa8] sm:$0xff] }
  0xa8   :  { %v5960_v51 = vcombine.high %v476_v45, %v480_v46  ;;  %1848 = vmatprep.subr.bf16.mxu1 %v5832_v50  ;;  %v5959_v53 = vcombine.low %v476_v45, %v480_v46  ;;  %v356_v54 = vld [vmem:[#allocation6 + $0x380] sm:$0xff] }
  0xa9   :  { %v360_v55 = vld [vmem:[#allocation6 + $0x3a0] sm:$0xff] }
  0xaa   :  { %1889 = vmatprep.subr.bf16.mxu0 %v5960_v51  ;;  %1849 = vmatpush1.bf16.msra.mxu1 %v5831_v52  ;;  %v484_v56 = vld [vmem:[#allocation6 + $0x780] sm:$0xff]  ;;  %v5840_v57 = vcombine.high %v356_v54, %v360_v55  ;;  %v5839_v59 = vcombine.low %v356_v54, %v360_v55  ;;  %v262_v51 = vld [vmem:[#allocation6 + $0x90] sm:$0xff]  ;;  %v5740_v54 = vcombine.high %v254_v43, %v258_v44 }
  0xab   :  { %1890 = vmatpush1.bf16.msra.mxu0 %v5959_v53  ;;  %v488_v58 = vld [vmem:[#allocation6 + $0x7a0] sm:$0xff]  ;;  %v266_v52 = vld [vmem:[#allocation6 + $0xb0] sm:$0xff]  ;;  %v5738_v53 = vcombine.high %v253_v38, %v257_v39  ;;  %v5737_v55 = vcombine.low %v253_v38, %v257_v39 }
  0xac   :  { %v5967_v60 = vcombine.low %v484_v56, %v488_v58  ;;  %v5968_v61 = vcombine.high %v484_v56, %v488_v58  ;;  %1850 = vmatprep.subr.bf16.mxu1 %v5840_v57  ;;  %v364_v62 = vld [vmem:[#allocation6 + $0x3c0] sm:$0xff]  ;;  %v5739_v56 = vcombine.low %v254_v43, %v258_v44  ;;  %v269_v57 = vld [vmem:[#allocation6 + $0xc8] sm:$0xff]  ;;  %v314_v43 = vld [vmem:[#allocation6 + $0x230] sm:$0xff] }
  0xad   :  { %v368_v63 = vld [vmem:[#allocation6 + $0x3e0] sm:$0xff]  ;;  %v273_v58 = vld [vmem:[#allocation6 + $0xe8] sm:$0xff] }
  0xae   :  { %1891 = vmatprep.subr.bf16.mxu0 %v5968_v61  ;;  %1851 = vmatpush1.bf16.msra.mxu1 %v5839_v59  ;;  %v492_v0 = vld [vmem:[#allocation6 + $0x7c0] sm:$0xff]  ;;  %v5848_v1 = vcombine.high %v364_v62, %v368_v63  ;;  %v5847_v3 = vcombine.low %v364_v62, %v368_v63  ;;  %v5746_v59 = vcombine.high %v261_v48, %v265_v49  ;;  %v270_v61 = vld [vmem:[#allocation6 + $0xd0] sm:$0xff] }
  0xaf   :  { %1892 = vmatpush1.bf16.msra.mxu0 %v5967_v60  ;;  %v496_v2 = vld [vmem:[#allocation6 + $0x7e0] sm:$0xff]  ;;  %v5748_v60 = vcombine.high %v262_v51, %v266_v52  ;;  %v274_v62 = vld [vmem:[#allocation6 + $0xf0] sm:$0xff]  ;;  %v5745_v63 = vcombine.low %v261_v48, %v265_v49  ;;  %v5753_v7 = vcombine.low %v269_v57, %v273_v58 }
  0xb0   :  { %v5975_v4 = vcombine.low %v492_v0, %v496_v2  ;;  %v5976_v5 = vcombine.high %v492_v0, %v496_v2  ;;  %1852 = vmatprep.subr.bf16.mxu1 %v5848_v1  ;;  %v5747_v0 = vcombine.low %v262_v51, %v266_v52  ;;  %v277_v1 = vld [vmem:[#allocation6 + $0x108] sm:$0xff]  ;;  %v5756_v6 = vcombine.high %v270_v61, %v274_v62 }
  0xb1   :  { %v281_v2 = vld [vmem:[#allocation6 + $0x128] sm:$0xff]  ;;  %v5755_v8 = vcombine.low %v270_v61, %v274_v62  ;;  %v326_v62 = vld [vmem:[#allocation6 + $0x290] sm:$0xff] }
  0xb2   :  { %1893 = vmatprep.subr.bf16.mxu0 %v5976_v5  ;;  %1853 = vmatpush1.bf16.msra.mxu1 %v5847_v3  ;;  %v278_v3 = vld [vmem:[#allocation6 + $0x110] sm:$0xff]  ;;  %v5754_v5 = vcombine.high %v269_v57, %v273_v58  ;;  %v5761_v17 = vcombine.low %v277_v1, %v281_v2  ;;  %v317_v52 = vld [vmem:[#allocation6 + $0x248] sm:$0xff] }
  0xb3   :  { %1894 = vmatpush1.bf16.msra.mxu0 %v5975_v4  ;;  %1904 = vmatprep.subr.bf16.mxu1 %v5730_v9  ;;  %v282_v4 = vld [vmem:[#allocation6 + $0x130] sm:$0xff]  ;;  %v285_v9 = vld [vmem:[#allocation6 + $0x148] sm:$0xff] }
  0xb4   :  { %1986 = vmatprep.subr.bf16.mxu0 %v5732_v13  ;;  %v5762_v13 = vcombine.high %v277_v1, %v281_v2  ;;  %v5764_v14 = vcombine.high %v278_v3, %v282_v4  ;;  %v329_v61 = vld [vmem:[#allocation6 + $0x2a8] sm:$0xff] }
 0x147   :  { %v188_v25 = vpop.f32.mrb[0].mxu0 }
 0x148   :  { %v229_v26 = vpop.f32.mrb[0].mxu1  ;;  %v189_v27 = vadd.f32 %v188_v25, %v113_v21  ;;  %v190_v29 = vpop.f32.mrb[1].mxu0  ;;  %v5763_v21 = vcombine.low %v278_v3, %v282_v4  ;;  %v297_v25 = vld [vmem:[#allocation6 + $0x1a8] sm:$0xff] }
 0x149   :  { %v230_v28 = vadd.f32 %v229_v26, %v121_v22  ;;  %v231_v30 = vpop.f32.mrb[1].mxu1  ;;  %v191_v31 = vadd.f32 %v190_v29, %v117_v23  ;;  %v192_v33 = vpop.f32.mrb[2].mxu0  ;;  %v293_v22 = vld [vmem:[#allocation6 + $0x188] sm:$0xff]  ;;  %v5770_v23 = vcombine.high %v285_v9, %v289_v10  ;;  %v294_v26 = vld [vmem:[#allocation6 + $0x190] sm:$0xff] }
 0x14a   :  { %v232_v32 = vadd.f32 %v231_v30, %v125_v24  ;;  %v233_v34 = vpop.f32.mrb[2].mxu1  ;;  %v236_v35 = vmax.f32 %v189_v27, 0.0  ;;  %v193_v37 = vpop.f32.mrb[3].mxu0  ;;  %v298_v27 = vld [vmem:[#allocation6 + $0x1b0] sm:$0xff]  ;;  %v5778_v30 = vcombine.high %v293_v22, %v297_v25  ;;  %v305_v33 = vld [vmem:[#allocation6 + $0x1e8] sm:$0xff] }
 0x14b   :  { %v238_v36 = vmax.f32 %v230_v28, 0.0  ;;  %v234_v40 = vpop.f32.mrb[3].mxu1  ;;  %v237_v41 = vmax.f32 %v191_v31, 0.0  ;;  %v5769_v28 = vcombine.low %v285_v9, %v289_v10  ;;  %v5780_v31 = vcombine.high %v294_v26, %v298_v27  ;;  %v302_v34 = vld [vmem:[#allocation6 + $0x1d0] sm:$0xff]  ;;  %v333_v4 = vld [vmem:[#allocation6 + $0x2c8] sm:$0xff] }
 0x14c   :  { %v239_v42 = vmax.f32 %v232_v32, 0.0  ;;  %v7565_v50 = vpack.c.bf16 %v236_v35, %v236_v35  ;;  %v301_v32 = vld [vmem:[#allocation6 + $0x1c8] sm:$0xff]  ;;  %v306_v35 = vld [vmem:[#allocation6 + $0x1f0] sm:$0xff]  ;;  %v5779_v37 = vcombine.low %v294_v26, %v298_v27 }
 0x14d   :  { %v7559_v45 = vpack.c.bf16 %v238_v36, %v238_v36  ;;  %v7561_v46 = vpack.c.bf16 %v237_v41, %v237_v41  ;;  %v5777_v36 = vcombine.low %v293_v22, %v297_v25  ;;  %v5786_v38 = vcombine.high %v301_v32, %v305_v33  ;;  %v309_v40 = vld [vmem:[#allocation6 + $0x208] sm:$0xff]  ;;  %v350_v27 = vld [vmem:[#allocation6 + $0x350] sm:$0xff] }
 0x14e   :  { %v7563_v47 = vpack.c.bf16 %v239_v42, %v239_v42  ;;  %v5788_v39 = vcombine.high %v302_v34, %v306_v35  ;;  %v313_v41 = vld [vmem:[#allocation6 + $0x228] sm:$0xff]  ;;  %v310_v42 = vld [vmem:[#allocation6 + $0x210] sm:$0xff]  ;;  %v5785_v44 = vcombine.low %v301_v32, %v305_v33  ;;  %v5787_v48 = vcombine.low %v302_v34, %v306_v35 }
 0x14f   :  { %1854 = vmatprep.mubr.bf16.mxu1 %v7561_v46  ;;  %v5794_v49 = vcombine.high %v309_v40, %v313_v41  ;;  %v5796_v51 = vcombine.high %v310_v42, %v314_v43  ;;  %v5795_v57 = vcombine.low %v310_v42, %v314_v43  ;;  %v349_v25 = vld [vmem:[#allocation6 + $0x348] sm:$0xff]  ;;  %v358_v35 = vld [vmem:[#allocation6 + $0x390] sm:$0xff] }
 0x150   :  { %1895 = vmatprep.mubr.bf16.mxu0 %v7563_v47  ;;  %1855 = vmatmul.mubr.bf16.vlgmr.msra.gmra.mrb[4].mxu1 %v7565_v50  ;;  %v353_v26 = vld [vmem:[#allocation6 + $0x368] sm:$0xff]  ;;  %v366_v43 = vld [vmem:[#allocation6 + $0x3d0] sm:$0xff] }
 0x151   :  { %1896 = vmatmul.mubr.bf16.vlgmr.msra.gmra.mrb[4].mxu0 %v7559_v45  ;;  %1905 = vmatpush1.bf16.msra.mxu1 %v5729_v11  ;;  %v286_v11 = vld [vmem:[#allocation6 + $0x150] sm:$0xff]  ;;  %v357_v33 = vld [vmem:[#allocation6 + $0x388] sm:$0xff] }
 0x152   :  { %1987 = vmatpush1.bf16.msra.mxu0 %v5731_v12  ;;  %1936 = vmatprep.mubr.bf16.mxu1 %v7561_v46  ;;  %v290_v12 = vld [vmem:[#allocation6 + $0x170] sm:$0xff]  ;;  %v361_v34 = vld [vmem:[#allocation6 + $0x3a8] sm:$0xff] }
 0x153   :  { %2018 = vmatprep.mubr.bf16.mxu0 %v7561_v46  ;;  %1906 = vmatprep.subr.bf16.mxu1 %v5738_v53  ;;  %v5772_v24 = vcombine.high %v286_v11, %v290_v12  ;;  %v5771_v29 = vcombine.low %v286_v11, %v290_v12  ;;  %v321_v53 = vld [vmem:[#allocation6 + $0x268] sm:$0xff] }
 0x154   :  { %1988 = vmatprep.subr.bf16.mxu0 %v5740_v54  ;;  %v318_v54 = vld [vmem:[#allocation6 + $0x250] sm:$0xff]  ;;  %v5802_v58 = vcombine.high %v317_v52, %v321_v53  ;;  %v341_v12 = vld [vmem:[#allocation6 + $0x308] sm:$0xff] }
 0x155   :  { %1907 = vmatpush1.bf16.msra.mxu1 %v5737_v55  ;;  %v322_v55 = vld [vmem:[#allocation6 + $0x270] sm:$0xff]  ;;  %v369_v42 = vld [vmem:[#allocation6 + $0x3e8] sm:$0xff] }
 0x156   :  { %1989 = vmatpush1.bf16.msra.mxu0 %v5739_v56  ;;  %1908 = vmatprep.subr.bf16.mxu1 %v5746_v59  ;;  %v5793_v56 = vcombine.low %v309_v40, %v313_v41  ;;  %v5804_v59 = vcombine.high %v318_v54, %v322_v55  ;;  %v5803_v1 = vcombine.low %v318_v54, %v322_v55  ;;  %v365_v41 = vld [vmem:[#allocation6 + $0x3c8] sm:$0xff]  ;;  %v374_v55 = vld [vmem:[#allocation6 + $0x410] sm:$0xff] }
 0x157   :  { %1990 = vmatprep.subr.bf16.mxu0 %v5748_v60  ;;  %v325_v60 = vld [vmem:[#allocation6 + $0x288] sm:$0xff] }
 0x158   :  { %v5810_v2 = vcombine.high %v325_v60, %v329_v61  ;;  %v377_v54 = vld [vmem:[#allocation6 + $0x428] sm:$0xff] }
 0x159   :  { %1909 = vmatpush1.bf16.msra.mxu1 %v5745_v63  ;;  %v330_v63 = vld [vmem:[#allocation6 + $0x2b0] sm:$0xff] }
 0x15a   :  { %1991 = vmatpush1.bf16.msra.mxu0 %v5747_v0  ;;  %1910 = vmatprep.subr.bf16.mxu1 %v5754_v5  ;;  %v5801_v0 = vcombine.low %v317_v52, %v321_v53  ;;  %v5812_v3 = vcombine.high %v326_v62, %v330_v63  ;;  %v337_v5 = vld [vmem:[#allocation6 + $0x2e8] sm:$0xff]  ;;  %v5811_v9 = vcombine.low %v326_v62, %v330_v63  ;;  %v382_v63 = vld [vmem:[#allocation6 + $0x450] sm:$0xff] }
 0x15b   :  { %1992 = vmatprep.subr.bf16.mxu0 %v5756_v6  ;;  %v334_v6 = vld [vmem:[#allocation6 + $0x2d0] sm:$0xff]  ;;  %v5818_v10 = vcombine.high %v333_v4, %v337_v5  ;;  %v373_v53 = vld [vmem:[#allocation6 + $0x408] sm:$0xff] }
 0x15c   :  { %v385_v62 = vld [vmem:[#allocation6 + $0x468] sm:$0xff] }
 0x15d   :  { %1911 = vmatpush1.bf16.msra.mxu1 %v5753_v7  ;;  %v338_v7 = vld [vmem:[#allocation6 + $0x2f0] sm:$0xff] }
 0x15e   :  { %1993 = vmatpush1.bf16.msra.mxu0 %v5755_v8  ;;  %1912 = vmatprep.subr.bf16.mxu1 %v5762_v13  ;;  %v5809_v8 = vcombine.low %v325_v60, %v329_v61  ;;  %v5820_v11 = vcombine.high %v334_v6, %v338_v7  ;;  %v345_v13 = vld [vmem:[#allocation6 + $0x328] sm:$0xff]  ;;  %v5819_v22 = vcombine.low %v334_v6, %v338_v7  ;;  %v390_v7 = vld [vmem:[#allocation6 + $0x490] sm:$0xff] }
 0x15f   :  { %1994 = vmatprep.subr.bf16.mxu0 %v5764_v14  ;;  %v342_v14 = vld [vmem:[#allocation6 + $0x310] sm:$0xff]  ;;  %v381_v61 = vld [vmem:[#allocation6 + $0x448] sm:$0xff] }
 0x160   :  { %v393_v6 = vld [vmem:[#allocation6 + $0x4a8] sm:$0xff] }
 0x161   :  { %1913 = vmatpush1.bf16.msra.mxu1 %v5761_v17  ;;  %v346_v17 = vld [vmem:[#allocation6 + $0x330] sm:$0xff] }
 0x162   :  { %1995 = vmatpush1.bf16.msra.mxu0 %v5763_v21  ;;  %1914 = vmatprep.subr.bf16.mxu1 %v5770_v23  ;;  %v5817_v21 = vcombine.low %v333_v4, %v337_v5  ;;  %v5826_v23 = vcombine.high %v341_v12, %v345_v13  ;;  %v389_v5 = vld [vmem:[#allocation6 + $0x488] sm:$0xff] }
 0x163   :  { %1996 = vmatprep.subr.bf16.mxu0 %v5772_v24  ;;  %v5828_v24 = vcombine.high %v342_v14, %v346_v17 }
 0x165   :  { %1915 = vmatpush1.bf16.msra.mxu1 %v5769_v28  ;;  %v354_v28 = vld [vmem:[#allocation6 + $0x370] sm:$0xff] }
 0x166   :  { %1997 = vmatpush1.bf16.msra.mxu0 %v5771_v29  ;;  %1916 = vmatprep.subr.bf16.mxu1 %v5778_v30  ;;  %v5825_v29 = vcombine.low %v341_v12, %v345_v13  ;;  %v5827_v30 = vcombine.low %v342_v14, %v346_v17  ;;  %v5836_v32 = vcombine.high %v350_v27, %v354_v28  ;;  %v397_v13 = vld [vmem:[#allocation6 + $0x4c8] sm:$0xff]  ;;  %v398_v17 = vld [vmem:[#allocation6 + $0x4d0] sm:$0xff] }
 0x167   :  { %1998 = vmatprep.subr.bf16.mxu0 %v5780_v31  ;;  %v5834_v31 = vcombine.high %v349_v25, %v353_v26  ;;  %v401_v14 = vld [vmem:[#allocation6 + $0x4e8] sm:$0xff] }
 0x169   :  { %1917 = vmatpush1.bf16.msra.mxu1 %v5777_v36  ;;  %v362_v36 = vld [vmem:[#allocation6 + $0x3b0] sm:$0xff] }
 0x16a   :  { %1999 = vmatpush1.bf16.msra.mxu0 %v5779_v37  ;;  %1918 = vmatprep.subr.bf16.mxu1 %v5786_v38  ;;  %v5833_v37 = vcombine.low %v349_v25, %v353_v26  ;;  %v5835_v38 = vcombine.low %v350_v27, %v354_v28  ;;  %v5844_v40 = vcombine.high %v358_v35, %v362_v36  ;;  %v405_v26 = vld [vmem:[#allocation6 + $0x508] sm:$0xff]  ;;  %v406_v28 = vld [vmem:[#allocation6 + $0x510] sm:$0xff] }
 0x16b   :  { %2000 = vmatprep.subr.bf16.mxu0 %v5788_v39  ;;  %v5842_v39 = vcombine.high %v357_v33, %v361_v34  ;;  %v409_v27 = vld [vmem:[#allocation6 + $0x528] sm:$0xff] }
 0x16d   :  { %1919 = vmatpush1.bf16.msra.mxu1 %v5785_v44  ;;  %v370_v44 = vld [vmem:[#allocation6 + $0x3f0] sm:$0xff] }
 0x16e   :  { %2001 = vmatpush1.bf16.msra.mxu0 %v5787_v48  ;;  %1920 = vmatprep.subr.bf16.mxu1 %v5794_v49  ;;  %v5841_v48 = vcombine.low %v357_v33, %v361_v34  ;;  %v5843_v49 = vcombine.low %v358_v35, %v362_v36  ;;  %v5852_v52 = vcombine.high %v366_v43, %v370_v44  ;;  %v413_v34 = vld [vmem:[#allocation6 + $0x548] sm:$0xff]  ;;  %v414_v36 = vld [vmem:[#allocation6 + $0x550] sm:$0xff] }
 0x16f   :  { %2002 = vmatprep.subr.bf16.mxu0 %v5796_v51  ;;  %v5850_v51 = vcombine.high %v365_v41, %v369_v42  ;;  %v417_v35 = vld [vmem:[#allocation6 + $0x568] sm:$0xff] }
 0x171   :  { %1921 = vmatpush1.bf16.msra.mxu1 %v5793_v56  ;;  %v378_v56 = vld [vmem:[#allocation6 + $0x430] sm:$0xff] }
 0x172   :  { %2003 = vmatpush1.bf16.msra.mxu0 %v5795_v57  ;;  %1922 = vmatprep.subr.bf16.mxu1 %v5802_v58  ;;  %v5849_v57 = vcombine.low %v365_v41, %v369_v42  ;;  %v5851_v58 = vcombine.low %v366_v43, %v370_v44  ;;  %v5860_v60 = vcombine.high %v374_v55, %v378_v56  ;;  %v421_v42 = vld [vmem:[#allocation6 + $0x588] sm:$0xff]  ;;  %v422_v44 = vld [vmem:[#allocation6 + $0x590] sm:$0xff] }
 0x173   :  { %2004 = vmatprep.subr.bf16.mxu0 %v5804_v59  ;;  %v5858_v59 = vcombine.high %v373_v53, %v377_v54  ;;  %v425_v43 = vld [vmem:[#allocation6 + $0x5a8] sm:$0xff] }
 0x175   :  { %1923 = vmatpush1.bf16.msra.mxu1 %v5801_v0  ;;  %v386_v0 = vld [vmem:[#allocation6 + $0x470] sm:$0xff] }
 0x176   :  { %2005 = vmatpush1.bf16.msra.mxu0 %v5803_v1  ;;  %1924 = vmatprep.subr.bf16.mxu1 %v5810_v2  ;;  %v5857_v1 = vcombine.low %v373_v53, %v377_v54  ;;  %v5859_v2 = vcombine.low %v374_v55, %v378_v56  ;;  %v5868_v4 = vcombine.high %v382_v63, %v386_v0  ;;  %v429_v54 = vld [vmem:[#allocation6 + $0x5c8] sm:$0xff]  ;;  %v430_v56 = vld [vmem:[#allocation6 + $0x5d0] sm:$0xff] }
 0x177   :  { %2006 = vmatprep.subr.bf16.mxu0 %v5812_v3  ;;  %v5866_v3 = vcombine.high %v381_v61, %v385_v62  ;;  %v433_v55 = vld [vmem:[#allocation6 + $0x5e8] sm:$0xff] }
 0x179   :  { %1925 = vmatpush1.bf16.msra.mxu1 %v5809_v8  ;;  %v394_v8 = vld [vmem:[#allocation6 + $0x4b0] sm:$0xff] }
 0x17a   :  { %2007 = vmatpush1.bf16.msra.mxu0 %v5811_v9  ;;  %1926 = vmatprep.subr.bf16.mxu1 %v5818_v10  ;;  %v5865_v9 = vcombine.low %v381_v61, %v385_v62  ;;  %v5867_v10 = vcombine.low %v382_v63, %v386_v0  ;;  %v5876_v12 = vcombine.high %v390_v7, %v394_v8  ;;  %v437_v62 = vld [vmem:[#allocation6 + $0x608] sm:$0xff]  ;;  %v438_v0 = vld [vmem:[#allocation6 + $0x610] sm:$0xff] }
 0x17b   :  { %2008 = vmatprep.subr.bf16.mxu0 %v5820_v11  ;;  %v5874_v11 = vcombine.high %v389_v5, %v393_v6  ;;  %v441_v63 = vld [vmem:[#allocation6 + $0x628] sm:$0xff] }
 0x17d   :  { %1927 = vmatpush1.bf16.msra.mxu1 %v5817_v21  ;;  %v402_v21 = vld [vmem:[#allocation6 + $0x4f0] sm:$0xff] }
 0x17e   :  { %2009 = vmatpush1.bf16.msra.mxu0 %v5819_v22  ;;  %1928 = vmatprep.subr.bf16.mxu1 %v5826_v23  ;;  %v5873_v22 = vcombine.low %v389_v5, %v393_v6  ;;  %v5875_v23 = vcombine.low %v390_v7, %v394_v8  ;;  %v5884_v25 = vcombine.high %v398_v17, %v402_v21  ;;  %v445_v6 = vld [vmem:[#allocation6 + $0x648] sm:$0xff]  ;;  %v446_v8 = vld [vmem:[#allocation6 + $0x650] sm:$0xff] }
 0x17f   :  { %2010 = vmatprep.subr.bf16.mxu0 %v5828_v24  ;;  %v5882_v24 = vcombine.high %v397_v13, %v401_v14  ;;  %v449_v7 = vld [vmem:[#allocation6 + $0x668] sm:$0xff] }
 0x181   :  { %1929 = vmatpush1.bf16.msra.mxu1 %v5825_v29  ;;  %v410_v29 = vld [vmem:[#allocation6 + $0x530] sm:$0xff] }
 0x182   :  { %2011 = vmatpush1.bf16.msra.mxu0 %v5827_v30  ;;  %1930 = vmatprep.subr.bf16.mxu1 %v5834_v31  ;;  %v5881_v30 = vcombine.low %v397_v13, %v401_v14  ;;  %v5883_v31 = vcombine.low %v398_v17, %v402_v21  ;;  %v5892_v33 = vcombine.high %v406_v28, %v410_v29  ;;  %v453_v14 = vld [vmem:[#allocation6 + $0x688] sm:$0xff]  ;;  %v454_v21 = vld [vmem:[#allocation6 + $0x690] sm:$0xff] }
 0x183   :  { %2012 = vmatprep.subr.bf16.mxu0 %v5836_v32  ;;  %v5890_v32 = vcombine.high %v405_v26, %v409_v27  ;;  %v457_v17 = vld [vmem:[#allocation6 + $0x6a8] sm:$0xff] }
 0x185   :  { %1931 = vmatpush1.bf16.msra.mxu1 %v5833_v37  ;;  %v418_v37 = vld [vmem:[#allocation6 + $0x570] sm:$0xff] }
 0x186   :  { %2013 = vmatpush1.bf16.msra.mxu0 %v5835_v38  ;;  %1932 = vmatprep.subr.bf16.mxu1 %v5842_v39  ;;  %v5889_v38 = vcombine.low %v405_v26, %v409_v27  ;;  %v5891_v39 = vcombine.low %v406_v28, %v410_v29  ;;  %v5900_v41 = vcombine.high %v414_v36, %v418_v37  ;;  %v461_v27 = vld [vmem:[#allocation6 + $0x6c8] sm:$0xff]  ;;  %v462_v29 = vld [vmem:[#allocation6 + $0x6d0] sm:$0xff] }
 0x187   :  { %2014 = vmatprep.subr.bf16.mxu0 %v5844_v40  ;;  %v5898_v40 = vcombine.high %v413_v34, %v417_v35  ;;  %v465_v28 = vld [vmem:[#allocation6 + $0x6e8] sm:$0xff] }
 0x189   :  { %1933 = vmatpush1.bf16.msra.mxu1 %v5841_v48  ;;  %v426_v48 = vld [vmem:[#allocation6 + $0x5b0] sm:$0xff] }
 0x18a   :  { %2015 = vmatpush1.bf16.msra.mxu0 %v5843_v49  ;;  %1934 = vmatprep.subr.bf16.mxu1 %v5850_v51  ;;  %v5897_v49 = vcombine.low %v413_v34, %v417_v35  ;;  %v5899_v51 = vcombine.low %v414_v36, %v418_v37  ;;  %v5908_v53 = vcombine.high %v422_v44, %v426_v48  ;;  %v469_v35 = vld [vmem:[#allocation6 + $0x708] sm:$0xff]  ;;  %v470_v37 = vld [vmem:[#allocation6 + $0x710] sm:$0xff] }
 0x18b   :  { %2016 = vmatprep.subr.bf16.mxu0 %v5852_v52  ;;  %v5906_v52 = vcombine.high %v421_v42, %v425_v43  ;;  %v473_v36 = vld [vmem:[#allocation6 + $0x728] sm:$0xff] }
 0x18d   :  { %1935 = vmatpush1.bf16.msra.mxu1 %v5849_v57  ;;  %v434_v57 = vld [vmem:[#allocation6 + $0x5f0] sm:$0xff] }
 0x18e   :  { %2017 = vmatpush1.bf16.msra.mxu0 %v5851_v58  ;;  %1945 = vmatprep.subr.bf16.mxu1 %v5858_v59  ;;  %v5905_v58 = vcombine.low %v421_v42, %v425_v43  ;;  %v5907_v59 = vcombine.low %v422_v44, %v426_v48  ;;  %v5916_v61 = vcombine.high %v430_v56, %v434_v57  ;;  %v477_v43 = vld [vmem:[#allocation6 + $0x748] sm:$0xff]  ;;  %v478_v48 = vld [vmem:[#allocation6 + $0x750] sm:$0xff] }
 0x18f   :  { %2027 = vmatprep.subr.bf16.mxu0 %v5860_v60  ;;  %v5914_v60 = vcombine.high %v429_v54, %v433_v55  ;;  %v481_v44 = vld [vmem:[#allocation6 + $0x768] sm:$0xff] }
 0x190   :  { %1937 = vmatmul.mubr.bf16.vlgmr.msra.gmra.mrb[8].mxu1 %v7565_v50 }
 0x191   :  { %2019 = vmatmul.mubr.bf16.vlgmr.msra.gmra.mrb[8].mxu0 %v7565_v50  ;;  %1946 = vmatpush1.bf16.msra.mxu1 %v5857_v1  ;;  %v442_v1 = vld [vmem:[#allocation6 + $0x630] sm:$0xff] }
 0x192   :  { %1977 = vmatprep.mubr.bf16.mxu1 %v7563_v47  ;;  %2028 = vmatpush1.bf16.msra.mxu0 %v5859_v2  ;;  %v5913_v2 = vcombine.low %v429_v54, %v433_v55  ;;  %v5924_v5 = vcombine.high %v438_v0, %v442_v1  ;;  %v485_v55 = vld [vmem:[#allocation6 + $0x788] sm:$0xff] }
 0x193   :  { %2059 = vmatprep.mubr.bf16.mxu0 %v7563_v47  ;;  %1947 = vmatprep.subr.bf16.mxu1 %v5866_v3  ;;  %v5915_v3 = vcombine.low %v430_v56, %v434_v57  ;;  %v489_v56 = vld [vmem:[#allocation6 + $0x7a8] sm:$0xff]  ;;  %v486_v57 = vld [vmem:[#allocation6 + $0x790] sm:$0xff] }
 0x194   :  { %2029 = vmatprep.subr.bf16.mxu0 %v5868_v4  ;;  %v5922_v4 = vcombine.high %v437_v62, %v441_v63 }
 0x195   :  { %1948 = vmatpush1.bf16.msra.mxu1 %v5865_v9  ;;  %v450_v9 = vld [vmem:[#allocation6 + $0x670] sm:$0xff] }
 0x196   :  { %2030 = vmatpush1.bf16.msra.mxu0 %v5867_v10  ;;  %1949 = vmatprep.subr.bf16.mxu1 %v5874_v11  ;;  %v5921_v10 = vcombine.low %v437_v62, %v441_v63  ;;  %v5923_v11 = vcombine.low %v438_v0, %v442_v1  ;;  %v5932_v13 = vcombine.high %v446_v8, %v450_v9  ;;  %v493_v63 = vld [vmem:[#allocation6 + $0x7c8] sm:$0xff]  ;;  %v494_v1 = vld [vmem:[#allocation6 + $0x7d0] sm:$0xff] }
 0x197   :  { %2031 = vmatprep.subr.bf16.mxu0 %v5876_v12  ;;  %v5930_v12 = vcombine.high %v445_v6, %v449_v7  ;;  %v497_v0 = vld [vmem:[#allocation6 + $0x7e8] sm:$0xff] }
 0x199   :  { %1950 = vmatpush1.bf16.msra.mxu1 %v5873_v22  ;;  %v458_v22 = vld [vmem:[#allocation6 + $0x6b0] sm:$0xff] }
 0x19a   :  { %2032 = vmatpush1.bf16.msra.mxu0 %v5875_v23  ;;  %1951 = vmatprep.subr.bf16.mxu1 %v5882_v24  ;;  %v5929_v23 = vcombine.low %v445_v6, %v449_v7  ;;  %v5931_v24 = vcombine.low %v446_v8, %v450_v9  ;;  %v5940_v26 = vcombine.high %v454_v21, %v458_v22  ;;  %v247_v7 = vld [vmem:[#allocation6 + $0x18] sm:$0xff] }
 0x19b   :  { %2033 = vmatprep.subr.bf16.mxu0 %v5884_v25  ;;  %v5938_v25 = vcombine.high %v453_v14, %v457_v17  ;;  %v251_v8 = vld [vmem:[#allocation6 + $0x38] sm:$0xff]  ;;  %v5977_v9 = vcombine.low %v493_v63, %v497_v0 }
 0x19d   :  { %1952 = vmatpush1.bf16.msra.mxu1 %v5881_v30  ;;  %v466_v30 = vld [vmem:[#allocation6 + $0x6f0] sm:$0xff] }
 0x19e   :  { %2034 = vmatpush1.bf16.msra.mxu0 %v5883_v31  ;;  %1953 = vmatprep.subr.bf16.mxu1 %v5890_v32  ;;  %v5937_v31 = vcombine.low %v453_v14, %v457_v17  ;;  %v5939_v32 = vcombine.low %v454_v21, %v458_v22  ;;  %v5948_v34 = vcombine.high %v462_v29, %v466_v30  ;;  %v6604_v14 = vld [vmem:[#allocation9 + $0x4] ss:$28 sps:$4 sm:$0xff]   ;;  %v263_v22 = vld [vmem:[#allocation6 + $0x98] sm:$0xff] }
 0x19f   :  { %2035 = vmatprep.subr.bf16.mxu0 %v5892_v33  ;;  %v5946_v33 = vcombine.high %v461_v27, %v465_v28  ;;  %v5733_v17 = vcombine.low %v247_v7, %v251_v8 }
 0x1a1   :  { %1954 = vmatpush1.bf16.msra.mxu1 %v5889_v38  ;;  %v474_v38 = vld [vmem:[#allocation6 + $0x730] sm:$0xff] }
 0x1a2   :  { %2036 = vmatpush1.bf16.msra.mxu0 %v5891_v39  ;;  %1955 = vmatprep.subr.bf16.mxu1 %v5898_v40  ;;  %v5945_v39 = vcombine.low %v461_v27, %v465_v28  ;;  %v5947_v40 = vcombine.low %v462_v29, %v466_v30  ;;  %v5956_v42 = vcombine.high %v470_v37, %v474_v38  ;;  %v271_v28 = vld [vmem:[#allocation6 + $0xd8] sm:$0xff] }
 0x1a3   :  { %2037 = vmatprep.subr.bf16.mxu0 %v5900_v41  ;;  %v5954_v41 = vcombine.high %v469_v35, %v473_v36  ;;  %v275_v29 = vld [vmem:[#allocation6 + $0xf8] sm:$0xff] }
 0x1a4   :  { %v6605_v30 = vld [vmem:[#allocation9 + $0x38] ss:$28 sps:$4 sm:$0xff]  }
 0x1a5   :  { %1956 = vmatpush1.bf16.msra.mxu1 %v5897_v49  ;;  %v482_v49 = vld [vmem:[#allocation6 + $0x770] sm:$0xff] }
 0x1a6   :  { %2038 = vmatpush1.bf16.msra.mxu0 %v5899_v51  ;;  %1957 = vmatprep.subr.bf16.mxu1 %v5906_v52  ;;  %v5953_v51 = vcombine.low %v469_v35, %v473_v36  ;;  %v5955_v52 = vcombine.low %v470_v37, %v474_v38  ;;  %v5964_v54 = vcombine.high %v478_v48, %v482_v49  ;;  %v283_v35 = vld [vmem:[#allocation6 + $0x138] sm:$0xff]  ;;  %v6613_v37 = vld [vmem:[#allocation9 + $0xac] ss:$28 sps:$4 sm:$0xff]  }
 0x1a7   :  { %2039 = vmatprep.subr.bf16.mxu0 %v5908_v53  ;;  %v5962_v53 = vcombine.high %v477_v43, %v481_v44  ;;  %v6608_v36 = vld [vmem:[#allocation9 + $0x70] ss:$28 sps:$4 sm:$0xff]  }
 0x1a9   :  { %1958 = vmatpush1.bf16.msra.mxu1 %v5905_v58  ;;  %v490_v58 = vld [vmem:[#allocation6 + $0x7b0] sm:$0xff] }
 0x1aa   :  { %2040 = vmatpush1.bf16.msra.mxu0 %v5907_v59  ;;  %1959 = vmatprep.subr.bf16.mxu1 %v5914_v60  ;;  %v5961_v59 = vcombine.low %v477_v43, %v481_v44  ;;  %v5963_v60 = vcombine.low %v478_v48, %v482_v49  ;;  %v5972_v62 = vcombine.high %v486_v57, %v490_v58  ;;  %v295_v48 = vld [vmem:[#allocation6 + $0x198] sm:$0xff] }
 0x1ab   :  { %2041 = vmatprep.subr.bf16.mxu0 %v5916_v61  ;;  %v5970_v61 = vcombine.high %v485_v55, %v489_v56  ;;  %v299_v49 = vld [vmem:[#allocation6 + $0x1b8] sm:$0xff] }
 0x1ad   :  { %1960 = vmatpush1.bf16.msra.mxu1 %v5913_v2  ;;  %v498_v2 = vld [vmem:[#allocation6 + $0x7f0] sm:$0xff] }
 0x1ae   :  { %2042 = vmatpush1.bf16.msra.mxu0 %v5915_v3  ;;  %1961 = vmatprep.subr.bf16.mxu1 %v5922_v4  ;;  %v5969_v3 = vcombine.low %v485_v55, %v489_v56  ;;  %v5971_v4 = vcombine.low %v486_v57, %v490_v58  ;;  %v5980_v6 = vcombine.high %v494_v1, %v498_v2  ;;  %v303_v55 = vld [vmem:[#allocation6 + $0x1d8] sm:$0xff] }
 0x1af   :  { %2043 = vmatprep.subr.bf16.mxu0 %v5924_v5  ;;  %v5978_v5 = vcombine.high %v493_v63, %v497_v0  ;;  %v307_v56 = vld [vmem:[#allocation6 + $0x1f8] sm:$0xff]  ;;  %v6625_v0 = vld [vmem:[#allocation9 + $0x18c] ss:$28 sps:$4 sm:$0xff]  }
 0x1b0   :  { %v6617_v57 = vld [vmem:[#allocation9 + $0x118] ss:$28 sps:$4 sm:$0xff]   ;;  %v6620_v63 = vld [vmem:[#allocation9 + $0x150] ss:$28 sps:$4 sm:$0xff]  }
 0x1b1   :  { %1962 = vmatpush1.bf16.msra.mxu1 %v5921_v10  ;;  %v5979_v10 = vcombine.low %v494_v1, %v498_v2  ;;  %v6622_v58 = vld [vmem:[#allocation9 + $0x154] ss:$28 sps:$4 sm:$0xff]   ;;  %v5789_v1 = vcombine.low %v303_v55, %v307_v56 }
 0x1b2   :  { %2044 = vmatpush1.bf16.msra.mxu0 %v5923_v11  ;;  %1963 = vmatprep.subr.bf16.mxu1 %v5930_v12  ;;  %v5734_v11 = vcombine.high %v247_v7, %v251_v8  ;;  %v255_v12 = vld [vmem:[#allocation6 + $0x58] sm:$0xff] }
 0x1b3   :  { %2045 = vmatprep.subr.bf16.mxu0 %v5932_v13  ;;  %v259_v13 = vld [vmem:[#allocation6 + $0x78] sm:$0xff] }
 0x1b4   :  { %v5742_v21 = vcombine.high %v255_v12, %v259_v13 }
 0x1b5   :  { %1964 = vmatpush1.bf16.msra.mxu1 %v5929_v23  ;;  %v267_v23 = vld [vmem:[#allocation6 + $0xb8] sm:$0xff] }
 0x1b6   :  { %2046 = vmatpush1.bf16.msra.mxu0 %v5931_v24  ;;  %1965 = vmatprep.subr.bf16.mxu1 %v5938_v25  ;;  %v6602_v24 = vld [vmem:[#allocation9] ss:$28 sps:$4 sm:$0xff]   ;;  %v5750_v27 = vcombine.high %v263_v22, %v267_v23 }
 0x1b7   :  { %2047 = vmatprep.subr.bf16.mxu0 %v5940_v26  ;;  %v6607_v25 = vld [vmem:[#allocation9 + $0x3c] ss:$28 sps:$4 sm:$0xff]   ;;  %v5741_v26 = vcombine.low %v255_v12, %v259_v13 }
 0x1b8   :  { %v6631_v12 = vld [vmem:[#allocation9 + $0x1fc] ss:$28 sps:$4 sm:$0xff]  }
 0x1b9   :  { %1966 = vmatpush1.bf16.msra.mxu1 %v5937_v31  ;;  %v6610_v31 = vld [vmem:[#allocation9 + $0x74] ss:$28 sps:$4 sm:$0xff]  }
 0x1ba   :  { %2048 = vmatpush1.bf16.msra.mxu0 %v5939_v32  ;;  %1967 = vmatprep.subr.bf16.mxu1 %v5946_v33  ;;  %v5749_v32 = vcombine.low %v263_v22, %v267_v23  ;;  %v5758_v33 = vcombine.high %v271_v28, %v275_v29  ;;  %v6629_v22 = vld [vmem:[#allocation9 + $0x1f8] ss:$28 sps:$4 sm:$0xff]  }
 0x1bb   :  { %2049 = vmatprep.subr.bf16.mxu0 %v5948_v34  ;;  %v279_v34 = vld [vmem:[#allocation6 + $0x118] sm:$0xff] }
 0x1bc   :  { %v5766_v38 = vcombine.high %v279_v34, %v283_v35  ;;  %v5765_v43 = vcombine.low %v279_v34, %v283_v35  ;;  %v6634_v23 = vld [vmem:[#allocation9 + $0x234] ss:$28 sps:$4 sm:$0xff]   ;;  %v6635_v34 = vld [vmem:[#allocation9 + $0x268] ss:$28 sps:$4 sm:$0xff]  }
 0x1bd   :  { %1968 = vmatpush1.bf16.msra.mxu1 %v5945_v39  ;;  %v287_v39 = vld [vmem:[#allocation6 + $0x158] sm:$0xff]  ;;  %v6640_v35 = vld [vmem:[#allocation9 + $0x2a4] ss:$28 sps:$4 sm:$0xff]  }
 0x1be   :  { %2050 = vmatpush1.bf16.msra.mxu0 %v5947_v40  ;;  %1969 = vmatprep.subr.bf16.mxu1 %v5954_v41  ;;  %v291_v40 = vld [vmem:[#allocation6 + $0x178] sm:$0xff]  ;;  %v6611_v41 = vld [vmem:[#allocation9 + $0xa8] ss:$28 sps:$4 sm:$0xff]  }
 0x1bf   :  { %2051 = vmatprep.subr.bf16.mxu0 %v5956_v42  ;;  %v6616_v42 = vld [vmem:[#allocation9 + $0xe4] ss:$28 sps:$4 sm:$0xff]   ;;  %v5774_v44 = vcombine.high %v287_v39, %v291_v40 }
 0x1c1   :  { %1970 = vmatpush1.bf16.msra.mxu1 %v5953_v51  ;;  %v6614_v51 = vld [vmem:[#allocation9 + $0xe0] ss:$28 sps:$4 sm:$0xff]  }
 0x1c2   :  { %2052 = vmatpush1.bf16.msra.mxu0 %v5955_v52  ;;  %1971 = vmatprep.subr.bf16.mxu1 %v5962_v53  ;;  %v6619_v52 = vld [vmem:[#allocation9 + $0x11c] ss:$28 sps:$4 sm:$0xff]   ;;  %v5773_v53 = vcombine.low %v287_v39, %v291_v40 }
 0x1c3   :  { %2053 = vmatprep.subr.bf16.mxu0 %v5964_v54  ;;  %v5782_v54 = vcombine.high %v295_v48, %v299_v49  ;;  %v6638_v39 = vld [vmem:[#allocation9 + $0x2a0] ss:$28 sps:$4 sm:$0xff]  }
 0x1c4   :  { %v6643_v40 = vld [vmem:[#allocation9 + $0x2dc] ss:$28 sps:$4 sm:$0xff]  }
 0x1c5   :  { %1972 = vmatpush1.bf16.msra.mxu1 %v5961_v59  ;;  %v5781_v59 = vcombine.low %v295_v48, %v299_v49  ;;  %v6641_v48 = vld [vmem:[#allocation9 + $0x2d8] ss:$28 sps:$4 sm:$0xff]  }
 0x1c6   :  { %2054 = vmatpush1.bf16.msra.mxu0 %v5963_v60  ;;  %1973 = vmatprep.subr.bf16.mxu1 %v5970_v61  ;;  %v5790_v60 = vcombine.high %v303_v55, %v307_v56  ;;  %v311_v61 = vld [vmem:[#allocation6 + $0x218] sm:$0xff]  ;;  %v6649_v56 = vld [vmem:[#allocation9 + $0x34c] ss:$28 sps:$4 sm:$0xff]  }
 0x1c7   :  { %2055 = vmatprep.subr.bf16.mxu0 %v5972_v62  ;;  %v315_v62 = vld [vmem:[#allocation6 + $0x238] sm:$0xff] }
 0x1c8   :  { %v5798_v2 = vcombine.high %v311_v61, %v315_v62  ;;  %v5797_v7 = vcombine.low %v311_v61, %v315_v62  ;;  %v6646_v49 = vld [vmem:[#allocation9 + $0x314] ss:$28 sps:$4 sm:$0xff]   ;;  %v6647_v61 = vld [vmem:[#allocation9 + $0x348] ss:$28 sps:$4 sm:$0xff]  }
 0x1c9   :  { %1974 = vmatpush1.bf16.msra.mxu1 %v5969_v3  ;;  %v319_v3 = vld [vmem:[#allocation6 + $0x258] sm:$0xff]  ;;  %v6673_v62 = vld [vmem:[#allocation9 + $0x384] ss:$28 sps:$4 sm:$0xff]  }
 0x1ca   :  { %2056 = vmatpush1.bf16.msra.mxu0 %v5971_v4  ;;  %1975 = vmatprep.subr.bf16.mxu1 %v5978_v5  ;;  %v323_v4 = vld [vmem:[#allocation6 + $0x278] sm:$0xff]  ;;  %v6623_v5 = vld [vmem:[#allocation9 + $0x188] ss:$28 sps:$4 sm:$0xff]  }
 0x1cb   :  { %2057 = vmatprep.subr.bf16.mxu0 %v5980_v6  ;;  %v6628_v6 = vld [vmem:[#allocation9 + $0x1c4] ss:$28 sps:$4 sm:$0xff]   ;;  %v5806_v8 = vcombine.high %v319_v3, %v323_v4  ;;  %v5805_v13 = vcombine.low %v319_v3, %v323_v4  ;;  %v6644_v55 = vld [vmem:[#allocation9 + $0x310] ss:$28 sps:$4 sm:$0xff]  }
 0x1cd   :  { %1976 = vmatpush1.bf16.msra.mxu1 %v5977_v9  ;;  %v327_v9 = vld [vmem:[#allocation6 + $0x298] sm:$0xff] }
 0x1ce   :  { %2058 = vmatpush1.bf16.msra.mxu0 %v5979_v10  ;;  %2068 = vmatprep.subr.bf16.mxu1 %v5734_v11  ;;  %v331_v10 = vld [vmem:[#allocation6 + $0x2b8] sm:$0xff]  ;;  %v6626_v11 = vld [vmem:[#allocation9 + $0x1c0] ss:$28 sps:$4 sm:$0xff]  }
 0x1cf   :  { %5019 = vmatprep.subr.bf16.mxu0 %v6604_v14  ;;  %v5814_v14 = vcombine.high %v327_v9, %v331_v10 }
 0x1d0   :  { %1978 = vmatmul.mubr.bf16.vlgmr.msra.gmra.mrb[8].mxu1 %v7559_v45 }
 0x1d1   :  { %2060 = vmatmul.mubr.bf16.vlgmr.msra.gmra.mrb[8].mxu0 %v7559_v45  ;;  %2069 = vmatpush1.bf16.msra.mxu1 %v5733_v17  ;;  %v335_v17 = vld [vmem:[#allocation6 + $0x2d8] sm:$0xff] }
 0x1d2   :  { %2100 = vmatprep.mubr.bf16.mxu1 %v7561_v46  ;;  %2070 = vmatprep.subr.bf16.mxu1 %v5742_v21  ;;  %v5757_v46 = vcombine.low %v271_v28, %v275_v29  ;;  %v339_v21 = vld [vmem:[#allocation6 + $0x2f8] sm:$0xff]  ;;  %v6637_v29 = vld [vmem:[#allocation9 + $0x26c] ss:$28 sps:$4 sm:$0xff]  }
 0x1d3   :  { %5020 = vmatpush1.bf16.msra.mxu0 %v6602_v24  ;;  %v5813_v24 = vcombine.low %v327_v9, %v331_v10  ;;  %v6632_v28 = vld [vmem:[#allocation9 + $0x230] ss:$28 sps:$4 sm:$0xff]  }
 0x1d4   :  { %5021 = vmatprep.subr.bf16.mxu0 %v6607_v25  ;;  %v5822_v25 = vcombine.high %v335_v17, %v339_v21  ;;  %v407_v9 = vld [vmem:[#allocation6 + $0x518] sm:$0xff] }
 0x1d5   :  { %2071 = vmatpush1.bf16.msra.mxu1 %v5741_v26  ;;  %v343_v26 = vld [vmem:[#allocation6 + $0x318] sm:$0xff] }
 0x1d6   :  { %2072 = vmatprep.subr.bf16.mxu1 %v5750_v27  ;;  %v347_v27 = vld [vmem:[#allocation6 + $0x338] sm:$0xff] }
 0x1d7   :  { %5022 = vmatpush1.bf16.msra.mxu0 %v6605_v30  ;;  %v5821_v30 = vcombine.low %v335_v17, %v339_v21  ;;  %v411_v10 = vld [vmem:[#allocation6 + $0x538] sm:$0xff] }
 0x1d8   :  { %5023 = vmatprep.subr.bf16.mxu0 %v6610_v31  ;;  %v5830_v31 = vcombine.high %v343_v26, %v347_v27  ;;  %v423_v21 = vld [vmem:[#allocation6 + $0x598] sm:$0xff] }
 0x1d9   :  { %2073 = vmatpush1.bf16.msra.mxu1 %v5749_v32  ;;  %v351_v32 = vld [vmem:[#allocation6 + $0x358] sm:$0xff] }
 0x1da   :  { %2074 = vmatprep.subr.bf16.mxu1 %v5758_v33  ;;  %v355_v33 = vld [vmem:[#allocation6 + $0x378] sm:$0xff] }
 0x1db   :  { %5024 = vmatpush1.bf16.msra.mxu0 %v6608_v36  ;;  %v5829_v36 = vcombine.low %v343_v26, %v347_v27 }
 0x1dc   :  { %5025 = vmatprep.subr.bf16.mxu0 %v6613_v37  ;;  %v5838_v37 = vcombine.high %v351_v32, %v355_v33 }
 0x1dd   :  { %2075 = vmatpush1.bf16.msra.mxu1 %v5757_v46  ;;  %v359_v46 = vld [vmem:[#allocation6 + $0x398] sm:$0xff] }
 0x1de   :  { %2076 = vmatprep.subr.bf16.mxu1 %v5766_v38  ;;  %v363_v38 = vld [vmem:[#allocation6 + $0x3b8] sm:$0xff] }
 0x1df   :  { %5026 = vmatpush1.bf16.msra.mxu0 %v6611_v41  ;;  %v5837_v41 = vcombine.low %v351_v32, %v355_v33 }
 0x1e0   :  { %5027 = vmatprep.subr.bf16.mxu0 %v6616_v42  ;;  %v5846_v42 = vcombine.high %v359_v46, %v363_v38 }
 0x1e1   :  { %2077 = vmatpush1.bf16.msra.mxu1 %v5765_v43  ;;  %v367_v43 = vld [vmem:[#allocation6 + $0x3d8] sm:$0xff] }
 0x1e2   :  { %2078 = vmatprep.subr.bf16.mxu1 %v5774_v44  ;;  %v371_v44 = vld [vmem:[#allocation6 + $0x3f8] sm:$0xff] }
 0x1e3   :  { %5028 = vmatpush1.bf16.msra.mxu0 %v6614_v51  ;;  %v5845_v51 = vcombine.low %v359_v46, %v363_v38 }
 0x1e4   :  { %5029 = vmatprep.subr.bf16.mxu0 %v6619_v52  ;;  %v5854_v52 = vcombine.high %v367_v43, %v371_v44 }
 0x1e5   :  { %2079 = vmatpush1.bf16.msra.mxu1 %v5773_v53  ;;  %v375_v53 = vld [vmem:[#allocation6 + $0x418] sm:$0xff] }
 0x1e6   :  { %2080 = vmatprep.subr.bf16.mxu1 %v5782_v54  ;;  %v379_v54 = vld [vmem:[#allocation6 + $0x438] sm:$0xff] }
 0x1e7   :  { %5030 = vmatpush1.bf16.msra.mxu0 %v6617_v57  ;;  %v5853_v57 = vcombine.low %v367_v43, %v371_v44  ;;  %v443_v43 = vld [vmem:[#allocation6 + $0x638] sm:$0xff] }
 0x1e8   :  { %5031 = vmatprep.subr.bf16.mxu0 %v6622_v58  ;;  %v5862_v58 = vcombine.high %v375_v53, %v379_v54 }
 0x1e9   :  { %2081 = vmatpush1.bf16.msra.mxu1 %v5781_v59  ;;  %v383_v59 = vld [vmem:[#allocation6 + $0x458] sm:$0xff] }
 0x1ea   :  { %2082 = vmatprep.subr.bf16.mxu1 %v5790_v60  ;;  %v387_v60 = vld [vmem:[#allocation6 + $0x478] sm:$0xff] }
 0x1eb   :  { %5032 = vmatpush1.bf16.msra.mxu0 %v6620_v63  ;;  %v5861_v63 = vcombine.low %v375_v53, %v379_v54  ;;  %v5869_v3 = vcombine.low %v383_v59, %v387_v60  ;;  %v447_v53 = vld [vmem:[#allocation6 + $0x658] sm:$0xff] }
 0x1ec   :  { %5033 = vmatprep.subr.bf16.mxu0 %v6625_v0  ;;  %v5870_v0 = vcombine.high %v383_v59, %v387_v60  ;;  %v451_v54 = vld [vmem:[#allocation6 + $0x678] sm:$0xff] }
 0x1ed   :  { %2083 = vmatpush1.bf16.msra.mxu1 %v5789_v1  ;;  %v391_v1 = vld [vmem:[#allocation6 + $0x498] sm:$0xff]  ;;  %v5934_v59 = vcombine.high %v447_v53, %v451_v54 }
 0x1ee   :  { %2084 = vmatprep.subr.bf16.mxu1 %v5798_v2  ;;  %v395_v2 = vld [vmem:[#allocation6 + $0x4b8] sm:$0xff] }
 0x1ef   :  { %5034 = vmatpush1.bf16.msra.mxu0 %v6623_v5  ;;  %v5878_v4 = vcombine.high %v391_v1, %v395_v2  ;;  %v399_v5 = vld [vmem:[#allocation6 + $0x4d8] sm:$0xff] }
 0x1f0   :  { %5035 = vmatprep.subr.bf16.mxu0 %v6628_v6  ;;  %v403_v6 = vld [vmem:[#allocation6 + $0x4f8] sm:$0xff] }
 0x1f1   :  { %2085 = vmatpush1.bf16.msra.mxu1 %v5797_v7  ;;  %v5877_v7 = vcombine.low %v391_v1, %v395_v2  ;;  %v455_v60 = vld [vmem:[#allocation6 + $0x698] sm:$0xff] }
 0x1f2   :  { %2086 = vmatprep.subr.bf16.mxu1 %v5806_v8  ;;  %v5886_v8 = vcombine.high %v399_v5, %v403_v6  ;;  %v463_v2 = vld [vmem:[#allocation6 + $0x6d8] sm:$0xff] }
 0x1f3   :  { %5036 = vmatpush1.bf16.msra.mxu0 %v6626_v11  ;;  %v5885_v11 = vcombine.low %v399_v5, %v403_v6  ;;  %v6691_v5 = vld [vmem:[#allocation9 + $0x42c] ss:$28 sps:$4 sm:$0xff]  }
 0x1f4   :  { %5037 = vmatprep.subr.bf16.mxu0 %v6631_v12  ;;  %v5894_v12 = vcombine.high %v407_v9, %v411_v10 }
 0x1f5   :  { %2087 = vmatpush1.bf16.msra.mxu1 %v5805_v13  ;;  %v419_v13 = vld [vmem:[#allocation6 + $0x578] sm:$0xff] }
 0x1f6   :  { %2088 = vmatprep.subr.bf16.mxu1 %v5814_v14  ;;  %v5893_v14 = vcombine.low %v407_v9, %v411_v10  ;;  %v475_v9 = vld [vmem:[#allocation6 + $0x738] sm:$0xff]  ;;  %v6689_v10 = vld [vmem:[#allocation9 + $0x428] ss:$28 sps:$4 sm:$0xff]  }
 0x1f7   :  { %5038 = vmatpush1.bf16.msra.mxu0 %v6629_v22  ;;  %v427_v22 = vld [vmem:[#allocation6 + $0x5b8] sm:$0xff] }
 0x1f8   :  { %5039 = vmatprep.subr.bf16.mxu0 %v6634_v23  ;;  %v5910_v26 = vcombine.high %v423_v21, %v427_v22 }
 0x1f9   :  { %2089 = vmatpush1.bf16.msra.mxu1 %v5813_v24 }
 0x1fa   :  { %2090 = vmatprep.subr.bf16.mxu1 %v5822_v25 }
 0x1fb   :  { %5040 = vmatpush1.bf16.msra.mxu0 %v6632_v28 }
 0x1fc   :  { %5041 = vmatprep.subr.bf16.mxu0 %v6637_v29  ;;  %v431_v29 = vld [vmem:[#allocation6 + $0x5d8] sm:$0xff] }
 0x1fd   :  { %2091 = vmatpush1.bf16.msra.mxu1 %v5821_v30  ;;  %v435_v30 = vld [vmem:[#allocation6 + $0x5f8] sm:$0xff] }
 0x1fe   :  { %2092 = vmatprep.subr.bf16.mxu1 %v5830_v31 }
 0x1ff   :  { %5042 = vmatpush1.bf16.msra.mxu0 %v6635_v34 }
 0x200   :  { %5043 = vmatprep.subr.bf16.mxu0 %v6640_v35 }
 0x201   :  { %2093 = vmatpush1.bf16.msra.mxu1 %v5829_v36  ;;  %v5909_v36 = vcombine.low %v423_v21, %v427_v22  ;;  %v6703_v21 = vld [vmem:[#allocation9 + $0x49c] ss:$28 sps:$4 sm:$0xff]  }
 0x202   :  { %2094 = vmatprep.subr.bf16.mxu1 %v5838_v37 }
 0x203   :  { %5044 = vmatpush1.bf16.msra.mxu0 %v6638_v39  ;;  %v5918_v39 = vcombine.high %v431_v29, %v435_v30 }
 0x204   :  { %5045 = vmatprep.subr.bf16.mxu0 %v6643_v40 }
 0x205   :  { %2095 = vmatpush1.bf16.msra.mxu1 %v5837_v41 }
 0x206   :  { %2096 = vmatprep.subr.bf16.mxu1 %v5846_v42  ;;  %v439_v42 = vld [vmem:[#allocation6 + $0x618] sm:$0xff] }
 0x207   :  { %5046 = vmatpush1.bf16.msra.mxu0 %v6641_v48 }
 0x208   :  { %5047 = vmatprep.subr.bf16.mxu0 %v6646_v49  ;;  %v5917_v49 = vcombine.low %v431_v29, %v435_v30  ;;  %v495_v30 = vld [vmem:[#allocation6 + $0x7d8] sm:$0xff] }
 0x209   :  { %2097 = vmatpush1.bf16.msra.mxu1 %v5845_v51  ;;  %v5926_v51 = vcombine.high %v439_v42, %v443_v43 }
 0x20a   :  { %2098 = vmatprep.subr.bf16.mxu1 %v5854_v52 }
 0x20b   :  { %5048 = vmatpush1.bf16.msra.mxu0 %v6644_v55  ;;  %v6671_v55 = vld [vmem:[#allocation9 + $0x380] ss:$28 sps:$4 sm:$0xff]  }
 0x20c   :  { %5049 = vmatprep.subr.bf16.mxu0 %v6649_v56 }
 0x20d   :  { %2099 = vmatpush1.bf16.msra.mxu1 %v5853_v57  ;;  %v6679_v57 = vld [vmem:[#allocation9 + $0x3bc] ss:$28 sps:$4 sm:$0xff]  }
 0x20e   :  { %2109 = vmatprep.subr.bf16.mxu1 %v5862_v58  ;;  %v5925_v58 = vcombine.low %v439_v42, %v443_v43  ;;  %v6655_v42 = vld [vmem:[#allocation9 + $0x44] ss:$28 sps:$4 sm:$0xff]   ;;  %v6725_v43 = vld [vmem:[#allocation9 + $0x578] ss:$28 sps:$4 sm:$0xff]  }
 0x20f   :  { %5050 = vmatpush1.bf16.msra.mxu0 %v6647_v61  ;;  %v459_v61 = vld [vmem:[#allocation6 + $0x6b8] sm:$0xff] }
 0x210   :  { %2101 = vmatmul.mubr.bf16.vlgmr.msra.gmra.mrb[12].mxu1 %v7565_v50  ;;  %5060 = vmatprep.subr.bf16.mxu0 %v6673_v62  ;;  %v415_v50 = vld [vmem:[#allocation6 + $0x558] sm:$0xff]  ;;  %v5942_v1 = vcombine.high %v455_v60, %v459_v61  ;;  %v5941_v6 = vcombine.low %v455_v60, %v459_v61  ;;  %v6743_v60 = vld [vmem:[#allocation9 + $0x620] ss:$28 sps:$4 sm:$0xff]  }
 0x211   :  { %2110 = vmatpush1.bf16.msra.mxu1 %v5861_v63  ;;  %2141 = vmatprep.mubr.bf16.mxu1 %v7563_v47  ;;  %v7582_v47 = vld [vmem:[#allocation7] sm:$0xff]  ;;  %v5902_v17 = vcombine.high %v415_v50, %v419_v13  ;;  %v5901_v24 = vcombine.low %v415_v50, %v419_v13  ;;  %v6685_v63 = vld [vmem:[#allocation9 + $0x3f4] ss:$28 sps:$4 sm:$0xff]  }
 0x212   :  { %2111 = vmatprep.subr.bf16.mxu1 %v5870_v0  ;;  %v505_v23 = vrot.slane %v7582_v47, %v7544_v16  ;;  %v509_v25 = vrot.slane %v7582_v47, %v7547_v18  ;;  %v6677_v62 = vld [vmem:[#allocation9 + $0x3b8] ss:$28 sps:$4 sm:$0xff]   ;;  %v5933_v0 = vcombine.low %v447_v53, %v451_v54  ;;  %v6739_v53 = vld [vmem:[#allocation9 + $0x5ec] ss:$28 sps:$4 sm:$0xff]  }
 0x213   :  { %v479_v13 = vld [vmem:[#allocation6 + $0x758] sm:$0xff]  ;;  %v6751_v61 = vld [vmem:[#allocation9 + $0x65c] ss:$28 sps:$4 sm:$0xff]  }
 0x214   :  { %v6656_v54 = vld [vmem:[#allocation9 + $0x78] ss:$28 sps:$4 sm:$0xff]  }
 0x215   :  { %2112 = vmatpush1.bf16.msra.mxu1 %v5869_v3  ;;  %v467_v3 = vld [vmem:[#allocation6 + $0x6f8] sm:$0xff] }
 0x216   :  { %2113 = vmatprep.subr.bf16.mxu1 %v5878_v4  ;;  %v6683_v4 = vld [vmem:[#allocation9 + $0x3f0] ss:$28 sps:$4 sm:$0xff]  }
 0x219   :  { %2114 = vmatpush1.bf16.msra.mxu1 %v5877_v7  ;;  %v5950_v7 = vcombine.high %v463_v2, %v467_v3 }
 0x21a   :  { %2115 = vmatprep.subr.bf16.mxu1 %v5886_v8  ;;  %v471_v8 = vld [vmem:[#allocation6 + $0x718] sm:$0xff] }
 0x21b   :  { %v5958_v50 = vcombine.high %v471_v8, %v475_v9  ;;  %v5957_v22 = vcombine.low %v471_v8, %v475_v9  ;;  %v6761_v8 = vld [vmem:[#allocation9 + $0x6c8] ss:$28 sps:$4 sm:$0xff]  }
 0x21c   :  { %v6769_v9 = vld [vmem:[#allocation9 + $0x704] ss:$28 sps:$4 sm:$0xff]  }
 0x21d   :  { %2116 = vmatpush1.bf16.msra.mxu1 %v5885_v11  ;;  %v6697_v11 = vld [vmem:[#allocation9 + $0x464] ss:$28 sps:$4 sm:$0xff]  }
 0x21e   :  { %2117 = vmatprep.subr.bf16.mxu1 %v5894_v12  ;;  %v5949_v12 = vcombine.low %v463_v2, %v467_v3  ;;  %v6665_v2 = vld [vmem:[#allocation9 + $0x120] ss:$28 sps:$4 sm:$0xff]  }
 0x21f   :  { %v6670_v3 = vld [vmem:[#allocation9 + $0x15c] ss:$28 sps:$4 sm:$0xff]  }
 0x221   :  { %2118 = vmatpush1.bf16.msra.mxu1 %v5893_v14  ;;  %v483_v14 = vld [vmem:[#allocation6 + $0x778] sm:$0xff] }
 0x222   :  { %2119 = vmatprep.subr.bf16.mxu1 %v5902_v17  ;;  %v6695_v17 = vld [vmem:[#allocation9 + $0x460] ss:$28 sps:$4 sm:$0xff]  }
 0x223   :  { %v1856_v27 = vpop.f32.mrb[4].mxu1 }
 0x224   :  { %v1897_v28 = vpop.f32.mrb[4].mxu0  ;;  %v1857_v31 = vadd.f32 %v1856_v27, %v505_v23  ;;  %v1858_v32 = vpop.f32.mrb[5].mxu1  ;;  %v5966_v23 = vcombine.high %v479_v13, %v483_v14  ;;  %v6709_v27 = vld [vmem:[#allocation9 + $0x4d4] ss:$28 sps:$4 sm:$0xff]  }
 0x225   :  { %v1899_v33 = vpop.f32.mrb[5].mxu0  ;;  %v1859_v34 = vadd.f32 %v1858_v32, %v509_v25  ;;  %2120 = vmatpush1.bf16.msra.mxu1 %v5901_v24  ;;  %v1860_v35 = vpop.f32.mrb[6].mxu1  ;;  %v487_v24 = vld [vmem:[#allocation6 + $0x798] sm:$0xff] }
 0x226   :  { %v1901_v37 = vpop.f32.mrb[6].mxu0  ;;  %v1898_v46 = vadd.f32 %v1897_v28, %v1857_v31  ;;  %v1861_v38 = vpop.f32.mrb[7].mxu1  ;;  %2121 = vmatprep.subr.bf16.mxu1 %v5910_v26  ;;  %v491_v25 = vld [vmem:[#allocation6 + $0x7b8] sm:$0xff]  ;;  %v5965_v28 = vcombine.low %v479_v13, %v483_v14  ;;  %v6686_v13 = vld [vmem:[#allocation9 + $0x200] ss:$28 sps:$4 sm:$0xff]  }
 0x227   :  { %v1902_v40 = vpop.f32.mrb[7].mxu0  ;;  %v1900_v41 = vadd.f32 %v1899_v33, %v1859_v34  ;;  %v6701_v26 = vld [vmem:[#allocation9 + $0x498] ss:$28 sps:$4 sm:$0xff]   ;;  %v5974_v29 = vcombine.high %v487_v24, %v491_v25  ;;  %v6707_v32 = vld [vmem:[#allocation9 + $0x4d0] ss:$28 sps:$4 sm:$0xff]   ;;  %v5973_v34 = vcombine.low %v487_v24, %v491_v25 }
 0x228   :  { %v2150_v44 = vmax.f32 %v1898_v46, 0.0  ;;  %v499_v31 = vld [vmem:[#allocation6 + $0x7f8] sm:$0xff]  ;;  %v6715_v33 = vld [vmem:[#allocation9 + $0x50c] ss:$28 sps:$4 sm:$0xff]   ;;  %v6721_v37 = vld [vmem:[#allocation9 + $0x544] ss:$28 sps:$4 sm:$0xff]  }
 0x229   :  { %v2151_v48 = vmax.f32 %v1900_v41, 0.0  ;;  %2122 = vmatpush1.bf16.msra.mxu1 %v5909_v36  ;;  %v5982_v35 = vcombine.high %v495_v30, %v499_v31  ;;  %v6713_v36 = vld [vmem:[#allocation9 + $0x508] ss:$28 sps:$4 sm:$0xff]   ;;  %v5981_v46 = vcombine.low %v495_v30, %v499_v31  ;;  %v6727_v40 = vld [vmem:[#allocation9 + $0x57c] ss:$28 sps:$4 sm:$0xff]  }
 0x22a   :  { %2123 = vmatprep.subr.bf16.mxu1 %v5918_v39  ;;  %v7590_v56 = vpack.c.bf16 %v2150_v44, %v2150_v44  ;;  %v6652_v38 = vld [vmem:[#allocation9 + $0xc] ss:$28 sps:$4 sm:$0xff]   ;;  %v6719_v39 = vld [vmem:[#allocation9 + $0x540] ss:$28 sps:$4 sm:$0xff]   ;;  %v6733_v44 = vld [vmem:[#allocation9 + $0x5b4] ss:$28 sps:$4 sm:$0xff]  }
 0x22b   :  { %v7588_v52 = vpack.c.bf16 %v2151_v48, %v2151_v48  ;;  %v6650_v41 = vld [vmem:[#allocation9 + $0x8] ss:$28 sps:$4 sm:$0xff]   ;;  %v6653_v48 = vld [vmem:[#allocation9 + $0x40] ss:$28 sps:$4 sm:$0xff]   ;;  %v6722_v30 = vld [vmem:[#allocation9 + $0x350] ss:$28 sps:$4 sm:$0xff]  }
 0x22c   :  { %v6694_v14 = vld [vmem:[#allocation9 + $0x23c] ss:$28 sps:$4 sm:$0xff]   ;;  %v6704_v24 = vld [vmem:[#allocation9 + $0x2a8] ss:$28 sps:$4 sm:$0xff]  }
 0x22d   :  { %2124 = vmatpush1.bf16.msra.mxu1 %v5917_v49  ;;  %5051 = vmatprep.mubr.bf16.mxu0 %v7588_v52  ;;  %v6658_v49 = vld [vmem:[#allocation9 + $0x7c] ss:$28 sps:$4 sm:$0xff]   ;;  %v6712_v25 = vld [vmem:[#allocation9 + $0x2e4] ss:$28 sps:$4 sm:$0xff]   ;;  %v6730_v31 = vld [vmem:[#allocation9 + $0x38c] ss:$28 sps:$4 sm:$0xff]  }
 0x22e   :  { %5052 = vmatmul.mubr.bf16.vlgmr.msra.gmra.mrb[12].mxu0 %v7590_v56  ;;  %2125 = vmatprep.subr.bf16.mxu1 %v5926_v51  ;;  %v6731_v51 = vld [vmem:[#allocation9 + $0x5b0] ss:$28 sps:$4 sm:$0xff]  }
 0x22f   :  { %5061 = vmatpush1.bf16.msra.mxu0 %v6671_v55  ;;  %v6661_v55 = vld [vmem:[#allocation9 + $0xb4] ss:$28 sps:$4 sm:$0xff]  }
 0x230   :  { %5062 = vmatprep.subr.bf16.mxu0 %v6679_v57  ;;  %v6737_v57 = vld [vmem:[#allocation9 + $0x5e8] ss:$28 sps:$4 sm:$0xff]  }
 0x231   :  { %2126 = vmatpush1.bf16.msra.mxu1 %v5925_v58  ;;  %v6659_v58 = vld [vmem:[#allocation9 + $0xb0] ss:$28 sps:$4 sm:$0xff]  }
 0x232   :  { %2127 = vmatprep.subr.bf16.mxu1 %v5934_v59  ;;  %v6664_v59 = vld [vmem:[#allocation9 + $0xec] ss:$28 sps:$4 sm:$0xff]  }
 0x233   :  { %5063 = vmatpush1.bf16.msra.mxu0 %v6677_v62  ;;  %v6662_v62 = vld [vmem:[#allocation9 + $0xe8] ss:$28 sps:$4 sm:$0xff]  }
 0x234   :  { %5064 = vmatprep.subr.bf16.mxu0 %v6685_v63  ;;  %v6667_v63 = vld [vmem:[#allocation9 + $0x124] ss:$28 sps:$4 sm:$0xff]  }
 0x235   :  { %2128 = vmatpush1.bf16.msra.mxu1 %v5933_v0  ;;  %v6749_v0 = vld [vmem:[#allocation9 + $0x658] ss:$28 sps:$4 sm:$0xff]  }
 0x236   :  { %2129 = vmatprep.subr.bf16.mxu1 %v5942_v1  ;;  %v6757_v1 = vld [vmem:[#allocation9 + $0x694] ss:$28 sps:$4 sm:$0xff]  }
 0x237   :  { %5065 = vmatpush1.bf16.msra.mxu0 %v6683_v4  ;;  %v6755_v4 = vld [vmem:[#allocation9 + $0x690] ss:$28 sps:$4 sm:$0xff]  }
 0x238   :  { %5066 = vmatprep.subr.bf16.mxu0 %v6691_v5  ;;  %v6763_v5 = vld [vmem:[#allocation9 + $0x6cc] ss:$28 sps:$4 sm:$0xff]  }
 0x239   :  { %2130 = vmatpush1.bf16.msra.mxu1 %v5941_v6  ;;  %v6668_v6 = vld [vmem:[#allocation9 + $0x158] ss:$28 sps:$4 sm:$0xff]  }
 0x23a   :  { %2131 = vmatprep.subr.bf16.mxu1 %v5950_v7  ;;  %v6676_v7 = vld [vmem:[#allocation9 + $0x194] ss:$28 sps:$4 sm:$0xff]  }
 0x23b   :  { %5067 = vmatpush1.bf16.msra.mxu0 %v6689_v10  ;;  %v6674_v10 = vld [vmem:[#allocation9 + $0x190] ss:$28 sps:$4 sm:$0xff]  }
 0x23c   :  { %5068 = vmatprep.subr.bf16.mxu0 %v6697_v11  ;;  %v6682_v11 = vld [vmem:[#allocation9 + $0x1cc] ss:$28 sps:$4 sm:$0xff]  }
 0x23d   :  { %2132 = vmatpush1.bf16.msra.mxu1 %v5949_v12  ;;  %v6680_v12 = vld [vmem:[#allocation9 + $0x1c8] ss:$28 sps:$4 sm:$0xff]  }
 0x23e   :  { %2133 = vmatprep.subr.bf16.mxu1 %v5958_v50  ;;  %v6688_v50 = vld [vmem:[#allocation9 + $0x204] ss:$28 sps:$4 sm:$0xff]  }
 0x23f   :  { %5069 = vmatpush1.bf16.msra.mxu0 %v6695_v17  ;;  %v6692_v17 = vld [vmem:[#allocation9 + $0x238] ss:$28 sps:$4 sm:$0xff]  }
 0x240   :  { %5070 = vmatprep.subr.bf16.mxu0 %v6703_v21  ;;  %v6700_v21 = vld [vmem:[#allocation9 + $0x274] ss:$28 sps:$4 sm:$0xff]  }
 0x241   :  { %2134 = vmatpush1.bf16.msra.mxu1 %v5957_v22  ;;  %v6698_v22 = vld [vmem:[#allocation9 + $0x270] ss:$28 sps:$4 sm:$0xff]  }
 0x242   :  { %2135 = vmatprep.subr.bf16.mxu1 %v5966_v23  ;;  %v6706_v23 = vld [vmem:[#allocation9 + $0x2ac] ss:$28 sps:$4 sm:$0xff]  }
 0x243   :  { %5071 = vmatpush1.bf16.msra.mxu0 %v6701_v26  ;;  %v6710_v26 = vld [vmem:[#allocation9 + $0x2e0] ss:$28 sps:$4 sm:$0xff]  }
 0x244   :  { %5072 = vmatprep.subr.bf16.mxu0 %v6709_v27  ;;  %v6718_v27 = vld [vmem:[#allocation9 + $0x31c] ss:$28 sps:$4 sm:$0xff]  }
 0x245   :  { %2136 = vmatpush1.bf16.msra.mxu1 %v5965_v28  ;;  %v6716_v28 = vld [vmem:[#allocation9 + $0x318] ss:$28 sps:$4 sm:$0xff]  }
 0x246   :  { %2137 = vmatprep.subr.bf16.mxu1 %v5974_v29  ;;  %v6724_v29 = vld [vmem:[#allocation9 + $0x354] ss:$28 sps:$4 sm:$0xff]  }
 0x247   :  { %5073 = vmatpush1.bf16.msra.mxu0 %v6707_v32  ;;  %v6728_v32 = vld [vmem:[#allocation9 + $0x388] ss:$28 sps:$4 sm:$0xff]  }
 0x248   :  { %5074 = vmatprep.subr.bf16.mxu0 %v6715_v33  ;;  %v6736_v33 = vld [vmem:[#allocation9 + $0x3c4] ss:$28 sps:$4 sm:$0xff]  }
 0x249   :  { %2138 = vmatpush1.bf16.msra.mxu1 %v5973_v34  ;;  %v6734_v34 = vld [vmem:[#allocation9 + $0x3c0] ss:$28 sps:$4 sm:$0xff]  }
 0x24a   :  { %2139 = vmatprep.subr.bf16.mxu1 %v5982_v35  ;;  %v6742_v35 = vld [vmem:[#allocation9 + $0x3fc] ss:$28 sps:$4 sm:$0xff]  }
 0x24b   :  { %5075 = vmatpush1.bf16.msra.mxu0 %v6713_v36  ;;  %v6740_v36 = vld [vmem:[#allocation9 + $0x3f8] ss:$28 sps:$4 sm:$0xff]  }
 0x24c   :  { %5076 = vmatprep.subr.bf16.mxu0 %v6721_v37  ;;  %v6748_v37 = vld [vmem:[#allocation9 + $0x434] ss:$28 sps:$4 sm:$0xff]  }
 0x24d   :  { %2140 = vmatpush1.bf16.msra.mxu1 %v5981_v46  ;;  %v6746_v46 = vld [vmem:[#allocation9 + $0x430] ss:$28 sps:$4 sm:$0xff]  }
 0x24e   :  { %5183 = vmatprep.subr.bf16.mxu1 %v6652_v38  ;;  %v6754_v38 = vld [vmem:[#allocation9 + $0x46c] ss:$28 sps:$4 sm:$0xff]  }
 0x24f   :  { %5077 = vmatpush1.bf16.msra.mxu0 %v6719_v39  ;;  %v6752_v39 = vld [vmem:[#allocation9 + $0x468] ss:$28 sps:$4 sm:$0xff]  }
 0x250   :  { %2142 = vmatmul.mubr.bf16.vlgmr.msra.gmra.mrb[12].mxu1 %v7559_v45  ;;  %5078 = vmatprep.subr.bf16.mxu0 %v6727_v40  ;;  %v6745_v45 = vld [vmem:[#allocation9 + $0x624] ss:$28 sps:$4 sm:$0xff]   ;;  %v524_v40 = vsub.s32 5, %v7541_v15 }
 0x251   :  { %5184 = vmatpush1.bf16.msra.mxu1 %v6650_v41  ;;  %5215 = vmatprep.mubr.bf16.mxu1 %v7588_v52  ;;  %v6760_v41 = vld [vmem:[#allocation9 + $0x4a4] ss:$28 sps:$4 sm:$0xff]  }
 0x252   :  { %5185 = vmatprep.subr.bf16.mxu1 %v6655_v42  ;;  %v513_v42 = vrot.slane %v7582_v47, %v7550_v19 }
 0x253   :  { %5079 = vmatpush1.bf16.msra.mxu0 %v6725_v43  ;;  %v517_v43 = vrot.slane %v7582_v47, %v7553_v20 }
 0x254   :  { %5080 = vmatprep.subr.bf16.mxu0 %v6733_v44  ;;  %v6758_v44 = vld [vmem:[#allocation9 + $0x4a0] ss:$28 sps:$4 sm:$0xff]  }
 0x255   :  { %5186 = vmatpush1.bf16.msra.mxu1 %v6653_v48  ;;  %v525_v48 = vrot.slane %v7582_v47, %v524_v40 }
 0x256   :  { %5187 = vmatprep.subr.bf16.mxu1 %v6658_v49  ;;  %v6766_v49 = vld [vmem:[#allocation9 + $0x4dc] ss:$28 sps:$4 sm:$0xff]  }
 0x257   :  { %5081 = vmatpush1.bf16.msra.mxu0 %v6731_v51 }
 0x258   :  { %5082 = vmatprep.subr.bf16.mxu0 %v6739_v53 }
 0x259   :  { %5188 = vmatpush1.bf16.msra.mxu1 %v6656_v54 }
 0x25a   :  { %5189 = vmatprep.subr.bf16.mxu1 %v6661_v55 }
 0x25b   :  { %5083 = vmatpush1.bf16.msra.mxu0 %v6737_v57 }
 0x25c   :  { %5084 = vmatprep.subr.bf16.mxu0 %v6745_v45 }
 0x25d   :  { %5190 = vmatpush1.bf16.msra.mxu1 %v6659_v58 }
 0x25e   :  { %5191 = vmatprep.subr.bf16.mxu1 %v6664_v59  ;;  %v6764_v59 = vld [vmem:[#allocation9 + $0x4d8] ss:$28 sps:$4 sm:$0xff]  }
 0x25f   :  { %5085 = vmatpush1.bf16.msra.mxu0 %v6743_v60 }
 0x260   :  { %5086 = vmatprep.subr.bf16.mxu0 %v6751_v61 }
 0x261   :  { %5192 = vmatpush1.bf16.msra.mxu1 %v6662_v62 }
 0x262   :  { %5193 = vmatprep.subr.bf16.mxu1 %v6667_v63 }
 0x263   :  { %5087 = vmatpush1.bf16.msra.mxu0 %v6749_v0  ;;  %v6772_v0 = vld [vmem:[#allocation9 + $0x514] ss:$28 sps:$4 sm:$0xff]  }
 0x264   :  { %5088 = vmatprep.subr.bf16.mxu0 %v6757_v1 }
 0x265   :  { %5194 = vmatpush1.bf16.msra.mxu1 %v6665_v2 }
 0x266   :  { %5195 = vmatprep.subr.bf16.mxu1 %v6670_v3 }
 0x267   :  { %5089 = vmatpush1.bf16.msra.mxu0 %v6755_v4 }
 0x268   :  { %5090 = vmatprep.subr.bf16.mxu0 %v6763_v5  ;;  %v6767_v5 = vld [vmem:[#allocation9 + $0x700] ss:$28 sps:$4 sm:$0xff]  }
 0x269   :  { %5196 = vmatpush1.bf16.msra.mxu1 %v6668_v6 }
 0x26a   :  { %5197 = vmatprep.subr.bf16.mxu1 %v6676_v7  ;;  %v6770_v7 = vld [vmem:[#allocation9 + $0x510] ss:$28 sps:$4 sm:$0xff]  }
 0x26b   :  { %5091 = vmatpush1.bf16.msra.mxu0 %v6761_v8  ;;  %v6775_v8 = vld [vmem:[#allocation9 + $0x73c] ss:$28 sps:$4 sm:$0xff]  }
 0x26c   :  { %5101 = vmatprep.subr.bf16.mxu0 %v6769_v9 }
 0x26d   :  { %5198 = vmatpush1.bf16.msra.mxu1 %v6674_v10  ;;  %v6778_v10 = vld [vmem:[#allocation9 + $0x54c] ss:$28 sps:$4 sm:$0xff]  }
 0x26e   :  { %5199 = vmatprep.subr.bf16.mxu1 %v6682_v11  ;;  %v6773_v11 = vld [vmem:[#allocation9 + $0x738] ss:$28 sps:$4 sm:$0xff]  }
 0x271   :  { %5200 = vmatpush1.bf16.msra.mxu1 %v6680_v12  ;;  %v6776_v12 = vld [vmem:[#allocation9 + $0x548] ss:$28 sps:$4 sm:$0xff]  }
 0x272   :  { %5201 = vmatprep.subr.bf16.mxu1 %v6688_v50  ;;  %v6781_v50 = vld [vmem:[#allocation9 + $0x774] ss:$28 sps:$4 sm:$0xff]  }
 0x275   :  { %5202 = vmatpush1.bf16.msra.mxu1 %v6686_v13  ;;  %v6784_v13 = vld [vmem:[#allocation9 + $0x584] ss:$28 sps:$4 sm:$0xff]  }
 0x276   :  { %5203 = vmatprep.subr.bf16.mxu1 %v6694_v14  ;;  %v6779_v14 = vld [vmem:[#allocation9 + $0x770] ss:$28 sps:$4 sm:$0xff]  }
 0x279   :  { %5204 = vmatpush1.bf16.msra.mxu1 %v6692_v17  ;;  %v6782_v17 = vld [vmem:[#allocation9 + $0x580] ss:$28 sps:$4 sm:$0xff]  }
 0x27a   :  { %5205 = vmatprep.subr.bf16.mxu1 %v6700_v21  ;;  %v6787_v21 = vld [vmem:[#allocation9 + $0x7ac] ss:$28 sps:$4 sm:$0xff]  }
 0x27d   :  { %5206 = vmatpush1.bf16.msra.mxu1 %v6698_v22  ;;  %v6790_v22 = vld [vmem:[#allocation9 + $0x5bc] ss:$28 sps:$4 sm:$0xff]  }
 0x27e   :  { %5207 = vmatprep.subr.bf16.mxu1 %v6706_v23  ;;  %v6785_v23 = vld [vmem:[#allocation9 + $0x7a8] ss:$28 sps:$4 sm:$0xff]  }
 0x281   :  { %5208 = vmatpush1.bf16.msra.mxu1 %v6704_v24  ;;  %v6788_v24 = vld [vmem:[#allocation9 + $0x5b8] ss:$28 sps:$4 sm:$0xff]  }
 0x282   :  { %5209 = vmatprep.subr.bf16.mxu1 %v6712_v25  ;;  %v6793_v25 = vld [vmem:[#allocation9 + $0x7e4] ss:$28 sps:$4 sm:$0xff]  }
 0x285   :  { %5210 = vmatpush1.bf16.msra.mxu1 %v6710_v26  ;;  %v6796_v26 = vld [vmem:[#allocation9 + $0x5f4] ss:$28 sps:$4 sm:$0xff]  }
 0x286   :  { %5211 = vmatprep.subr.bf16.mxu1 %v6718_v27  ;;  %v6791_v27 = vld [vmem:[#allocation9 + $0x7e0] ss:$28 sps:$4 sm:$0xff]  }
 0x289   :  { %5212 = vmatpush1.bf16.msra.mxu1 %v6716_v28  ;;  %v6794_v28 = vld [vmem:[#allocation9 + $0x5f0] ss:$28 sps:$4 sm:$0xff]  }
 0x28a   :  { %5213 = vmatprep.subr.bf16.mxu1 %v6724_v29  ;;  %v6799_v29 = vld [vmem:[#allocation9 + $0x81c] ss:$28 sps:$4 sm:$0xff]  }
 0x28d   :  { %5214 = vmatpush1.bf16.msra.mxu1 %v6722_v30  ;;  %v6802_v30 = vld [vmem:[#allocation9 + $0x62c] ss:$28 sps:$4 sm:$0xff]  }
 0x28e   :  { %5224 = vmatprep.subr.bf16.mxu1 %v6730_v31  ;;  %v6797_v31 = vld [vmem:[#allocation9 + $0x818] ss:$28 sps:$4 sm:$0xff]  }
 0x290   :  { %5216 = vmatmul.mubr.bf16.vlgmr.msra.gmra.mrb[16].mxu1 %v7590_v56 }
 0x291   :  { %5225 = vmatpush1.bf16.msra.mxu1 %v6728_v32  ;;  %v6800_v32 = vld [vmem:[#allocation9 + $0x628] ss:$28 sps:$4 sm:$0xff]  }
 0x292   :  { %5226 = vmatprep.subr.bf16.mxu1 %v6736_v33  ;;  %v6805_v33 = vld [vmem:[#allocation9 + $0x854] ss:$28 sps:$4 sm:$0xff]  }
 0x295   :  { %5227 = vmatpush1.bf16.msra.mxu1 %v6734_v34  ;;  %v6808_v34 = vld [vmem:[#allocation9 + $0x664] ss:$28 sps:$4 sm:$0xff]  }
 0x296   :  { %5228 = vmatprep.subr.bf16.mxu1 %v6742_v35  ;;  %v6803_v35 = vld [vmem:[#allocation9 + $0x850] ss:$28 sps:$4 sm:$0xff]  }
 0x299   :  { %5229 = vmatpush1.bf16.msra.mxu1 %v6740_v36  ;;  %v6806_v36 = vld [vmem:[#allocation9 + $0x660] ss:$28 sps:$4 sm:$0xff]  }
 0x29a   :  { %5230 = vmatprep.subr.bf16.mxu1 %v6748_v37  ;;  %v6811_v37 = vld [vmem:[#allocation9 + $0x88c] ss:$28 sps:$4 sm:$0xff]  }
 0x29d   :  { %5231 = vmatpush1.bf16.msra.mxu1 %v6746_v46  ;;  %v6814_v46 = vld [vmem:[#allocation9 + $0x69c] ss:$28 sps:$4 sm:$0xff]  }
 0x29e   :  { %5232 = vmatprep.subr.bf16.mxu1 %v6754_v38  ;;  %v6809_v38 = vld [vmem:[#allocation9 + $0x888] ss:$28 sps:$4 sm:$0xff]  }
 0x2a1   :  { %5233 = vmatpush1.bf16.msra.mxu1 %v6752_v39  ;;  %v6812_v39 = vld [vmem:[#allocation9 + $0x698] ss:$28 sps:$4 sm:$0xff]  }
 0x2a2   :  { %5234 = vmatprep.subr.bf16.mxu1 %v6760_v41  ;;  %v6817_v41 = vld [vmem:[#allocation9 + $0x8c4] ss:$28 sps:$4 sm:$0xff]  }
 0x2a3   :  { %v1979_v51 = vpop.f32.mrb[8].mxu1 }
 0x2a4   :  { %v6523_v53 = vadd.f32 %v1979_v51, %v513_v42  ;;  %v7605_v54 = vpop.f32.mrb[8].mxu0  ;;  %v1981_v55 = vpop.f32.mrb[9].mxu1  ;;  %v6820_v42 = vld [vmem:[#allocation9 + $0x6d4] ss:$28 sps:$4 sm:$0xff]  }
 0x2a5   :  { %v6524_v57 = vadd.f32 %v1981_v55, %v517_v43  ;;  %v2063_v45 = vpop.f32.mrb[9].mxu0  ;;  %v1983_v58 = vpop.f32.mrb[10].mxu1  ;;  %5235 = vmatpush1.bf16.msra.mxu1 %v6758_v44  ;;  %v6815_v43 = vld [vmem:[#allocation9 + $0x8c0] ss:$28 sps:$4 sm:$0xff]   ;;  %v6818_v44 = vld [vmem:[#allocation9 + $0x6d0] ss:$28 sps:$4 sm:$0xff]  }
 0x2a6   :  { %v2152_v60 = vmax.f32 %v6523_v53, 0.0  ;;  %v6526_v61 = vadd.f32 %v2063_v45, %v525_v48  ;;  %v2065_v62 = vpop.f32.mrb[10].mxu0  ;;  %v1984_v63 = vpop.f32.mrb[11].mxu1  ;;  %5236 = vmatprep.subr.bf16.mxu1 %v6766_v49  ;;  %v6823_v48 = vld [vmem:[#allocation9 + $0x8fc] ss:$28 sps:$4 sm:$0xff]  }
 0x2a7   :  { %v2153_v1 = vmax.f32 %v6524_v57, 0.0  ;;  %v2066_v2 = vpop.f32.mrb[11].mxu0  ;;  %v6826_v49 = vld [vmem:[#allocation9 + $0x70c] ss:$28 sps:$4 sm:$0xff]   ;;  %v6821_v51 = vld [vmem:[#allocation9 + $0x8f8] ss:$28 sps:$4 sm:$0xff]  }
 0x2a8   :  { %v2155_v3 = vmax.f32 %v6526_v61, 0.0  ;;  %v7609_v6 = vpack.c.bf16 %v2152_v60, %v2152_v60  ;;  %v6824_v53 = vld [vmem:[#allocation9 + $0x708] ss:$28 sps:$4 sm:$0xff]   ;;  %v6829_v55 = vld [vmem:[#allocation9 + $0x934] ss:$28 sps:$4 sm:$0xff]   ;;  %v520_v2 = vsub.s32 4, %v7541_v15 }
 0x2a9   :  { %v7607_v4 = vpack.c.bf16 %v2153_v1, %v2153_v1  ;;  %5237 = vmatpush1.bf16.msra.mxu1 %v6764_v59  ;;  %v6832_v57 = vld [vmem:[#allocation9 + $0x744] ss:$28 sps:$4 sm:$0xff]   ;;  %v6827_v45 = vld [vmem:[#allocation9 + $0x930] ss:$28 sps:$4 sm:$0xff]   ;;  %v6838_v60 = vld [vmem:[#allocation9 + $0x77c] ss:$28 sps:$4 sm:$0xff]  }
 0x2aa   :  { %5238 = vmatprep.subr.bf16.mxu1 %v6772_v0  ;;  %v7611_v9 = vpack.c.bf16 %v2155_v3, %v2155_v3  ;;  %v6830_v58 = vld [vmem:[#allocation9 + $0x740] ss:$28 sps:$4 sm:$0xff]   ;;  %v6835_v59 = vld [vmem:[#allocation9 + $0x96c] ss:$28 sps:$4 sm:$0xff]   ;;  %v6836_v62 = vld [vmem:[#allocation9 + $0x778] ss:$28 sps:$4 sm:$0xff]  }
 0x2ab   :  { %5092 = vmatprep.mubr.bf16.mxu0 %v7607_v4  ;;  %5256 = vmatprep.mubr.bf16.mxu1 %v7607_v4  ;;  %v6833_v61 = vld [vmem:[#allocation9 + $0x968] ss:$28 sps:$4 sm:$0xff]   ;;  %v6844_v0 = vld [vmem:[#allocation9 + $0x7b4] ss:$28 sps:$4 sm:$0xff]   ;;  %v6839_v1 = vld [vmem:[#allocation9 + $0x9a0] ss:$28 sps:$4 sm:$0xff]  }
 0x2ac   :  { %5093 = vmatmul.mubr.bf16.vlgmr.msra.gmra.mrb[12].mxu0 %v7609_v6  ;;  %v6841_v63 = vld [vmem:[#allocation9 + $0x9a4] ss:$28 sps:$4 sm:$0xff]   ;;  %v6842_v3 = vld [vmem:[#allocation9 + $0x7b0] ss:$28 sps:$4 sm:$0xff]  }
 0x2ad   :  { %5102 = vmatpush1.bf16.msra.mxu0 %v6767_v5  ;;  %5133 = vmatprep.mubr.bf16.mxu0 %v7611_v9  ;;  %v6847_v5 = vld [vmem:[#allocation9 + $0x9dc] ss:$28 sps:$4 sm:$0xff]  }
 0x2ae   :  { %5239 = vmatpush1.bf16.msra.mxu1 %v6770_v7  ;;  %5103 = vmatprep.subr.bf16.mxu0 %v6775_v8  ;;  %v6850_v7 = vld [vmem:[#allocation9 + $0x7ec] ss:$28 sps:$4 sm:$0xff]   ;;  %v6845_v8 = vld [vmem:[#allocation9 + $0x9d8] ss:$28 sps:$4 sm:$0xff]  }
 0x2af   :  { %5240 = vmatprep.subr.bf16.mxu1 %v6778_v10  ;;  %v521_v10 = vrot.slane %v7582_v47, %v520_v2  ;;  %v6860_v47 = vld [vmem:[#allocation9 + $0x858] ss:$28 sps:$4 sm:$0xff]  }
 0x2b1   :  { %5104 = vmatpush1.bf16.msra.mxu0 %v6773_v11  ;;  %v6848_v11 = vld [vmem:[#allocation9 + $0x7e8] ss:$28 sps:$4 sm:$0xff]  }
 0x2b2   :  { %5241 = vmatpush1.bf16.msra.mxu1 %v6776_v12  ;;  %5105 = vmatprep.subr.bf16.mxu0 %v6781_v50  ;;  %v6853_v12 = vld [vmem:[#allocation9 + $0xa14] ss:$28 sps:$4 sm:$0xff]   ;;  %v6856_v50 = vld [vmem:[#allocation9 + $0x824] ss:$28 sps:$4 sm:$0xff]  }
 0x2b3   :  { %5242 = vmatprep.subr.bf16.mxu1 %v6784_v13  ;;  %v6851_v13 = vld [vmem:[#allocation9 + $0xa10] ss:$28 sps:$4 sm:$0xff]  }
 0x2b5   :  { %5106 = vmatpush1.bf16.msra.mxu0 %v6779_v14  ;;  %v6525_v14 = vadd.f32 %v7605_v54, %v521_v10  ;;  %v6866_v54 = vld [vmem:[#allocation9 + $0x890] ss:$28 sps:$4 sm:$0xff]   ;;  %v6920_v10 = vld [vmem:[#allocation9 + $0xa88] ss:$28 sps:$4 sm:$0xff]  }
 0x2b6   :  { %5243 = vmatpush1.bf16.msra.mxu1 %v6782_v17  ;;  %5107 = vmatprep.subr.bf16.mxu0 %v6787_v21  ;;  %v6854_v17 = vld [vmem:[#allocation9 + $0x820] ss:$28 sps:$4 sm:$0xff]   ;;  %v6859_v21 = vld [vmem:[#allocation9 + $0xa4c] ss:$28 sps:$4 sm:$0xff]  }
 0x2b7   :  { %5244 = vmatprep.subr.bf16.mxu1 %v6790_v22  ;;  %v6862_v22 = vld [vmem:[#allocation9 + $0x85c] ss:$28 sps:$4 sm:$0xff]  }
 0x2b9   :  { %5108 = vmatpush1.bf16.msra.mxu0 %v6785_v23  ;;  %v6857_v23 = vld [vmem:[#allocation9 + $0xa48] ss:$28 sps:$4 sm:$0xff]  }
 0x2ba   :  { %5245 = vmatpush1.bf16.msra.mxu1 %v6788_v24  ;;  %5109 = vmatprep.subr.bf16.mxu0 %v6793_v25  ;;  %v2154_v24 = vmax.f32 %v6525_v14, 0.0  ;;  %v6865_v25 = vld [vmem:[#allocation9 + $0xa84] ss:$28 sps:$4 sm:$0xff]   ;;  %v6931_v14 = vld [vmem:[#allocation9 + $0xcec] ss:$28 sps:$4 sm:$0xff]  }
 0x2bb   :  { %5246 = vmatprep.subr.bf16.mxu1 %v6796_v26  ;;  %v6868_v26 = vld [vmem:[#allocation9 + $0x894] ss:$28 sps:$4 sm:$0xff]  }
 0x2bd   :  { %5110 = vmatpush1.bf16.msra.mxu0 %v6791_v27  ;;  %v6863_v27 = vld [vmem:[#allocation9 + $0xa80] ss:$28 sps:$4 sm:$0xff]  }
 0x2be   :  { %5247 = vmatpush1.bf16.msra.mxu1 %v6794_v28  ;;  %5111 = vmatprep.subr.bf16.mxu0 %v6799_v29  ;;  %v7624_v28 = vpack.c.bf16 %v2154_v24, %v2154_v24  ;;  %v6871_v29 = vld [vmem:[#allocation9 + $0xabc] ss:$28 sps:$4 sm:$0xff]   ;;  %v6940_v24 = vld [vmem:[#allocation9 + $0xb34] ss:$28 sps:$4 sm:$0xff]  }
 0x2bf   :  { %5248 = vmatprep.subr.bf16.mxu1 %v6802_v30  ;;  %v6874_v30 = vld [vmem:[#allocation9 + $0x8cc] ss:$28 sps:$4 sm:$0xff]  }
 0x2c1   :  { %5112 = vmatpush1.bf16.msra.mxu0 %v6797_v31  ;;  %v6869_v31 = vld [vmem:[#allocation9 + $0xab8] ss:$28 sps:$4 sm:$0xff]  }
 0x2c2   :  { %5249 = vmatpush1.bf16.msra.mxu1 %v6800_v32  ;;  %5113 = vmatprep.subr.bf16.mxu0 %v6805_v33  ;;  %v6872_v32 = vld [vmem:[#allocation9 + $0x8c8] ss:$28 sps:$4 sm:$0xff]   ;;  %v6877_v33 = vld [vmem:[#allocation9 + $0xaf4] ss:$28 sps:$4 sm:$0xff]  }
 0x2c3   :  { %5250 = vmatprep.subr.bf16.mxu1 %v6808_v34  ;;  %v6880_v34 = vld [vmem:[#allocation9 + $0x904] ss:$28 sps:$4 sm:$0xff]  }
 0x2c5   :  { %5114 = vmatpush1.bf16.msra.mxu0 %v6803_v35  ;;  %v6875_v35 = vld [vmem:[#allocation9 + $0xaf0] ss:$28 sps:$4 sm:$0xff]  }
 0x2c6   :  { %5251 = vmatpush1.bf16.msra.mxu1 %v6806_v36  ;;  %5115 = vmatprep.subr.bf16.mxu0 %v6811_v37  ;;  %v6878_v36 = vld [vmem:[#allocation9 + $0x900] ss:$28 sps:$4 sm:$0xff]   ;;  %v6883_v37 = vld [vmem:[#allocation9 + $0xb2c] ss:$28 sps:$4 sm:$0xff]  }
 0x2c7   :  { %5252 = vmatprep.subr.bf16.mxu1 %v6814_v46  ;;  %v6886_v46 = vld [vmem:[#allocation9 + $0x93c] ss:$28 sps:$4 sm:$0xff]  }
 0x2c9   :  { %5116 = vmatpush1.bf16.msra.mxu0 %v6809_v38  ;;  %v6881_v38 = vld [vmem:[#allocation9 + $0xb28] ss:$28 sps:$4 sm:$0xff]  }
 0x2ca   :  { %5253 = vmatpush1.bf16.msra.mxu1 %v6812_v39  ;;  %5117 = vmatprep.subr.bf16.mxu0 %v6817_v41  ;;  %v6884_v39 = vld [vmem:[#allocation9 + $0x938] ss:$28 sps:$4 sm:$0xff]   ;;  %v6889_v41 = vld [vmem:[#allocation9 + $0xb64] ss:$28 sps:$4 sm:$0xff]  }
 0x2cb   :  { %5254 = vmatprep.subr.bf16.mxu1 %v6820_v42  ;;  %v6892_v42 = vld [vmem:[#allocation9 + $0x974] ss:$28 sps:$4 sm:$0xff]  }
 0x2cd   :  { %5118 = vmatpush1.bf16.msra.mxu0 %v6815_v43  ;;  %v6887_v43 = vld [vmem:[#allocation9 + $0xb60] ss:$28 sps:$4 sm:$0xff]  }
 0x2ce   :  { %5255 = vmatpush1.bf16.msra.mxu1 %v6818_v44  ;;  %5119 = vmatprep.subr.bf16.mxu0 %v6823_v48  ;;  %v6890_v44 = vld [vmem:[#allocation9 + $0x970] ss:$28 sps:$4 sm:$0xff]   ;;  %v6895_v48 = vld [vmem:[#allocation9 + $0xb9c] ss:$28 sps:$4 sm:$0xff]  }
 0x2cf   :  { %5265 = vmatprep.subr.bf16.mxu1 %v6826_v49  ;;  %v6898_v49 = vld [vmem:[#allocation9 + $0x9ac] ss:$28 sps:$4 sm:$0xff]  }
 0x2d1   :  { %5120 = vmatpush1.bf16.msra.mxu0 %v6821_v51  ;;  %5257 = vmatmul.mubr.bf16.vlgmr.msra.gmra.mrb[16].mxu1 %v7609_v6  ;;  %v6893_v51 = vld [vmem:[#allocation9 + $0xb98] ss:$28 sps:$4 sm:$0xff]  }
 0x2d2   :  { %5266 = vmatpush1.bf16.msra.mxu1 %v6824_v53  ;;  %5297 = vmatprep.mubr.bf16.mxu1 %v7611_v9  ;;  %v6896_v53 = vld [vmem:[#allocation9 + $0x9a8] ss:$28 sps:$4 sm:$0xff]  }
 0x2d3   :  { %5121 = vmatprep.subr.bf16.mxu0 %v6829_v55  ;;  %5267 = vmatprep.subr.bf16.mxu1 %v6832_v57  ;;  %v6901_v55 = vld [vmem:[#allocation9 + $0xbd4] ss:$28 sps:$4 sm:$0xff]   ;;  %v6904_v57 = vld [vmem:[#allocation9 + $0x9e4] ss:$28 sps:$4 sm:$0xff]  }
 0x2d5   :  { %5122 = vmatpush1.bf16.msra.mxu0 %v6827_v45  ;;  %v6899_v45 = vld [vmem:[#allocation9 + $0xbd0] ss:$28 sps:$4 sm:$0xff]  }
 0x2d6   :  { %5268 = vmatpush1.bf16.msra.mxu1 %v6830_v58  ;;  %5123 = vmatprep.subr.bf16.mxu0 %v6835_v59  ;;  %v6902_v58 = vld [vmem:[#allocation9 + $0x9e0] ss:$28 sps:$4 sm:$0xff]   ;;  %v6907_v59 = vld [vmem:[#allocation9 + $0xc0c] ss:$28 sps:$4 sm:$0xff]  }
 0x2d7   :  { %5269 = vmatprep.subr.bf16.mxu1 %v6838_v60  ;;  %v6910_v60 = vld [vmem:[#allocation9 + $0xa1c] ss:$28 sps:$4 sm:$0xff]  }
 0x2d9   :  { %5124 = vmatpush1.bf16.msra.mxu0 %v6833_v61  ;;  %v6905_v61 = vld [vmem:[#allocation9 + $0xc08] ss:$28 sps:$4 sm:$0xff]  }
 0x2da   :  { %5270 = vmatpush1.bf16.msra.mxu1 %v6836_v62  ;;  %5125 = vmatprep.subr.bf16.mxu0 %v6841_v63  ;;  %v6908_v62 = vld [vmem:[#allocation9 + $0xa18] ss:$28 sps:$4 sm:$0xff]   ;;  %v6913_v63 = vld [vmem:[#allocation9 + $0xc44] ss:$28 sps:$4 sm:$0xff]  }
 0x2db   :  { %5271 = vmatprep.subr.bf16.mxu1 %v6844_v0  ;;  %v6916_v0 = vld [vmem:[#allocation9 + $0xa54] ss:$28 sps:$4 sm:$0xff]  }
 0x2dd   :  { %5126 = vmatpush1.bf16.msra.mxu0 %v6839_v1  ;;  %v6911_v1 = vld [vmem:[#allocation9 + $0xc40] ss:$28 sps:$4 sm:$0xff]  }
 0x2de   :  { %5272 = vmatpush1.bf16.msra.mxu1 %v6842_v3  ;;  %5127 = vmatprep.subr.bf16.mxu0 %v6847_v5  ;;  %v6914_v3 = vld [vmem:[#allocation9 + $0xa50] ss:$28 sps:$4 sm:$0xff]   ;;  %v6919_v5 = vld [vmem:[#allocation9 + $0xc7c] ss:$28 sps:$4 sm:$0xff]  }
 0x2df   :  { %5273 = vmatprep.subr.bf16.mxu1 %v6850_v7  ;;  %v6922_v7 = vld [vmem:[#allocation9 + $0xa8c] ss:$28 sps:$4 sm:$0xff]  }
 0x2e1   :  { %5128 = vmatpush1.bf16.msra.mxu0 %v6845_v8  ;;  %v6917_v8 = vld [vmem:[#allocation9 + $0xc78] ss:$28 sps:$4 sm:$0xff]  }
 0x2e2   :  { %5274 = vmatpush1.bf16.msra.mxu1 %v6848_v11  ;;  %5129 = vmatprep.subr.bf16.mxu0 %v6853_v12  ;;  %v6925_v11 = vld [vmem:[#allocation9 + $0xcb4] ss:$28 sps:$4 sm:$0xff]   ;;  %v6928_v12 = vld [vmem:[#allocation9 + $0xac4] ss:$28 sps:$4 sm:$0xff]  }
 0x2e3   :  { %5275 = vmatprep.subr.bf16.mxu1 %v6856_v50  ;;  %v6923_v50 = vld [vmem:[#allocation9 + $0xcb0] ss:$28 sps:$4 sm:$0xff]  }
 0x2e5   :  { %5130 = vmatpush1.bf16.msra.mxu0 %v6851_v13  ;;  %v6926_v13 = vld [vmem:[#allocation9 + $0xac0] ss:$28 sps:$4 sm:$0xff]  }
 0x2e6   :  { %5276 = vmatpush1.bf16.msra.mxu1 %v6854_v17  ;;  %5131 = vmatprep.subr.bf16.mxu0 %v6859_v21  ;;  %v6934_v17 = vld [vmem:[#allocation9 + $0xafc] ss:$28 sps:$4 sm:$0xff]   ;;  %v6929_v21 = vld [vmem:[#allocation9 + $0xce8] ss:$28 sps:$4 sm:$0xff]  }
 0x2e7   :  { %5277 = vmatprep.subr.bf16.mxu1 %v6862_v22  ;;  %v6932_v22 = vld [vmem:[#allocation9 + $0xaf8] ss:$28 sps:$4 sm:$0xff]  }
 0x2e9   :  { %5132 = vmatpush1.bf16.msra.mxu0 %v6857_v23  ;;  %v6937_v23 = vld [vmem:[#allocation9 + $0xd24] ss:$28 sps:$4 sm:$0xff]  }
 0x2ea   :  { %5278 = vmatpush1.bf16.msra.mxu1 %v6860_v47  ;;  %5142 = vmatprep.subr.bf16.mxu0 %v6865_v25  ;;  %v6935_v47 = vld [vmem:[#allocation9 + $0xd20] ss:$28 sps:$4 sm:$0xff]   ;;  %v6938_v25 = vld [vmem:[#allocation9 + $0xb30] ss:$28 sps:$4 sm:$0xff]  }
 0x2eb   :  { %5279 = vmatprep.subr.bf16.mxu1 %v6868_v26  ;;  %v6943_v26 = vld [vmem:[#allocation9 + $0xd5c] ss:$28 sps:$4 sm:$0xff]  }
 0x2ec   :  { %5134 = vmatmul.mubr.bf16.vlgmr.msra.gmra.mrb[12].mxu0 %v7624_v28 }
 0x2ed   :  { %5143 = vmatpush1.bf16.msra.mxu0 %v6863_v27  ;;  %v6946_v27 = vld [vmem:[#allocation9 + $0xb6c] ss:$28 sps:$4 sm:$0xff]  }
 0x2ee   :  { %5280 = vmatpush1.bf16.msra.mxu1 %v6866_v54  ;;  %5144 = vmatprep.subr.bf16.mxu0 %v6871_v29  ;;  %v528_v54 = vsub.s32 6, %v7541_v15  ;;  %v6941_v29 = vld [vmem:[#allocation9 + $0xd58] ss:$28 sps:$4 sm:$0xff]  }
 0x2ef   :  { %5281 = vmatprep.subr.bf16.mxu1 %v6874_v30  ;;  %v532_v30 = vsub.s32 7, %v7541_v15 }
 0x2f1   :  { %5145 = vmatpush1.bf16.msra.mxu0 %v6869_v31  ;;  %v6944_v31 = vld [vmem:[#allocation9 + $0xb68] ss:$28 sps:$4 sm:$0xff]  }
 0x2f2   :  { %5282 = vmatpush1.bf16.msra.mxu1 %v6872_v32  ;;  %5146 = vmatprep.subr.bf16.mxu0 %v6877_v33  ;;  %v6949_v32 = vld [vmem:[#allocation9 + $0xd94] ss:$28 sps:$4 sm:$0xff]   ;;  %v6952_v33 = vld [vmem:[#allocation9 + $0xba4] ss:$28 sps:$4 sm:$0xff]  }
 0x2f3   :  { %5283 = vmatprep.subr.bf16.mxu1 %v6880_v34  ;;  %v7270_v34 = vld [vmem:[#allocation7] sm:$0xff] }
 0x2f5   :  { %5147 = vmatpush1.bf16.msra.mxu0 %v6875_v35  ;;  %v529_v35 = vrot.slane %v7270_v34, %v528_v54 }
 0x2f6   :  { %5284 = vmatpush1.bf16.msra.mxu1 %v6878_v36  ;;  %5148 = vmatprep.subr.bf16.mxu0 %v6883_v37  ;;  %v6947_v36 = vld [vmem:[#allocation9 + $0xd90] ss:$28 sps:$4 sm:$0xff]   ;;  %v533_v37 = vrot.slane %v7270_v34, %v532_v30  ;;  %v6998_v30 = vld [vmem:[#allocation9 + $0xd60] ss:$28 sps:$4 sm:$0xff]   ;;  %v7004_v34 = vld [vmem:[#allocation9 + $0xd98] ss:$28 sps:$4 sm:$0xff]  }
 0x2f7   :  { %5285 = vmatprep.subr.bf16.mxu1 %v6886_v46  ;;  %v6950_v46 = vld [vmem:[#allocation9 + $0xba0] ss:$28 sps:$4 sm:$0xff]  }
 0x2f9   :  { %5149 = vmatpush1.bf16.msra.mxu0 %v6881_v38  ;;  %v6955_v38 = vld [vmem:[#allocation9 + $0xdcc] ss:$28 sps:$4 sm:$0xff]  }
 0x2fa   :  { %5286 = vmatpush1.bf16.msra.mxu1 %v6884_v39  ;;  %5150 = vmatprep.subr.bf16.mxu0 %v6889_v41  ;;  %v6958_v41 = vld [vmem:[#allocation9 + $0xbdc] ss:$28 sps:$4 sm:$0xff]  }
 0x2fb   :  { %5287 = vmatprep.subr.bf16.mxu1 %v6892_v42 }
 0x2fd   :  { %5151 = vmatpush1.bf16.msra.mxu0 %v6887_v43 }
 0x2fe   :  { %5288 = vmatpush1.bf16.msra.mxu1 %v6890_v44  ;;  %5152 = vmatprep.subr.bf16.mxu0 %v6895_v48 }
 0x2ff   :  { %5289 = vmatprep.subr.bf16.mxu1 %v6898_v49  ;;  %v6953_v49 = vld [vmem:[#allocation9 + $0xdc8] ss:$28 sps:$4 sm:$0xff]  }
 0x301   :  { %5153 = vmatpush1.bf16.msra.mxu0 %v6893_v51 }
 0x302   :  { %5290 = vmatpush1.bf16.msra.mxu1 %v6896_v53  ;;  %5154 = vmatprep.subr.bf16.mxu0 %v6901_v55  ;;  %v6956_v55 = vld [vmem:[#allocation9 + $0xbd8] ss:$28 sps:$4 sm:$0xff]  }
 0x303   :  { %5291 = vmatprep.subr.bf16.mxu1 %v6904_v57  ;;  %v6961_v57 = vld [vmem:[#allocation9 + $0x14] ss:$28 sps:$4 sm:$0xff]  }
 0x305   :  { %5155 = vmatpush1.bf16.msra.mxu0 %v6899_v45 }
 0x306   :  { %5292 = vmatpush1.bf16.msra.mxu1 %v6902_v58  ;;  %5156 = vmatprep.subr.bf16.mxu0 %v6907_v59  ;;  %v6964_v58 = vld [vmem:[#allocation9 + $0xc14] ss:$28 sps:$4 sm:$0xff]  }
 0x307   :  { %5293 = vmatprep.subr.bf16.mxu1 %v6910_v60  ;;  %v6959_v60 = vld [vmem:[#allocation9 + $0x10] ss:$28 sps:$4 sm:$0xff]  }
 0x309   :  { %5157 = vmatpush1.bf16.msra.mxu0 %v6905_v61 }
 0x30a   :  { %5294 = vmatpush1.bf16.msra.mxu1 %v6908_v62  ;;  %5158 = vmatprep.subr.bf16.mxu0 %v6913_v63  ;;  %v6962_v62 = vld [vmem:[#allocation9 + $0xc10] ss:$28 sps:$4 sm:$0xff]  }
 0x30b   :  { %5295 = vmatprep.subr.bf16.mxu1 %v6916_v0  ;;  %v6967_v63 = vld [vmem:[#allocation9 + $0x4c] ss:$28 sps:$4 sm:$0xff]  }
 0x30c   :  { %v6970_v0 = vld [vmem:[#allocation9 + $0xc4c] ss:$28 sps:$4 sm:$0xff]  }
 0x30d   :  { %5159 = vmatpush1.bf16.msra.mxu0 %v6911_v1  ;;  %v6965_v1 = vld [vmem:[#allocation9 + $0x48] ss:$28 sps:$4 sm:$0xff]  }
 0x30e   :  { %5296 = vmatpush1.bf16.msra.mxu1 %v6914_v3  ;;  %5160 = vmatprep.subr.bf16.mxu0 %v6919_v5  ;;  %v6968_v3 = vld [vmem:[#allocation9 + $0xc48] ss:$28 sps:$4 sm:$0xff]  }
 0x30f   :  { %5306 = vmatprep.subr.bf16.mxu1 %v6922_v7  ;;  %v6973_v5 = vld [vmem:[#allocation9 + $0x84] ss:$28 sps:$4 sm:$0xff]  }
 0x310   :  { %v6976_v7 = vld [vmem:[#allocation9 + $0xc84] ss:$28 sps:$4 sm:$0xff]  }
 0x311   :  { %5161 = vmatpush1.bf16.msra.mxu0 %v6917_v8  ;;  %5298 = vmatmul.mubr.bf16.vlgmr.msra.gmra.mrb[16].mxu1 %v7624_v28  ;;  %v6971_v8 = vld [vmem:[#allocation9 + $0x80] ss:$28 sps:$4 sm:$0xff]  }
 0x312   :  { %5307 = vmatpush1.bf16.msra.mxu1 %v6920_v10  ;;  %5162 = vmatprep.subr.bf16.mxu0 %v6925_v11  ;;  %v6974_v10 = vld [vmem:[#allocation9 + $0xc80] ss:$28 sps:$4 sm:$0xff]  }
 0x313   :  { %5308 = vmatprep.subr.bf16.mxu1 %v6928_v12  ;;  %v6979_v11 = vld [vmem:[#allocation9 + $0xbc] ss:$28 sps:$4 sm:$0xff]  }
 0x314   :  { %v6982_v12 = vld [vmem:[#allocation9 + $0xcbc] ss:$28 sps:$4 sm:$0xff]  }
 0x315   :  { %5163 = vmatpush1.bf16.msra.mxu0 %v6923_v50  ;;  %v6977_v50 = vld [vmem:[#allocation9 + $0xb8] ss:$28 sps:$4 sm:$0xff]  }
 0x316   :  { %5309 = vmatpush1.bf16.msra.mxu1 %v6926_v13  ;;  %5164 = vmatprep.subr.bf16.mxu0 %v6931_v14  ;;  %v6980_v13 = vld [vmem:[#allocation9 + $0xcb8] ss:$28 sps:$4 sm:$0xff]  }
 0x317   :  { %5310 = vmatprep.subr.bf16.mxu1 %v6934_v17  ;;  %v6985_v14 = vld [vmem:[#allocation9 + $0xf4] ss:$28 sps:$4 sm:$0xff]  }
 0x318   :  { %v6988_v17 = vld [vmem:[#allocation9 + $0xcf4] ss:$28 sps:$4 sm:$0xff]  }
 0x319   :  { %5165 = vmatpush1.bf16.msra.mxu0 %v6929_v21  ;;  %v6983_v21 = vld [vmem:[#allocation9 + $0xf0] ss:$28 sps:$4 sm:$0xff]  }
 0x31a   :  { %5311 = vmatpush1.bf16.msra.mxu1 %v6932_v22  ;;  %5166 = vmatprep.subr.bf16.mxu0 %v6937_v23  ;;  %v6986_v22 = vld [vmem:[#allocation9 + $0xcf0] ss:$28 sps:$4 sm:$0xff]  }
 0x31b   :  { %5312 = vmatprep.subr.bf16.mxu1 %v6940_v24  ;;  %v6991_v23 = vld [vmem:[#allocation9 + $0x12c] ss:$28 sps:$4 sm:$0xff]  }
 0x31c   :  { %v6994_v24 = vld [vmem:[#allocation9 + $0xd2c] ss:$28 sps:$4 sm:$0xff]  }
 0x31d   :  { %5167 = vmatpush1.bf16.msra.mxu0 %v6935_v47  ;;  %v6989_v47 = vld [vmem:[#allocation9 + $0x128] ss:$28 sps:$4 sm:$0xff]  }
 0x31e   :  { %5313 = vmatpush1.bf16.msra.mxu1 %v6938_v25  ;;  %5168 = vmatprep.subr.bf16.mxu0 %v6943_v26  ;;  %v6992_v25 = vld [vmem:[#allocation9 + $0xd28] ss:$28 sps:$4 sm:$0xff]  }
 0x31f   :  { %5314 = vmatprep.subr.bf16.mxu1 %v6946_v27  ;;  %v6997_v26 = vld [vmem:[#allocation9 + $0x164] ss:$28 sps:$4 sm:$0xff]  }
 0x320   :  { %v7000_v27 = vld [vmem:[#allocation9 + $0xd64] ss:$28 sps:$4 sm:$0xff]  }
 0x321   :  { %5169 = vmatpush1.bf16.msra.mxu0 %v6941_v29  ;;  %v6995_v29 = vld [vmem:[#allocation9 + $0x160] ss:$28 sps:$4 sm:$0xff]  }
 0x322   :  { %5315 = vmatpush1.bf16.msra.mxu1 %v6944_v31  ;;  %5170 = vmatprep.subr.bf16.mxu0 %v6949_v32  ;;  %v7003_v31 = vld [vmem:[#allocation9 + $0x19c] ss:$28 sps:$4 sm:$0xff]  }
 0x323   :  { %v2143_v39 = vpop.f32.mrb[12].mxu1  ;;  %5316 = vmatprep.subr.bf16.mxu1 %v6952_v33  ;;  %v7006_v32 = vld [vmem:[#allocation9 + $0xd9c] ss:$28 sps:$4 sm:$0xff]  }
 0x324   :  { %v6527_v42 = vadd.f32 %v2143_v39, %v529_v35  ;;  %v2145_v43 = vpop.f32.mrb[13].mxu1  ;;  %v7001_v33 = vld [vmem:[#allocation9 + $0x198] ss:$28 sps:$4 sm:$0xff]  }
 0x325   :  { %v6528_v44 = vadd.f32 %v2145_v43, %v533_v37  ;;  %5171 = vmatpush1.bf16.msra.mxu0 %v6947_v36  ;;  %v2147_v48 = vpop.f32.mrb[14].mxu1  ;;  %v7009_v35 = vld [vmem:[#allocation9 + $0x1d4] ss:$28 sps:$4 sm:$0xff]   ;;  %v7020_v43 = vld [vmem:[#allocation9 + $0x244] ss:$28 sps:$4 sm:$0xff]  }
 0x326   :  { %v2156_v51 = vmax.f32 %v6527_v42, 0.0  ;;  %5317 = vmatpush1.bf16.msra.mxu1 %v6950_v46  ;;  %v2148_v53 = vpop.f32.mrb[15].mxu1  ;;  %5172 = vmatprep.subr.bf16.mxu0 %v6955_v38  ;;  %v7012_v36 = vld [vmem:[#allocation9 + $0xdd4] ss:$28 sps:$4 sm:$0xff]   ;;  %v7015_v38 = vld [vmem:[#allocation9 + $0x20c] ss:$28 sps:$4 sm:$0xff]  }
 0x327   :  { %v2157_v45 = vmax.f32 %v6528_v44, 0.0  ;;  %5318 = vmatprep.subr.bf16.mxu1 %v6958_v41  ;;  %v7007_v37 = vld [vmem:[#allocation9 + $0x1d0] ss:$28 sps:$4 sm:$0xff]   ;;  %v7016_v39 = vld [vmem:[#allocation9 + $0x1d8] ss:$28 sps:$4 sm:$0xff]  }
 0x328   :  { %v7634_v61 = vpack.c.bf16 %v2156_v51, %v2156_v51  ;;  %v7010_v46 = vld [vmem:[#allocation9 + $0xdd0] ss:$28 sps:$4 sm:$0xff]   ;;  %v7013_v41 = vld [vmem:[#allocation9 + $0x208] ss:$28 sps:$4 sm:$0xff]   ;;  %v7017_v42 = vld [vmem:[#allocation9 + $0x18] ss:$28 sps:$4 sm:$0xff]  }
 0x329   :  { %v7632_v59 = vpack.c.bf16 %v2157_v45, %v2157_v45  ;;  %5173 = vmatpush1.bf16.msra.mxu0 %v6953_v49  ;;  %v7021_v44 = vld [vmem:[#allocation9 + $0x210] ss:$28 sps:$4 sm:$0xff]   ;;  %v7018_v48 = vld [vmem:[#allocation9 + $0x240] ss:$28 sps:$4 sm:$0xff]   ;;  %v7026_v53 = vld [vmem:[#allocation9 + $0x248] ss:$28 sps:$4 sm:$0xff]  }
 0x32a   :  { %5319 = vmatpush1.bf16.msra.mxu1 %v6956_v55  ;;  %5347 = vmatprep.subr.bf16.mxu0 %v6961_v57  ;;  %v7022_v49 = vld [vmem:[#allocation9 + $0x50] ss:$28 sps:$4 sm:$0xff]   ;;  %v7025_v51 = vld [vmem:[#allocation9 + $0x27c] ss:$28 sps:$4 sm:$0xff]   ;;  %v7027_v57 = vld [vmem:[#allocation9 + $0x88] ss:$28 sps:$4 sm:$0xff]  }
 0x32b   :  { %5174 = vmatprep.mubr.bf16.mxu0 %v7632_v59  ;;  %5338 = vmatprep.mubr.bf16.mxu1 %v7632_v59  ;;  %v7023_v55 = vld [vmem:[#allocation9 + $0x278] ss:$28 sps:$4 sm:$0xff]  }
 0x32c   :  { %5175 = vmatmul.mubr.bf16.vlgmr.msra.gmra.mrb[12].mxu0 %v7634_v61  ;;  %5320 = vmatprep.subr.bf16.mxu1 %v6964_v58  ;;  %v7030_v45 = vld [vmem:[#allocation9 + $0x2b4] ss:$28 sps:$4 sm:$0xff]   ;;  %v7031_v58 = vld [vmem:[#allocation9 + $0x280] ss:$28 sps:$4 sm:$0xff]  }
 0x32d   :  { %5348 = vmatpush1.bf16.msra.mxu0 %v6959_v60  ;;  %5379 = vmatprep.mubr.bf16.mxu0 %v7588_v52  ;;  %v7028_v60 = vld [vmem:[#allocation9 + $0x2b0] ss:$28 sps:$4 sm:$0xff]  }
 0x32e   :  { %5321 = vmatpush1.bf16.msra.mxu1 %v6962_v62  ;;  %5349 = vmatprep.subr.bf16.mxu0 %v6967_v63  ;;  %v7032_v62 = vld [vmem:[#allocation9 + $0xc0] ss:$28 sps:$4 sm:$0xff]   ;;  %v7035_v63 = vld [vmem:[#allocation9 + $0x2ec] ss:$28 sps:$4 sm:$0xff]  }
 0x32f   :  { %5322 = vmatprep.subr.bf16.mxu1 %v6970_v0  ;;  %v7033_v0 = vld [vmem:[#allocation9 + $0x2e8] ss:$28 sps:$4 sm:$0xff]  }
 0x331   :  { %5350 = vmatpush1.bf16.msra.mxu0 %v6965_v1  ;;  %v7037_v1 = vld [vmem:[#allocation9 + $0xf8] ss:$28 sps:$4 sm:$0xff]  }
 0x332   :  { %5323 = vmatpush1.bf16.msra.mxu1 %v6968_v3  ;;  %5351 = vmatprep.subr.bf16.mxu0 %v6973_v5  ;;  %v7040_v3 = vld [vmem:[#allocation9 + $0x324] ss:$28 sps:$4 sm:$0xff]   ;;  %v7041_v5 = vld [vmem:[#allocation9 + $0x2f0] ss:$28 sps:$4 sm:$0xff]  }
 0x333   :  { %5324 = vmatprep.subr.bf16.mxu1 %v6976_v7  ;;  %v7038_v7 = vld [vmem:[#allocation9 + $0x320] ss:$28 sps:$4 sm:$0xff]  }
 0x335   :  { %5352 = vmatpush1.bf16.msra.mxu0 %v6971_v8  ;;  %v7042_v8 = vld [vmem:[#allocation9 + $0x130] ss:$28 sps:$4 sm:$0xff]  }
 0x336   :  { %5325 = vmatpush1.bf16.msra.mxu1 %v6974_v10  ;;  %5353 = vmatprep.subr.bf16.mxu0 %v6979_v11  ;;  %v7045_v10 = vld [vmem:[#allocation9 + $0x35c] ss:$28 sps:$4 sm:$0xff]   ;;  %v7046_v11 = vld [vmem:[#allocation9 + $0x328] ss:$28 sps:$4 sm:$0xff]  }
 0x337   :  { %5326 = vmatprep.subr.bf16.mxu1 %v6982_v12  ;;  %v7043_v12 = vld [vmem:[#allocation9 + $0x358] ss:$28 sps:$4 sm:$0xff]  }
 0x339   :  { %5354 = vmatpush1.bf16.msra.mxu0 %v6977_v50  ;;  %v7047_v50 = vld [vmem:[#allocation9 + $0x168] ss:$28 sps:$4 sm:$0xff]  }
 0x33a   :  { %5327 = vmatpush1.bf16.msra.mxu1 %v6980_v13  ;;  %5355 = vmatprep.subr.bf16.mxu0 %v6985_v14  ;;  %v7050_v13 = vld [vmem:[#allocation9 + $0x394] ss:$28 sps:$4 sm:$0xff]   ;;  %v7051_v14 = vld [vmem:[#allocation9 + $0x360] ss:$28 sps:$4 sm:$0xff]  }
 0x33b   :  { %5328 = vmatprep.subr.bf16.mxu1 %v6988_v17  ;;  %v7048_v17 = vld [vmem:[#allocation9 + $0x390] ss:$28 sps:$4 sm:$0xff]  }
 0x33d   :  { %5356 = vmatpush1.bf16.msra.mxu0 %v6983_v21  ;;  %v7052_v21 = vld [vmem:[#allocation9 + $0x1a0] ss:$28 sps:$4 sm:$0xff]  }
 0x33e   :  { %5329 = vmatpush1.bf16.msra.mxu1 %v6986_v22  ;;  %5357 = vmatprep.subr.bf16.mxu0 %v6991_v23  ;;  %v7055_v22 = vld [vmem:[#allocation9 + $0x3cc] ss:$28 sps:$4 sm:$0xff]   ;;  %v7056_v23 = vld [vmem:[#allocation9 + $0x558] ss:$28 sps:$4 sm:$0xff]  }
 0x33f   :  { %5330 = vmatprep.subr.bf16.mxu1 %v6994_v24  ;;  %v7053_v24 = vld [vmem:[#allocation9 + $0x3c8] ss:$28 sps:$4 sm:$0xff]  }
 0x341   :  { %5358 = vmatpush1.bf16.msra.mxu0 %v6989_v47  ;;  %v7057_v47 = vld [vmem:[#allocation9 + $0x398] ss:$28 sps:$4 sm:$0xff]  }
 0x342   :  { %5331 = vmatpush1.bf16.msra.mxu1 %v6992_v25  ;;  %5359 = vmatprep.subr.bf16.mxu0 %v6997_v26  ;;  %v7060_v25 = vld [vmem:[#allocation9 + $0x404] ss:$28 sps:$4 sm:$0xff]   ;;  %v7061_v26 = vld [vmem:[#allocation9 + $0x590] ss:$28 sps:$4 sm:$0xff]  }
 0x343   :  { %5332 = vmatprep.subr.bf16.mxu1 %v7000_v27  ;;  %v7058_v27 = vld [vmem:[#allocation9 + $0x400] ss:$28 sps:$4 sm:$0xff]  }
 0x345   :  { %5360 = vmatpush1.bf16.msra.mxu0 %v6995_v29  ;;  %v7062_v29 = vld [vmem:[#allocation9 + $0x3d0] ss:$28 sps:$4 sm:$0xff]  }
 0x346   :  { %5333 = vmatpush1.bf16.msra.mxu1 %v6998_v30  ;;  %5361 = vmatprep.subr.bf16.mxu0 %v7003_v31  ;;  %v7065_v30 = vld [vmem:[#allocation9 + $0x43c] ss:$28 sps:$4 sm:$0xff]   ;;  %v7066_v31 = vld [vmem:[#allocation9 + $0x5c8] ss:$28 sps:$4 sm:$0xff]  }
 0x347   :  { %5334 = vmatprep.subr.bf16.mxu1 %v7006_v32  ;;  %v7063_v32 = vld [vmem:[#allocation9 + $0x438] ss:$28 sps:$4 sm:$0xff]  }
 0x349   :  { %5362 = vmatpush1.bf16.msra.mxu0 %v7001_v33  ;;  %v7067_v33 = vld [vmem:[#allocation9 + $0x408] ss:$28 sps:$4 sm:$0xff]  }
 0x34a   :  { %5335 = vmatpush1.bf16.msra.mxu1 %v7004_v34  ;;  %5363 = vmatprep.subr.bf16.mxu0 %v7009_v35  ;;  %v7070_v34 = vld [vmem:[#allocation9 + $0x474] ss:$28 sps:$4 sm:$0xff]   ;;  %v7071_v35 = vld [vmem:[#allocation9 + $0x600] ss:$28 sps:$4 sm:$0xff]  }
 0x34b   :  { %5336 = vmatprep.subr.bf16.mxu1 %v7012_v36  ;;  %v7068_v36 = vld [vmem:[#allocation9 + $0x470] ss:$28 sps:$4 sm:$0xff]  }
 0x34d   :  { %5364 = vmatpush1.bf16.msra.mxu0 %v7007_v37  ;;  %v7075_v37 = vld [vmem:[#allocation9 + $0x4ac] ss:$28 sps:$4 sm:$0xff]  }
 0x34e   :  { %5337 = vmatpush1.bf16.msra.mxu1 %v7010_v46  ;;  %5365 = vmatprep.subr.bf16.mxu0 %v7015_v38  ;;  %v7073_v46 = vld [vmem:[#allocation9 + $0x4a8] ss:$28 sps:$4 sm:$0xff]   ;;  %v7077_v38 = vld [vmem:[#allocation9 + $0x478] ss:$28 sps:$4 sm:$0xff]  }
 0x34f   :  { %6431 = vmatprep.subr.bf16.mxu1 %v7016_v39  ;;  %v7080_v39 = vld [vmem:[#allocation9 + $0x4e4] ss:$28 sps:$4 sm:$0xff]  }
 0x351   :  { %5339 = vmatmul.mubr.bf16.vlgmr.msra.gmra.mrb[16].mxu1 %v7634_v61  ;;  %5366 = vmatpush1.bf16.msra.mxu0 %v7013_v41  ;;  %v7081_v41 = vld [vmem:[#allocation9 + $0x670] ss:$28 sps:$4 sm:$0xff]  }
 0x352   :  { %6432 = vmatpush3.bf16.msra.mxu1 %v7017_v42  ;;  %5543 = vmatprep.mubr.bf16.mxu1 %v7588_v52  ;;  %v7036_v52 = vld [vmem:[#allocation9 + $0x2b8] ss:$28 sps:$4 sm:$0xff]   ;;  %v7078_v42 = vld [vmem:[#allocation9 + $0x4e0] ss:$28 sps:$4 sm:$0xff]  }
 0x353   :  { %5367 = vmatprep.subr.bf16.mxu0 %v7020_v43  ;;  %6433 = vmatprep.subr.bf16.mxu1 %v7021_v44  ;;  %v7082_v43 = vld [vmem:[#allocation9 + $0x4b0] ss:$28 sps:$4 sm:$0xff]   ;;  %v7085_v44 = vld [vmem:[#allocation9 + $0x51c] ss:$28 sps:$4 sm:$0xff]  }
 0x355   :  { %5368 = vmatpush1.bf16.msra.mxu0 %v7018_v48  ;;  %v7086_v48 = vld [vmem:[#allocation9 + $0x6a8] ss:$28 sps:$4 sm:$0xff]  }
 0x356   :  { %6434 = vmatpush3.bf16.msra.mxu1 %v7022_v49  ;;  %5369 = vmatprep.subr.bf16.mxu0 %v7025_v51  ;;  %v7083_v49 = vld [vmem:[#allocation9 + $0x518] ss:$28 sps:$4 sm:$0xff]   ;;  %v7087_v51 = vld [vmem:[#allocation9 + $0x4e8] ss:$28 sps:$4 sm:$0xff]  }
 0x357   :  { %6435 = vmatprep.subr.bf16.mxu1 %v7026_v53  ;;  %v7090_v53 = vld [vmem:[#allocation9 + $0x554] ss:$28 sps:$4 sm:$0xff]  }
 0x359   :  { %5370 = vmatpush1.bf16.msra.mxu0 %v7023_v55  ;;  %v7091_v55 = vld [vmem:[#allocation9 + $0x6e0] ss:$28 sps:$4 sm:$0xff]  }
 0x35a   :  { %6436 = vmatpush3.bf16.msra.mxu1 %v7027_v57  ;;  %5371 = vmatprep.subr.bf16.mxu0 %v7030_v45  ;;  %v7088_v57 = vld [vmem:[#allocation9 + $0x550] ss:$28 sps:$4 sm:$0xff]   ;;  %v7092_v45 = vld [vmem:[#allocation9 + $0x520] ss:$28 sps:$4 sm:$0xff]  }
 0x35b   :  { %6437 = vmatprep.subr.bf16.mxu1 %v7031_v58  ;;  %v7095_v58 = vld [vmem:[#allocation9 + $0x58c] ss:$28 sps:$4 sm:$0xff]  }
 0x35d   :  { %5372 = vmatpush1.bf16.msra.mxu0 %v7028_v60  ;;  %v7096_v60 = vld [vmem:[#allocation9 + $0x8d8] ss:$28 sps:$4 sm:$0xff]  }
 0x35e   :  { %6438 = vmatpush3.bf16.msra.mxu1 %v7032_v62  ;;  %5373 = vmatprep.subr.bf16.mxu0 %v7035_v63  ;;  %v7093_v62 = vld [vmem:[#allocation9 + $0x588] ss:$28 sps:$4 sm:$0xff]   ;;  %v7097_v63 = vld [vmem:[#allocation9 + $0x718] ss:$28 sps:$4 sm:$0xff]  }
 0x35f   :  { %6439 = vmatprep.subr.bf16.mxu1 %v7036_v52  ;;  %v7100_v52 = vld [vmem:[#allocation9 + $0x5c4] ss:$28 sps:$4 sm:$0xff]  }
 0x361   :  { %5374 = vmatpush1.bf16.msra.mxu0 %v7033_v0  ;;  %v7101_v0 = vld [vmem:[#allocation9 + $0x910] ss:$28 sps:$4 sm:$0xff]  }
 0x362   :  { %6440 = vmatpush3.bf16.msra.mxu1 %v7037_v1  ;;  %5375 = vmatprep.subr.bf16.mxu0 %v7040_v3  ;;  %v7098_v1 = vld [vmem:[#allocation9 + $0x5c0] ss:$28 sps:$4 sm:$0xff]   ;;  %v7102_v3 = vld [vmem:[#allocation9 + $0x750] ss:$28 sps:$4 sm:$0xff]  }
 0x363   :  { %6441 = vmatprep.subr.bf16.mxu1 %v7041_v5  ;;  %v7105_v5 = vld [vmem:[#allocation9 + $0x5fc] ss:$28 sps:$4 sm:$0xff]  }
 0x365   :  { %5376 = vmatpush1.bf16.msra.mxu0 %v7038_v7  ;;  %v7106_v7 = vld [vmem:[#allocation9 + $0x948] ss:$28 sps:$4 sm:$0xff]  }
 0x366   :  { %6442 = vmatpush3.bf16.msra.mxu1 %v7042_v8  ;;  %5377 = vmatprep.subr.bf16.mxu0 %v7045_v10  ;;  %v7103_v8 = vld [vmem:[#allocation9 + $0x5f8] ss:$28 sps:$4 sm:$0xff]   ;;  %v7107_v10 = vld [vmem:[#allocation9 + $0x788] ss:$28 sps:$4 sm:$0xff]  }
 0x367   :  { %6443 = vmatprep.subr.bf16.mxu1 %v7046_v11  ;;  %v7110_v11 = vld [vmem:[#allocation9 + $0x634] ss:$28 sps:$4 sm:$0xff]  }
 0x369   :  { %5378 = vmatpush1.bf16.msra.mxu0 %v7043_v12  ;;  %v7111_v12 = vld [vmem:[#allocation9 + $0x980] ss:$28 sps:$4 sm:$0xff]  }
 0x36a   :  { %6444 = vmatpush3.bf16.msra.mxu1 %v7047_v50  ;;  %5388 = vmatprep.subr.bf16.mxu0 %v7050_v13  ;;  %v7108_v50 = vld [vmem:[#allocation9 + $0x630] ss:$28 sps:$4 sm:$0xff]   ;;  %v7112_v13 = vld [vmem:[#allocation9 + $0x7c0] ss:$28 sps:$4 sm:$0xff]  }
 0x36b   :  { %6445 = vmatprep.subr.bf16.mxu1 %v7051_v14  ;;  %v7115_v14 = vld [vmem:[#allocation9 + $0x66c] ss:$28 sps:$4 sm:$0xff]  }
 0x36c   :  { %5380 = vmatmul.mubr.bf16.vlgmr.msra.gmra.mrb[16].mxu0 %v7590_v56 }
 0x36d   :  { %5389 = vmatpush1.bf16.msra.mxu0 %v7048_v17  ;;  %5420 = vmatprep.mubr.bf16.mxu0 %v7607_v4  ;;  %v7116_v17 = vld [vmem:[#allocation9 + $0x9b8] ss:$28 sps:$4 sm:$0xff]  }
 0x36e   :  { %6446 = vmatpush3.bf16.msra.mxu1 %v7052_v21  ;;  %5390 = vmatprep.subr.bf16.mxu0 %v7055_v22  ;;  %v7113_v21 = vld [vmem:[#allocation9 + $0x668] ss:$28 sps:$4 sm:$0xff]   ;;  %v7117_v22 = vld [vmem:[#allocation9 + $0x7f8] ss:$28 sps:$4 sm:$0xff]  }
 0x36f   :  { %6453 = vmatprep.subr.bf16.mxu1 %v7056_v23  ;;  %v7120_v23 = vld [vmem:[#allocation9 + $0x6a4] ss:$28 sps:$4 sm:$0xff]  }
 0x371   :  { %5391 = vmatpush1.bf16.msra.mxu0 %v7053_v24  ;;  %5544 = vmatmul.mubr.bf16.vlgmr.msra.gmra.mrb[20].mxu1 %v7590_v56  ;;  %v7072_v56 = vld [vmem:[#allocation9 + $0x440] ss:$28 sps:$4 sm:$0xff]   ;;  %v7121_v24 = vld [vmem:[#allocation9 + $0x9f0] ss:$28 sps:$4 sm:$0xff]  }
 0x372   :  { %6454 = vmatpush3.bf16.msra.mxu1 %v7057_v47  ;;  %5583 = vmatprep.mubr.bf16.mxu1 %v7607_v4  ;;  %v7076_v4 = vld [vmem:[#allocation9 + $0x638] ss:$28 sps:$4 sm:$0xff]   ;;  %v7118_v47 = vld [vmem:[#allocation9 + $0x6a0] ss:$28 sps:$4 sm:$0xff]  }
 0x373   :  { %5392 = vmatprep.subr.bf16.mxu0 %v7060_v25  ;;  %6455 = vmatprep.subr.bf16.mxu1 %v7061_v26  ;;  %v7122_v25 = vld [vmem:[#allocation9 + $0x830] ss:$28 sps:$4 sm:$0xff]   ;;  %v7125_v26 = vld [vmem:[#allocation9 + $0x6dc] ss:$28 sps:$4 sm:$0xff]  }
 0x375   :  { %5393 = vmatpush1.bf16.msra.mxu0 %v7058_v27  ;;  %v7126_v27 = vld [vmem:[#allocation9 + $0xa28] ss:$28 sps:$4 sm:$0xff]  }
 0x376   :  { %6456 = vmatpush3.bf16.msra.mxu1 %v7062_v29  ;;  %5394 = vmatprep.subr.bf16.mxu0 %v7065_v30  ;;  %v7123_v29 = vld [vmem:[#allocation9 + $0x6d8] ss:$28 sps:$4 sm:$0xff]   ;;  %v7127_v30 = vld [vmem:[#allocation9 + $0x868] ss:$28 sps:$4 sm:$0xff]  }
 0x377   :  { %6457 = vmatprep.subr.bf16.mxu1 %v7066_v31  ;;  %v7130_v31 = vld [vmem:[#allocation9 + $0x714] ss:$28 sps:$4 sm:$0xff]  }
 0x379   :  { %5395 = vmatpush1.bf16.msra.mxu0 %v7063_v32  ;;  %v7131_v32 = vld [vmem:[#allocation9 + $0xa60] ss:$28 sps:$4 sm:$0xff]  }
 0x37a   :  { %6458 = vmatpush3.bf16.msra.mxu1 %v7067_v33  ;;  %5396 = vmatprep.subr.bf16.mxu0 %v7070_v34  ;;  %v7128_v33 = vld [vmem:[#allocation9 + $0x710] ss:$28 sps:$4 sm:$0xff]   ;;  %v7132_v34 = vld [vmem:[#allocation9 + $0x8a0] ss:$28 sps:$4 sm:$0xff]  }
 0x37b   :  { %6459 = vmatprep.subr.bf16.mxu1 %v7071_v35  ;;  %v7135_v35 = vld [vmem:[#allocation9 + $0x74c] ss:$28 sps:$4 sm:$0xff]  }
 0x37d   :  { %5397 = vmatpush1.bf16.msra.mxu0 %v7068_v36  ;;  %v7136_v36 = vld [vmem:[#allocation9 + $0xc58] ss:$28 sps:$4 sm:$0xff]  }
 0x37e   :  { %6460 = vmatpush3.bf16.msra.mxu1 %v7072_v56  ;;  %5398 = vmatprep.subr.bf16.mxu0 %v7075_v37  ;;  %v7133_v56 = vld [vmem:[#allocation9 + $0x748] ss:$28 sps:$4 sm:$0xff]   ;;  %v7137_v37 = vld [vmem:[#allocation9 + $0xa98] ss:$28 sps:$4 sm:$0xff]  }
 0x37f   :  { %6461 = vmatprep.subr.bf16.mxu1 %v7076_v4  ;;  %v7140_v4 = vld [vmem:[#allocation9 + $0x784] ss:$28 sps:$4 sm:$0xff]  }
 0x381   :  { %5399 = vmatpush1.bf16.msra.mxu0 %v7073_v46  ;;  %v7141_v46 = vld [vmem:[#allocation9 + $0xc90] ss:$28 sps:$4 sm:$0xff]  }
 0x382   :  { %6462 = vmatpush3.bf16.msra.mxu1 %v7077_v38  ;;  %5400 = vmatprep.subr.bf16.mxu0 %v7080_v39  ;;  %v7138_v38 = vld [vmem:[#allocation9 + $0x780] ss:$28 sps:$4 sm:$0xff]   ;;  %v7142_v39 = vld [vmem:[#allocation9 + $0xad0] ss:$28 sps:$4 sm:$0xff]  }
 0x383   :  { %6463 = vmatprep.subr.bf16.mxu1 %v7081_v41  ;;  %v7145_v41 = vld [vmem:[#allocation9 + $0x7bc] ss:$28 sps:$4 sm:$0xff]  }
 0x385   :  { %5401 = vmatpush1.bf16.msra.mxu0 %v7078_v42  ;;  %v7147_v42 = vld [vmem:[#allocation9 + $0xb08] ss:$28 sps:$4 sm:$0xff]  }
 0x386   :  { %6464 = vmatpush3.bf16.msra.mxu1 %v7082_v43  ;;  %5402 = vmatprep.subr.bf16.mxu0 %v7085_v44  ;;  %v7150_v43 = vld [vmem:[#allocation9 + $0x7f4] ss:$28 sps:$4 sm:$0xff]   ;;  %v7151_v44 = vld [vmem:[#allocation9 + $0xd00] ss:$28 sps:$4 sm:$0xff]  }
 0x387   :  { %6465 = vmatprep.subr.bf16.mxu1 %v7086_v48  ;;  %v7148_v48 = vld [vmem:[#allocation9 + $0x7f0] ss:$28 sps:$4 sm:$0xff]  }
 0x389   :  { %5403 = vmatpush1.bf16.msra.mxu0 %v7083_v49  ;;  %v7152_v49 = vld [vmem:[#allocation9 + $0xb40] ss:$28 sps:$4 sm:$0xff]  }
 0x38a   :  { %6466 = vmatpush3.bf16.msra.mxu1 %v7087_v51  ;;  %5404 = vmatprep.subr.bf16.mxu0 %v7090_v53  ;;  %v7155_v51 = vld [vmem:[#allocation9 + $0x82c] ss:$28 sps:$4 sm:$0xff]   ;;  %v7156_v53 = vld [vmem:[#allocation9 + $0xd38] ss:$28 sps:$4 sm:$0xff]  }
 0x38b   :  { %6467 = vmatprep.subr.bf16.mxu1 %v7091_v55  ;;  %v7153_v55 = vld [vmem:[#allocation9 + $0x828] ss:$28 sps:$4 sm:$0xff]  }
 0x38d   :  { %5405 = vmatpush1.bf16.msra.mxu0 %v7088_v57  ;;  %v7157_v57 = vld [vmem:[#allocation9 + $0xb78] ss:$28 sps:$4 sm:$0xff]  }
 0x38e   :  { %6468 = vmatpush3.bf16.msra.mxu1 %v7092_v45  ;;  %5406 = vmatprep.subr.bf16.mxu0 %v7095_v58  ;;  %v7160_v45 = vld [vmem:[#allocation9 + $0x864] ss:$28 sps:$4 sm:$0xff]   ;;  %v7161_v58 = vld [vmem:[#allocation9 + $0xd70] ss:$28 sps:$4 sm:$0xff]  }
 0x38f   :  { %6475 = vmatprep.subr.bf16.mxu1 %v7096_v60  ;;  %v7158_v60 = vld [vmem:[#allocation9 + $0x860] ss:$28 sps:$4 sm:$0xff]  }
 0x391   :  { %5407 = vmatpush1.bf16.msra.mxu0 %v7093_v62  ;;  %5584 = vmatmul.mubr.bf16.vlgmr.msra.gmra.mrb[24].mxu1 %v7609_v6  ;;  %v7162_v62 = vld [vmem:[#allocation9 + $0xbb0] ss:$28 sps:$4 sm:$0xff]  }
 0x392   :  { %6476 = vmatpush3.bf16.msra.mxu1 %v7097_v63  ;;  %5623 = vmatprep.mubr.bf16.mxu1 %v7611_v9  ;;  %v7165_v63 = vld [vmem:[#allocation9 + $0x89c] ss:$28 sps:$4 sm:$0xff]  }
 0x393   :  { %5408 = vmatprep.subr.bf16.mxu0 %v7100_v52  ;;  %6477 = vmatprep.subr.bf16.mxu1 %v7101_v0  ;;  %v7166_v52 = vld [vmem:[#allocation9 + $0xda8] ss:$28 sps:$4 sm:$0xff]   ;;  %v7163_v0 = vld [vmem:[#allocation9 + $0x898] ss:$28 sps:$4 sm:$0xff]  }
 0x395   :  { %5409 = vmatpush1.bf16.msra.mxu0 %v7098_v1  ;;  %v7167_v1 = vld [vmem:[#allocation9 + $0xbe8] ss:$28 sps:$4 sm:$0xff]  }
 0x396   :  { %6478 = vmatpush3.bf16.msra.mxu1 %v7102_v3  ;;  %5410 = vmatprep.subr.bf16.mxu0 %v7105_v5  ;;  %v7170_v3 = vld [vmem:[#allocation9 + $0x8d4] ss:$28 sps:$4 sm:$0xff]   ;;  %v7171_v5 = vld [vmem:[#allocation9 + $0xde0] ss:$28 sps:$4 sm:$0xff]  }
 0x397   :  { %6479 = vmatprep.subr.bf16.mxu1 %v7106_v7  ;;  %v7168_v7 = vld [vmem:[#allocation9 + $0x8d0] ss:$28 sps:$4 sm:$0xff]  }
 0x399   :  { %5411 = vmatpush1.bf16.msra.mxu0 %v7103_v8  ;;  %v7172_v8 = vld [vmem:[#allocation9 + $0xc20] ss:$28 sps:$4 sm:$0xff]  }
 0x39a   :  { %6480 = vmatpush3.bf16.msra.mxu1 %v7107_v10  ;;  %5412 = vmatprep.subr.bf16.mxu0 %v7110_v11  ;;  %v7175_v10 = vld [vmem:[#allocation9 + $0x90c] ss:$28 sps:$4 sm:$0xff]  }
 0x39b   :  { %6481 = vmatprep.subr.bf16.mxu1 %v7111_v12  ;;  %v7173_v11 = vld [vmem:[#allocation9 + $0x908] ss:$28 sps:$4 sm:$0xff]  }
 0x39c   :  { %v7178_v12 = vld [vmem:[#allocation9 + $0x944] ss:$28 sps:$4 sm:$0xff]  }
 0x39d   :  { %5413 = vmatpush1.bf16.msra.mxu0 %v7108_v50  ;;  %v7176_v50 = vld [vmem:[#allocation9 + $0x940] ss:$28 sps:$4 sm:$0xff]  }
 0x39e   :  { %6482 = vmatpush3.bf16.msra.mxu1 %v7112_v13  ;;  %5414 = vmatprep.subr.bf16.mxu0 %v7115_v14  ;;  %v7181_v13 = vld [vmem:[#allocation9 + $0x97c] ss:$28 sps:$4 sm:$0xff]  }
 0x39f   :  { %6483 = vmatprep.subr.bf16.mxu1 %v7116_v17  ;;  %v7179_v14 = vld [vmem:[#allocation9 + $0x978] ss:$28 sps:$4 sm:$0xff]  }
 0x3a0   :  { %v7184_v17 = vld [vmem:[#allocation9 + $0x9b4] ss:$28 sps:$4 sm:$0xff]  }
 0x3a1   :  { %5415 = vmatpush1.bf16.msra.mxu0 %v7113_v21  ;;  %v7182_v21 = vld [vmem:[#allocation9 + $0x9b0] ss:$28 sps:$4 sm:$0xff]  }
 0x3a2   :  { %6484 = vmatpush3.bf16.msra.mxu1 %v7117_v22  ;;  %5416 = vmatprep.subr.bf16.mxu0 %v7120_v23  ;;  %v7187_v22 = vld [vmem:[#allocation9 + $0x9ec] ss:$28 sps:$4 sm:$0xff]  }
 0x3a3   :  { %6485 = vmatprep.subr.bf16.mxu1 %v7121_v24  ;;  %v7185_v23 = vld [vmem:[#allocation9 + $0x9e8] ss:$28 sps:$4 sm:$0xff]  }
 0x3a4   :  { %v7190_v24 = vld [vmem:[#allocation9 + $0xa24] ss:$28 sps:$4 sm:$0xff]  }
 0x3a5   :  { %5417 = vmatpush1.bf16.msra.mxu0 %v7118_v47  ;;  %v7188_v47 = vld [vmem:[#allocation9 + $0xa20] ss:$28 sps:$4 sm:$0xff]  }
 0x3a6   :  { %6486 = vmatpush3.bf16.msra.mxu1 %v7122_v25  ;;  %5418 = vmatprep.subr.bf16.mxu0 %v7125_v26  ;;  %v7193_v25 = vld [vmem:[#allocation9 + $0xa5c] ss:$28 sps:$4 sm:$0xff]  }
 0x3a7   :  { %6487 = vmatprep.subr.bf16.mxu1 %v7126_v27  ;;  %v7191_v26 = vld [vmem:[#allocation9 + $0xa58] ss:$28 sps:$4 sm:$0xff]  }
 0x3a8   :  { %v7196_v27 = vld [vmem:[#allocation9 + $0xa94] ss:$28 sps:$4 sm:$0xff]  }
 0x3a9   :  { %5419 = vmatpush1.bf16.msra.mxu0 %v7123_v29  ;;  %v7194_v29 = vld [vmem:[#allocation9 + $0xa90] ss:$28 sps:$4 sm:$0xff]  }
 0x3aa   :  { %6488 = vmatpush3.bf16.msra.mxu1 %v7127_v30  ;;  %5429 = vmatprep.subr.bf16.mxu0 %v7130_v31  ;;  %v7199_v30 = vld [vmem:[#allocation9 + $0xacc] ss:$28 sps:$4 sm:$0xff]  }
 0x3ab   :  { %6489 = vmatprep.subr.bf16.mxu1 %v7131_v32  ;;  %v7197_v31 = vld [vmem:[#allocation9 + $0xac8] ss:$28 sps:$4 sm:$0xff]  }
 0x3ac   :  { %5421 = vmatmul.mubr.bf16.vlgmr.msra.gmra.mrb[16].mxu0 %v7609_v6  ;;  %v7146_v6 = vld [vmem:[#allocation9 + $0xcc8] ss:$28 sps:$4 sm:$0xff]  }
 0x3ad   :  { %5430 = vmatpush1.bf16.msra.mxu0 %v7128_v33  ;;  %5461 = vmatprep.mubr.bf16.mxu0 %v7611_v9  ;;  %v7143_v9 = vld [vmem:[#allocation9 + $0x7b8] ss:$28 sps:$4 sm:$0xff]   ;;  %v7202_v32 = vld [vmem:[#allocation9 + $0xb04] ss:$28 sps:$4 sm:$0xff]  }
 0x3ae   :  { %6490 = vmatpush3.bf16.msra.mxu1 %v7132_v34  ;;  %5431 = vmatprep.subr.bf16.mxu0 %v7135_v35  ;;  %v7200_v33 = vld [vmem:[#allocation9 + $0xb00] ss:$28 sps:$4 sm:$0xff]   ;;  %v7203_v35 = vld [vmem:[#allocation9 + $0xb38] ss:$28 sps:$4 sm:$0xff]  }
 0x3af   :  { %6497 = vmatprep.subr.bf16.mxu1 %v7136_v36  ;;  %v7205_v34 = vld [vmem:[#allocation9 + $0xb3c] ss:$28 sps:$4 sm:$0xff]   ;;  %v7208_v36 = vld [vmem:[#allocation9 + $0xb74] ss:$28 sps:$4 sm:$0xff]  }
 0x3b1   :  { %5432 = vmatpush1.bf16.msra.mxu0 %v7133_v56  ;;  %5624 = vmatmul.mubr.bf16.vlgmr.msra.gmra.mrb[28].mxu1 %v7624_v28  ;;  %v7206_v56 = vld [vmem:[#allocation9 + $0xb70] ss:$28 sps:$4 sm:$0xff]  }
 0x3b2   :  { %6498 = vmatpush3.bf16.msra.mxu1 %v7137_v37  ;;  %5663 = vmatprep.mubr.bf16.mxu1 %v7632_v59  ;;  %v7655_v37 = vld [vmem:[#allocation10] sm:$0xff] }
 0x3b3   :  { %5433 = vmatprep.subr.bf16.mxu0 %v7140_v4  ;;  %6499 = vmatprep.subr.bf16.mxu1 %v7141_v46  ;;  %v7209_v4 = vld [vmem:[#allocation9 + $0xba8] ss:$28 sps:$4 sm:$0xff]   ;;  %v2687_v46 = vrot.slane %v7655_v37, %v7547_v18  ;;  %v7220_v18 = vld [vmem:[#allocation9 + $0xc54] ss:$28 sps:$4 sm:$0xff]  }
 0x3b5   :  { %5434 = vmatpush1.bf16.msra.mxu0 %v7138_v38  ;;  %v7214_v38 = vld [vmem:[#allocation9 + $0xbe4] ss:$28 sps:$4 sm:$0xff]  }
 0x3b6   :  { %6500 = vmatpush3.bf16.msra.mxu1 %v7142_v39  ;;  %5435 = vmatprep.subr.bf16.mxu0 %v7145_v41 }
 0x3b7   :  { %6501 = vmatprep.subr.bf16.mxu1 %v7146_v6 }
 0x3b9   :  { %5436 = vmatpush1.bf16.msra.mxu0 %v7143_v9 }
 0x3ba   :  { %6502 = vmatpush3.bf16.msra.mxu1 %v7147_v42  ;;  %5437 = vmatprep.subr.bf16.mxu0 %v7150_v43  ;;  %v7212_v43 = vld [vmem:[#allocation9 + $0xbe0] ss:$28 sps:$4 sm:$0xff]  }
 0x3bb   :  { %6503 = vmatprep.subr.bf16.mxu1 %v7151_v44 }
 0x3bd   :  { %5438 = vmatpush1.bf16.msra.mxu0 %v7148_v48 }
 0x3be   :  { %6504 = vmatpush3.bf16.msra.mxu1 %v7152_v49  ;;  %5439 = vmatprep.subr.bf16.mxu0 %v7155_v51  ;;  %v7217_v49 = vld [vmem:[#allocation9 + $0xc1c] ss:$28 sps:$4 sm:$0xff]  }
 0x3bf   :  { %6505 = vmatprep.subr.bf16.mxu1 %v7156_v53 }
 0x3c1   :  { %5440 = vmatpush1.bf16.msra.mxu0 %v7153_v55  ;;  %v7215_v55 = vld [vmem:[#allocation9 + $0xc18] ss:$28 sps:$4 sm:$0xff]  }
 0x3c2   :  { %6506 = vmatpush3.bf16.msra.mxu1 %v7157_v57  ;;  %5441 = vmatprep.subr.bf16.mxu0 %v7160_v45  ;;  %v7218_v57 = vld [vmem:[#allocation9 + $0xc50] ss:$28 sps:$4 sm:$0xff]  }
 0x3c3   :  { %6507 = vmatprep.subr.bf16.mxu1 %v7161_v58  ;;  %v7223_v45 = vld [vmem:[#allocation9 + $0xc8c] ss:$28 sps:$4 sm:$0xff]  }
 0x3c4   :  { %v7221_v58 = vld [vmem:[#allocation9 + $0xc88] ss:$28 sps:$4 sm:$0xff]  }
 0x3c5   :  { %5442 = vmatpush1.bf16.msra.mxu0 %v7158_v60  ;;  %v7226_v60 = vld [vmem:[#allocation9 + $0xcc4] ss:$28 sps:$4 sm:$0xff]  }
 0x3c6   :  { %6508 = vmatpush3.bf16.msra.mxu1 %v7162_v62  ;;  %5443 = vmatprep.subr.bf16.mxu0 %v7165_v63 }
 0x3c7   :  { %6509 = vmatprep.subr.bf16.mxu1 %v7166_v52 }
 0x3c9   :  { %5444 = vmatpush1.bf16.msra.mxu0 %v7163_v0  ;;  %v7224_v0 = vld [vmem:[#allocation9 + $0xcc0] ss:$28 sps:$4 sm:$0xff]  }
 0x3ca   :  { %6510 = vmatpush3.bf16.msra.mxu1 %v7167_v1  ;;  %5445 = vmatprep.subr.bf16.mxu0 %v7170_v3  ;;  %v7229_v3 = vld [vmem:[#allocation9 + $0xcfc] ss:$28 sps:$4 sm:$0xff]  }
 0x3cb   :  { %6511 = vmatprep.subr.bf16.mxu1 %v7171_v5  ;;  %v7227_v5 = vld [vmem:[#allocation9 + $0xcf8] ss:$28 sps:$4 sm:$0xff]  }
 0x3cd   :  { %5446 = vmatpush1.bf16.msra.mxu0 %v7168_v7  ;;  %v7232_v7 = vld [vmem:[#allocation9 + $0xd34] ss:$28 sps:$4 sm:$0xff]  }
 0x3ce   :  { %6512 = vmatpush3.bf16.msra.mxu1 %v7172_v8  ;;  %5447 = vmatprep.subr.bf16.mxu0 %v7175_v10  ;;  %v7230_v8 = vld [vmem:[#allocation9 + $0xd30] ss:$28 sps:$4 sm:$0xff]  }
 0x3cf   :  { %v7235_v10 = vld [vmem:[#allocation9 + $0xd6c] ss:$28 sps:$4 sm:$0xff]  }
 0x3d1   :  { %5448 = vmatpush1.bf16.msra.mxu0 %v7173_v11  ;;  %5664 = vmatmul.mubr.bf16.vlgmr.msra.gmra.mrb[32].mxu1 %v7634_v61 }
 0x3d2   :  { %5449 = vmatprep.subr.bf16.mxu0 %v7178_v12  ;;  %v7233_v12 = vld [vmem:[#allocation9 + $0xd68] ss:$28 sps:$4 sm:$0xff]  }
 0x3d5   :  { %5450 = vmatpush1.bf16.msra.mxu0 %v7176_v50 }
 0x3d6   :  { %5451 = vmatprep.subr.bf16.mxu0 %v7181_v13  ;;  %v7238_v13 = vld [vmem:[#allocation9 + $0xda4] ss:$28 sps:$4 sm:$0xff]  }
 0x3d9   :  { %5452 = vmatpush1.bf16.msra.mxu0 %v7179_v14  ;;  %v2691_v14 = vrot.slane %v7655_v37, %v7550_v19 }
 0x3da   :  { %5453 = vmatprep.subr.bf16.mxu0 %v7184_v17  ;;  %v7236_v17 = vld [vmem:[#allocation9 + $0xda0] ss:$28 sps:$4 sm:$0xff]  }
 0x3dd   :  { %5454 = vmatpush1.bf16.msra.mxu0 %v7182_v21  ;;  %v2695_v21 = vrot.slane %v7655_v37, %v7553_v20 }
 0x3de   :  { %5455 = vmatprep.subr.bf16.mxu0 %v7187_v22  ;;  %v7241_v22 = vld [vmem:[#allocation9 + $0xddc] ss:$28 sps:$4 sm:$0xff]  }
 0x3e1   :  { %5456 = vmatpush1.bf16.msra.mxu0 %v7185_v23 }
 0x3e2   :  { %5457 = vmatprep.subr.bf16.mxu0 %v7190_v24 }
 0x3e5   :  { %5458 = vmatpush1.bf16.msra.mxu0 %v7188_v47 }
 0x3e6   :  { %5459 = vmatprep.subr.bf16.mxu0 %v7193_v25  ;;  %v7239_v25 = vld [vmem:[#allocation9 + $0xdd8] ss:$28 sps:$4 sm:$0xff]  }
 0x3e9   :  { %5460 = vmatpush1.bf16.msra.mxu0 %v7191_v26 }
 0x3ea   :  { %5470 = vmatprep.subr.bf16.mxu0 %v7196_v27 }
 0x3ec   :  { %5462 = vmatmul.mubr.bf16.vlgmr.msra.gmra.mrb[16].mxu0 %v7624_v28  ;;  %v7211_v28 = vld [vmem:[#allocation9 + $0xbac] ss:$28 sps:$4 sm:$0xff]  }
 0x3ed   :  { %5471 = vmatpush1.bf16.msra.mxu0 %v7194_v29  ;;  %5502 = vmatprep.mubr.bf16.mxu0 %v7632_v59  ;;  %v2683_v59 = vrot.slane %v7655_v37, %v7544_v16 }
 0x3ee   :  { %5472 = vmatprep.subr.bf16.mxu0 %v7199_v30 }
 0x3f1   :  { %5473 = vmatpush1.bf16.msra.mxu0 %v7197_v31 }
 0x3f2   :  { %5474 = vmatprep.subr.bf16.mxu0 %v7202_v32 }
 0x3f5   :  { %5475 = vmatpush1.bf16.msra.mxu0 %v7200_v33 }
 0x3f6   :  { %5476 = vmatprep.subr.bf16.mxu0 %v7205_v34 }
 0x3f9   :  { %5477 = vmatpush1.bf16.msra.mxu0 %v7203_v35 }
 0x3fa   :  { %5478 = vmatprep.subr.bf16.mxu0 %v7208_v36 }
 0x3fd   :  { %5479 = vmatpush1.bf16.msra.mxu0 %v7206_v56 }
 0x3fe   :  { %5480 = vmatprep.subr.bf16.mxu0 %v7211_v28 }
 0x3ff   :  { %v5176_v39 = vpop.f32.mrb[12].mxu0 }
 0x400   :  { %v6529_v41 = vadd.f32 %v5176_v39, %v2683_v59  ;;  %v5178_v6 = vpop.f32.mrb[13].mxu0 }
 0x401   :  { %v6530_v9 = vadd.f32 %v5178_v6, %v2687_v46  ;;  %5481 = vmatpush1.bf16.msra.mxu0 %v7209_v4  ;;  %v5180_v42 = vpop.f32.mrb[14].mxu0 }
 0x402   :  { %v5671_v44 = vsub.f32 0.0, %v6529_v41  ;;  %v5181_v48 = vpop.f32.mrb[15].mxu0  ;;  %5482 = vmatprep.subr.bf16.mxu0 %v7214_v38  ;;  %v2707_v38 = vrot.slane %v7655_v37, %v528_v54 }
 0x403   :  { %v5672_v51 = vsub.f32 0.0, %v6530_v9 }
 0x404   :  { %v5678_v16 = vmul.f32 1.442695, %v5671_v44 }
 0x405   :  { %v5680_v53 = vmul.f32 1.442695, %v5672_v51  ;;  %5483 = vmatpush1.bf16.msra.mxu0 %v7212_v43 }
 0x406   :  { %7242 = vpow2.f32 %v5678_v16  ;;  %5484 = vmatprep.subr.bf16.mxu0 %v7217_v49 }
 0x407   :  { %7244 = vpow2.f32 %v5680_v53 }
 0x409   :  { %5485 = vmatpush1.bf16.msra.mxu0 %v7215_v55 }
 0x40a   :  { %5486 = vmatprep.subr.bf16.mxu0 %v7220_v18 }
 0x40d   :  { %5487 = vmatpush1.bf16.msra.mxu0 %v7218_v57 }
 0x40e   :  { %5488 = vmatprep.subr.bf16.mxu0 %v7223_v45 }
 0x410   :  { %v7243_v62 = vpop.eup %7242 }
 0x411   :  { %v7245_v63 = vpop.eup %7244  ;;  %v5692_v52 = vadd.f32 1.0, %v7243_v62  ;;  %5489 = vmatpush1.bf16.msra.mxu0 %v7221_v58 }
 0x412   :  { %v5693_v1 = vadd.f32 1.0, %v7245_v63  ;;  %5490 = vmatprep.subr.bf16.mxu0 %v7226_v60 }
 0x413   :  { %7246 = vrcp.f32 %v5692_v52 }
 0x414   :  { %7248 = vrcp.f32 %v5693_v1 }
 0x415   :  { %5491 = vmatpush1.bf16.msra.mxu0 %v7224_v0 }
 0x416   :  { %5492 = vmatprep.subr.bf16.mxu0 %v7229_v3  ;;  %v2699_v3 = vrot.slane %v7655_v37, %v520_v2 }
 0x419   :  { %5493 = vmatpush1.bf16.msra.mxu0 %v7227_v5  ;;  %v2703_v5 = vrot.slane %v7655_v37, %v524_v40 }
 0x41a   :  { %5494 = vmatprep.subr.bf16.mxu0 %v7232_v7 }
 0x41d   :  { %v7247_v11 = vpop.eup %7246  ;;  %5495 = vmatpush1.bf16.msra.mxu0 %v7230_v8 }
 0x41e   :  { %v7249_v50 = vpop.eup %7248  ;;  %5706 = vst [vmem:[%s7703_s7] sm:$0xff] %v7247_v11  ;;  %5496 = vmatprep.subr.bf16.mxu0 %v7235_v10 }
 0x41f   :  { %5707 = vst [vmem:[%s7703_s7 + $0x8] sm:$0xff] %v7249_v50 }
 0x421   :  { %5497 = vmatpush1.bf16.msra.mxu0 %v7233_v12 }
 0x422   :  { %5498 = vmatprep.subr.bf16.mxu0 %v7238_v13 }
 0x424   :  { %v5340_v23 = vpop.f32.mrb[16].mxu1 }
 0x425   :  { %v6531_v24 = vadd.f32 %v5340_v23, %v2691_v14  ;;  %v5342_v47 = vpop.f32.mrb[17].mxu1  ;;  %5499 = vmatpush1.bf16.msra.mxu0 %v7236_v17 }
 0x426   :  { %v6532_v26 = vadd.f32 %v5342_v47, %v2695_v21  ;;  %v5344_v27 = vpop.f32.mrb[18].mxu1  ;;  %5500 = vmatprep.subr.bf16.mxu0 %v7241_v22 }
 0x427   :  { %v5673_v29 = vsub.f32 0.0, %v6531_v24  ;;  %v5345_v30 = vpop.f32.mrb[19].mxu1 }
 0x428   :  { %v5674_v31 = vsub.f32 0.0, %v6532_v26 }
 0x429   :  { %v5682_v32 = vmul.f32 1.442695, %v5673_v29  ;;  %5501 = vmatpush1.bf16.msra.mxu0 %v7239_v25 }
 0x42a   :  { %v5684_v19 = vmul.f32 1.442695, %v5674_v31 }
 0x42b   :  { %7250 = vpow2.f32 %v5682_v32 }
 0x42c   :  { %7252 = vpow2.f32 %v5684_v19  ;;  %5503 = vmatmul.mubr.bf16.vlgmr.msra.gmra.mrb[16].mxu0 %v7634_v61 }
 0x435   :  { %v7251_v20 = vpop.eup %7250 }
 0x436   :  { %v7253_v33 = vpop.eup %7252  ;;  %v5694_v34 = vadd.f32 1.0, %v7251_v20 }
 0x437   :  { %v5695_v35 = vadd.f32 1.0, %v7253_v33 }
 0x438   :  { %7254 = vrcp.f32 %v5694_v34 }
 0x439   :  { %7256 = vrcp.f32 %v5695_v35 }
 0x442   :  { %v7255_v36 = vpop.eup %7254 }
 0x443   :  { %v7257_v56 = vpop.eup %7256  ;;  %5708 = vst [vmem:[%s7703_s7 + $0x10] sm:$0xff] %v7255_v36 }
 0x444   :  { %5709 = vst [vmem:[%s7703_s7 + $0x18] sm:$0xff] %v7257_v56  ;;  %v6447_v28 = vpop.f32.mrb[20].mxu1 }
 0x445   :  { %v6448_v59 = vpop.f32.mrb[21].mxu1 }
 0x446   :  { %v6449_v4 = vadd.f32 %v6448_v59, %v6447_v28  ;;  %v6450_v61 = vpop.f32.mrb[22].mxu1 }
 0x447   :  { %v6451_v46 = vpop.f32.mrb[23].mxu1 }
 0x448   :  { %v5546_v6 = vadd.f32 %v6449_v4, %v2707_v38 }
 0x464   :  { %v6469_v39 = vpop.f32.mrb[24].mxu1 }
 0x465   :  { %v6470_v41 = vpop.f32.mrb[25].mxu1 }
 0x466   :  { %v6471_v9 = vadd.f32 %v6470_v41, %v6469_v39  ;;  %v6472_v42 = vpop.f32.mrb[26].mxu1 }
 0x467   :  { %v6473_v43 = vpop.f32.mrb[27].mxu1 }
 0x468   :  { %v5586_v44 = vadd.f32 %v6471_v9, %v5546_v6 }
 0x484   :  { %v6491_v48 = vpop.f32.mrb[28].mxu1 }
 0x485   :  { %v6492_v49 = vpop.f32.mrb[29].mxu1 }
 0x486   :  { %v6493_v51 = vadd.f32 %v6492_v49, %v6491_v48  ;;  %v6494_v16 = vpop.f32.mrb[30].mxu1 }
 0x487   :  { %v6495_v53 = vpop.f32.mrb[31].mxu1 }
 0x488   :  { %v5626_v55 = vadd.f32 %v6493_v51, %v5586_v44 }
 0x4a4   :  { %v6513_v18 = vpop.f32.mrb[32].mxu1 }
 0x4a5   :  { %v6514_v57 = vpop.f32.mrb[33].mxu1 }
 0x4a6   :  { %v6515_v45 = vadd.f32 %v6514_v57, %v6513_v18  ;;  %v6516_v58 = vpop.f32.mrb[34].mxu1 }
 0x4a7   :  { %v6517_v60 = vpop.f32.mrb[35].mxu1 }
 0x4a8   :  { %v5666_v62 = vadd.f32 %v6515_v45, %v5626_v55 }
 0x4aa   :  { %v5677_v54 = vsub.f32 0.0, %v5666_v62 }
 0x4ac   :  { %v5690_v63 = vmul.f32 1.442695, %v5677_v54 }
 0x4ae   :  { %7258 = vpow2.f32 %v5690_v63 }
 0x4b8   :  { %v7259_v52 = vpop.eup %7258 }
 0x4b9   :  { %v5698_v0 = vadd.f32 1.0, %v7259_v52 }
 0x4bb   :  { %7260 = vrcp.f32 %v5698_v0 }
 0x4c5   :  { %v7261_v1 = vpop.eup %7260 }
 0x4c6   :  { %5712 = vst [vmem:[%s7703_s7 + $0x30] sm:$0xff] %v7261_v1 }
 0x4ff   :  { %v5504_v7 = vpop.f32.mrb[16].mxu0 }
 0x500   :  { %v6533_v8 = vadd.f32 %v5504_v7, %v2699_v3  ;;  %v5506_v10 = vpop.f32.mrb[17].mxu0 }
 0x501   :  { %v6534_v11 = vadd.f32 %v5506_v10, %v2703_v5  ;;  %v5508_v12 = vpop.f32.mrb[18].mxu0 }
 0x502   :  { %v5675_v50 = vsub.f32 0.0, %v6533_v8  ;;  %v5509_v13 = vpop.f32.mrb[19].mxu0 }
 0x503   :  { %v5676_v14 = vsub.f32 0.0, %v6534_v11 }
 0x504   :  { %v5686_v17 = vmul.f32 1.442695, %v5675_v50 }
 0x505   :  { %v5688_v21 = vmul.f32 1.442695, %v5676_v14 }
 0x506   :  { %7262 = vpow2.f32 %v5686_v17 }
 0x507   :  { %7264 = vpow2.f32 %v5688_v21 }
 0x510   :  { %v7263_v22 = vpop.eup %7262 }
 0x511   :  { %v7265_v23 = vpop.eup %7264  ;;  %v5696_v24 = vadd.f32 1.0, %v7263_v22 }
 0x512   :  { %v5697_v2 = vadd.f32 1.0, %v7265_v23 }
 0x513   :  { %7266 = vrcp.f32 %v5696_v24 }
 0x514   :  { %7268 = vrcp.f32 %v5697_v2 }
 0x51d   :  { %v7267_v15 = vpop.eup %7266 }
 0x51e   :  { %v7269_v40 = vpop.eup %7268  ;;  %5710 = vst [vmem:[%s7703_s7 + $0x20] sm:$0xff] %v7267_v15 }
 0x51f   :  { %5711 = vst [vmem:[%s7703_s7 + $0x28] sm:$0xff] %v7269_v40 }
 0x520   :  { %5717 = vsyncpa [#allocation3], 1 }
 0x521   :  { %5718 = vsyncpa [#allocation5], 1 }
 0x522   :  { %5719 = vsyncpa [#allocation8], 1 }
 0x523   :  { %5720 = vsyncpa [#allocation11], 1 }

</bundles_post_ra>
